<compile_context>
chip_gen: v7x
topology: tpu7x:2x2x1
jax: 0.10.0
libtpu: 0.0.40
codegen_flags: <defaults>
</compile_context>

<pallas_src>
import functools

import jax
import jax.numpy as jnp
import numpy as np
from jax import lax
from jax.experimental import pallas as pl
from jax.experimental.pallas import tpu as pltpu


_MAXC = 32  # max channel count of any in-kernel activation (4 phases x 8 ch)


# ----------------------------------------------------------------------------
# The single fused Pallas kernel (one image per grid step)
# ----------------------------------------------------------------------------
def _refine_kernel(dmin_ref, dmax_ref, mask_l_ref, mask_r_ref, d0_ref, img_ref,
                   w1_ref, b1_ref, w2_ref, b2_ref, wd_ref, bd_ref,
                   w0_ref, b0_ref, w3d_ref, w3c_ref, b3_ref, wr_ref,
                   out_ref, pad_ref, *, h, w):
    """Whole refinement head for one image, entirely at half resolution.

    Activations: (C, h*w) with C on sublanes and h*w on lanes.  Full-res
    tensors live in 2x2 sub-pixel ("phase") space: channel = phase*C + c.
    """
    P = h * w
    padw = w + 1                       # halo so every tap offset stays in-bounds
    b = pl.program_id(0)
    dmin = dmin_ref[b]
    dmax = dmax_ref[b]

    # Zero the padded row buffer once per image; its halo columns implement the
    # convs' zero padding in VMEM (no jnp.pad / extra HBM traffic).
    pad_ref[...] = jnp.zeros(pad_ref.shape, jnp.float32)

    taps3 = [(dy, dx) for dy in (-1, 0, 1) for dx in (-1, 0, 1)]
    taps2 = [(dy, dx) for dy in (0, 1) for dx in (0, 1)]

    def conv(inputs, taps, bias_ref, relu):
        """inputs: [(x value (Cin, P), w_ref (T, Cout, Cin))]; taps: [(dy, dx)].

        Per tap: a statically-offset slice of the zero-haloed scratch, an
        optional 0/1 column mask (horizontal boundary), and one lane-dense
        (Cout, Cin) x (Cin, P) MXU matmul accumulated in f32.
        """
        acc = None
        for x, w_ref in inputs:
            cin = x.shape[0]
            pad_ref[0:cin, padw:padw + P] = x
            for t, (dy, dx) in enumerate(taps):
                start = padw + dy * w + dx
                patch = pad_ref[0:cin, start:start + P]
                if dx == -1:                      # left neighbour out of bounds
                    patch = patch * mask_l_ref[...]
                elif dx == 1:                     # right neighbour out of bounds
                    patch = patch * mask_r_ref[...]
                if cin == 1:                      # degenerate K=1: VPU broadcast
                    part = w_ref[t] * patch
                else:
                    part = lax.dot_general(
                        w_ref[t], patch,
                        dimension_numbers=(((1,), (0,)), ((), ())),
                        preferred_element_type=jnp.float32)
                acc = part if acc is None else acc + part
        if bias_ref is not None:
            acc = acc + bias_ref[...]
        if relu:
            acc = jnp.maximum(acc, 0.0)
        return acc

    # normalize the half-res depth
    dnorm = (d0_ref[0, :, :] - dmin) / (dmax - dmin)                 # (1, P)
    # conv1 -> conv2 (ConvBnReLU, half res)
    c1 = conv([(dnorm, w1_ref)], taps3, b1_ref, True)                # (8, P)
    cres = conv([(c1, w2_ref)], taps3, b2_ref, True)                 # (8, P)
    # ConvTranspose2d(8,8,3,s=2,p=1,op=1) + BN + ReLU as a 4-output-phase
    # 2x2-tap conv on conv_res (no zero-dilated buffer).
    dec = conv([(cres, wd_ref)], taps2, bd_ref, True)                # (32, P)
    # conv0 (full-res ConvBnReLU) on the space-to-depth image.
    c0 = conv([(img_ref[0, :, :], w0_ref)], taps3, b0_ref, True)     # (32, P)
    # conv3 on cat(deconv, conv0): weight split host-side -> no concat needed.
    c3 = conv([(dec, w3d_ref), (c0, w3c_ref)], taps3, b3_ref, True)  # (32, P)
    # final 1-channel residual conv (one channel per phase).
    res = conv([(c3, wr_ref)], taps3, None, False)                   # (4, P)

    # F.interpolate(scale_factor=2, mode='area') of dnorm == phase broadcast;
    # then de-normalize.  Lane-dense (4, P) store.
    out_ref[0, :, :] = ((dnorm + res) * (dmax - dmin) + dmin).astype(out_ref.dtype)


# ----------------------------------------------------------------------------
# Parameters (deterministic synthetic init), BN folding and weight transforms
# ----------------------------------------------------------------------------
def _conv_bn_init(k, cin, cout):
    k1, k2, k3, k4, k5 = jax.random.split(k, 5)
    w = 0.1 * jax.random.normal(k1, (cout, cin, 3, 3), jnp.float32)
    gamma = 1.0 + 0.1 * jax.random.normal(k2, (cout,), jnp.float32)
    beta = 0.1 * jax.random.normal(k3, (cout,), jnp.float32)
    mean = 0.1 * jax.random.normal(k4, (cout,), jnp.float32)
    var = 1.0 + 0.1 * jax.random.uniform(k5, (cout,), jnp.float32)
    return (w, gamma, beta, mean, var)


def init_raw_params(key):
    ks = jax.random.split(key, 7)
    return {
        "conv0": _conv_bn_init(ks[0], 3, 8),
        "conv1": _conv_bn_init(ks[1], 1, 8),
        "conv2": _conv_bn_init(ks[2], 8, 8),
        # ConvTranspose2d weight layout: (in_channels, out_channels, kh, kw)
        "deconv": 0.1 * jax.random.normal(ks[3], (8, 8, 3, 3), jnp.float32),
        "bn": _conv_bn_init(ks[4], 8, 8)[1:],  # (gamma, beta, mean, var)
        "conv3": _conv_bn_init(ks[5], 16, 8),
        "res": 0.1 * jax.random.normal(ks[6], (1, 8, 3, 3), jnp.float32),
    }


def _fold_bn(w_oihw, gamma, beta, mean, var, eps=1e-5):
    scale = gamma / jnp.sqrt(var + eps)
    return w_oihw * scale[:, None, None, None], beta - mean * scale


def _tap_major(w_oihw):
    """(O, I, 3, 3) -> (9, O, I) with tap t = ky*3 + kx, offset (ky-1, kx-1)."""
    o, i = w_oihw.shape[0], w_oihw.shape[1]
    return jnp.transpose(w_oihw, (2, 3, 0, 1)).reshape(9, o, i)


def _s2d_conv_weight(w_oihw):
    """Full-res 3x3 stride-1 conv -> half-res 3x3 conv on space-to-depth
    tensors (channel = phase*C + c, phase = py*2 + px).  Returns
    (4*O, 4*I, 3, 3)."""
    o, i = w_oihw.shape[0], w_oihw.shape[1]
    wp = jnp.zeros((2, 2, o, 2, 2, i, 3, 3), jnp.float32)
    for py in range(2):
        for px in range(2):
            for dy in range(3):
                for dx in range(3):
                    ay, ax = py + dy - 1, px + dx - 1
                    qy, ry = ay // 2, ay % 2
                    qx, rx = ax // 2, ax % 2
                    wp = wp.at[py, px, :, ry, rx, :, qy + 1, qx + 1].set(
                        w_oihw[:, :, dy, dx])
    return wp.reshape(4 * o, 4 * i, 3, 3)


def _s2d_deconv_weight(w_iokk):
    """ConvTranspose2d(8,8,3,stride=2,padding=1,output_padding=1) weight
    (I, O, 3, 3) -> equivalent half-res 2x2-tap conv with space-to-depth
    output: (4*O, I, 2, 2), tap offset = (sy, sx) in {0,1}^2."""
    i_ch, o_ch = w_iokk.shape[0], w_iokk.shape[1]
    wf = jnp.transpose(w_iokk[:, :, ::-1, ::-1], (1, 0, 2, 3))  # (O, I, ky, kx)
    wd = jnp.zeros((2, 2, o_ch, i_ch, 2, 2), jnp.float32)
    for py in range(2):
        for px in range(2):
            for sy in range(2):
                for sx in range(2):
                    ky, kx = 2 * sy + 1 - py, 2 * sx + 1 - px
                    if 0 <= ky < 3 and 0 <= kx < 3:
                        wd = wd.at[py, px, :, :, sy, sx].set(wf[:, :, ky, kx])
    return wd.reshape(4 * o_ch, i_ch, 2, 2)


def fold_params(raw, eps=1e-5):
    p = {}
    # conv1 / conv2: ordinary half-resolution 3x3 ConvBnReLU.
    for name in ("conv1", "conv2"):
        wgt, g, bb, m, v = raw[name]
        wf, bf = _fold_bn(wgt, g, bb, m, v, eps)
        p[name + "_w"] = _tap_major(wf)
        p[name + "_b"] = bf[:, None]
    # conv0: full-res 3x3 ConvBnReLU -> phase-space conv (32 <- 12 channels).
    wgt, g, bb, m, v = raw["conv0"]
    wf, bf = _fold_bn(wgt, g, bb, m, v, eps)
    p["conv0_w"] = _tap_major(_s2d_conv_weight(wf))
    p["conv0_b"] = jnp.tile(bf, 4)[:, None]
    # deconv + BN (ReLU in kernel) -> 4-phase 2x2-tap conv (32 <- 8 channels).
    g, bb, m, v = raw["bn"]
    scale = g / jnp.sqrt(v + eps)
    wd = _s2d_deconv_weight(raw["deconv"]) * jnp.tile(scale, 4)[:, None, None, None]
    p["deconv_w"] = jnp.transpose(wd, (2, 3, 0, 1)).reshape(4, wd.shape[0], wd.shape[1])
    p["deconv_b"] = jnp.tile(bb - m * scale, 4)[:, None]
    # conv3: full-res 16->8 ConvBnReLU -> phase conv; its input-channel axis is
    # split into the deconv part and the conv0 part so the kernel never
    # concatenates channels.
    wgt, g, bb, m, v = raw["conv3"]
    wf, bf = _fold_bn(wgt, g, bb, m, v, eps)
    w3 = _s2d_conv_weight(wf).reshape(32, 4, 16, 3, 3)
    p["conv3d_w"] = _tap_major(w3[:, :, :8].reshape(32, 32, 3, 3))
    p["conv3c_w"] = _tap_major(w3[:, :, 8:].reshape(32, 32, 3, 3))
    p["conv3_b"] = jnp.tile(bf, 4)[:, None]
    # res: full-res 8->1 conv (no bias / BN) -> phase conv (4 <- 32 channels).
    p["res_w"] = _tap_major(_s2d_conv_weight(raw["res"]))
    return p


# ----------------------------------------------------------------------------
# Forward pass (single fused pallas_call)
# ----------------------------------------------------------------------------
def refinement_forward(params, img, depth_0, depth_min, depth_max):
    B = img.shape[0]
    H, W = img.shape[2], img.shape[3]
    h, w = H // 2, W // 2
    P = h * w

    # Space-to-depth the image once (channel = phase*3 + c).  This is the only
    # full-resolution layout transform; everything else stays fused in VMEM.
    img_s2d = (img.astype(jnp.float32)
               .reshape(B, 3, h, 2, w, 2)
               .transpose(0, 3, 5, 1, 2, 4)
               .reshape(B, 12, P))
    d0 = depth_0.astype(jnp.float32).reshape(B, 1, P)
    dmin = depth_min.astype(jnp.float32)
    dmax = depth_max.astype(jnp.float32)

    # 0/1 masks for the +/-1 horizontal taps (vertical halos come from the
    # zero-padded VMEM row buffer inside the kernel).
    col = jnp.arange(P, dtype=jnp.int32) % w
    mask_l = (col >= 1).astype(jnp.float32).reshape(1, P)
    mask_r = (col < (w - 1)).astype(jnp.float32).reshape(1, P)

    wnames = ("conv1_w", "conv1_b", "conv2_w", "conv2_b",
              "deconv_w", "deconv_b", "conv0_w", "conv0_b",
              "conv3d_w", "conv3c_w", "conv3_b", "res_w")
    weights = [params[n] for n in wnames]

    def _wspec(a):
        if a.ndim == 3:
            return pl.BlockSpec(a.shape, lambda b: (0, 0, 0))
        return pl.BlockSpec(a.shape, lambda b: (0, 0))

    out_s2d = pl.pallas_call(
        functools.partial(_refine_kernel, h=h, w=w),
        out_shape=jax.ShapeDtypeStruct((B, 4, P), jnp.float32),
        grid=(B,),
        in_specs=[
            pl.BlockSpec(memory_space=pltpu.MemorySpace.SMEM),      # depth_min
            pl.BlockSpec(memory_space=pltpu.MemorySpace.SMEM),      # depth_max
            pl.BlockSpec((1, P), lambda b: (0, 0)),                 # mask_l
            pl.BlockSpec((1, P), lambda b: (0, 0)),                 # mask_r
            pl.BlockSpec((1, 1, P), lambda b: (b, 0, 0)),           # depth_0
            pl.BlockSpec((1, 12, P), lambda b: (b, 0, 0)),          # img (s2d)
        ] + [_wspec(a) for a in weights],
        out_specs=pl.BlockSpec((1, 4, P), lambda b: (b, 0, 0)),
        scratch_shapes=[pltpu.VMEM((_MAXC, P + 2 * (w + 1)), jnp.float32)],
        compiler_params=pltpu.CompilerParams(
            dimension_semantics=("parallel",)),
    )(dmin, dmax, mask_l, mask_r, d0, img_s2d, *weights)

    # Phase space -> (B, 1, H, W).
    out = out_s2d.reshape(B, 2, 2, h, w).transpose(0, 3, 1, 4, 2)
    return out.reshape(B, 1, H, W)


# ----------------------------------------------------------------------------
# Pure-JAX (lax.conv) reference for verification
# ----------------------------------------------------------------------------
def ref_forward(raw, img, depth_0, dmin, dmax):
    eps = 1e-5
    dn = ("NCHW", "OIHW", "NCHW")

    def conv(x, w_):
        return lax.conv_general_dilated(x, w_, (1, 1), ((1, 1), (1, 1)),
                                        dimension_numbers=dn)

    def bn(x, g, b, m, v):
        sh = (1, -1, 1, 1)
        return (x - m.reshape(sh)) / jnp.sqrt(v + eps).reshape(sh) \
            * g.reshape(sh) + b.reshape(sh)

    def cbr(x, pr):
        w_, g, b, m, v = pr
        return jax.nn.relu(bn(conv(x, w_), g, b, m, v))

    B = dmin.shape[0]
    dmin_ = dmin.reshape(B, 1, 1, 1)
    dmax_ = dmax.reshape(B, 1, 1, 1)
    depth = (depth_0 - dmin_) / (dmax_ - dmin_)
    conv0 = cbr(img, raw["conv0"])
    conv_res = cbr(cbr(depth, raw["conv1"]), raw["conv2"])
    w_eq = jnp.transpose(raw["deconv"][:, :, ::-1, ::-1], (1, 0, 2, 3))
    deconv_res = lax.conv_general_dilated(
        conv_res, w_eq, (1, 1), ((1, 2), (1, 2)),
        lhs_dilation=(2, 2), dimension_numbers=dn)
    g, b, m, v = raw["bn"]
    deconv = jax.nn.relu(bn(deconv_res, g, b, m, v))
    cat = jnp.concatenate([deconv, conv0], axis=1)
    res = conv(cbr(cat, raw["conv3"]), raw["res"])
    depth_up = jnp.repeat(jnp.repeat(depth, 2, axis=2), 2, axis=3)
    return (depth_up + res) * (dmax_ - dmin_) + dmin_


# ----------------------------------------------------------------------------
if __name__ == "__main__":
    key = jax.random.PRNGKey(0)
    kp, ki, kd, kmin, kmax = jax.random.split(key, 5)

    B, H, W = 2, 32, 32            # half-res flattened spatial = 256 (lane-aligned)
    h, w = H // 2, W // 2

    raw = init_raw_params(kp)
    params = fold_params(raw)

    img = jax.random.normal(ki, (B, 3, H, W), jnp.float32)
    depth_0 = jax.random.uniform(kd, (B, 1, h, w), jnp.float32, 1.0, 2.0)
    depth_min = jax.random.uniform(kmin, (B,), jnp.float32, 0.5, 1.0)
    depth_max = depth_min + jax.random.uniform(kmax, (B,), jnp.float32, 1.5, 2.5)

    fwd = jax.jit(refinement_forward)
    out = jax.block_until_ready(fwd(params, img, depth_0, depth_min, depth_max))
    assert out.shape == (B, 1, H, W)

    ref = ref_forward(raw, img, depth_0, depth_min, depth_max)
    # Tolerance covers default TPU matmul precision (bf16 passes) on both paths.
    np.testing.assert_allclose(np.asarray(out), np.asarray(ref),
                               rtol=5e-3, atol=5e-3)

    print("KERNEL_OK")
</pallas_src>

<mosaic_0001>
module attributes {stable_mosaic.version = 11 : i64} {
  func.func @_refine_kernel(%arg0: i32, %arg1: memref<2xf32, #tpu.memory_space<smem>>, %arg2: memref<2xf32, #tpu.memory_space<smem>>, %arg3: memref<1x256xf32, #tpu.memory_space<vmem>>, %arg4: memref<1x256xf32, #tpu.memory_space<vmem>>, %arg5: memref<1x1x256xf32, #tpu.memory_space<vmem>>, %arg6: memref<1x12x256xf32, #tpu.memory_space<vmem>>, %arg7: memref<9x8x1xf32, #tpu.memory_space<vmem>>, %arg8: memref<8x1xf32, #tpu.memory_space<vmem>>, %arg9: memref<9x8x8xf32, #tpu.memory_space<vmem>>, %arg10: memref<8x1xf32, #tpu.memory_space<vmem>>, %arg11: memref<4x32x8xf32, #tpu.memory_space<vmem>>, %arg12: memref<32x1xf32, #tpu.memory_space<vmem>>, %arg13: memref<9x32x12xf32, #tpu.memory_space<vmem>>, %arg14: memref<32x1xf32, #tpu.memory_space<vmem>>, %arg15: memref<9x32x32xf32, #tpu.memory_space<vmem>>, %arg16: memref<9x32x32xf32, #tpu.memory_space<vmem>>, %arg17: memref<32x1xf32, #tpu.memory_space<vmem>>, %arg18: memref<9x4x32xf32, #tpu.memory_space<vmem>>, %arg19: memref<1x4x256xf32, #tpu.memory_space<vmem>>, %arg20: memref<32x290xf32, #tpu.memory_space<vmem>>) attributes {dimension_semantics = [#tpu.dimension_semantics<parallel>], iteration_bounds = array<i64: 2>, scalar_prefetch = 0 : i64, scratch_operands = 1 : i64, tpu.core_type = #tpu.core_type<tc>, window_params = [{transform_indices = @transform_0, window_bounds = array<i64: 2>}, {transform_indices = @transform_1, window_bounds = array<i64: 2>}, {pipeline_mode = #tpu.pipeline_mode<synchronous>, transform_indices = @transform_2, window_bounds = array<i64: 1, 256>}, {pipeline_mode = #tpu.pipeline_mode<synchronous>, transform_indices = @transform_3, window_bounds = array<i64: 1, 256>}, {transform_indices = @transform_4, window_bounds = array<i64: 1, 1, 256>}, {transform_indices = @transform_5, window_bounds = array<i64: 1, 12, 256>}, {pipeline_mode = #tpu.pipeline_mode<synchronous>, transform_indices = @transform_6, window_bounds = array<i64: 9, 8, 1>}, {pipeline_mode = #tpu.pipeline_mode<synchronous>, transform_indices = @transform_7, window_bounds = array<i64: 8, 1>}, {pipeline_mode = #tpu.pipeline_mode<synchronous>, transform_indices = @transform_8, window_bounds = array<i64: 9, 8, 8>}, {pipeline_mode = #tpu.pipeline_mode<synchronous>, transform_indices = @transform_9, window_bounds = array<i64: 8, 1>}, {pipeline_mode = #tpu.pipeline_mode<synchronous>, transform_indices = @transform_10, window_bounds = array<i64: 4, 32, 8>}, {pipeline_mode = #tpu.pipeline_mode<synchronous>, transform_indices = @transform_11, window_bounds = array<i64: 32, 1>}, {pipeline_mode = #tpu.pipeline_mode<synchronous>, transform_indices = @transform_12, window_bounds = array<i64: 9, 32, 12>}, {pipeline_mode = #tpu.pipeline_mode<synchronous>, transform_indices = @transform_13, window_bounds = array<i64: 32, 1>}, {pipeline_mode = #tpu.pipeline_mode<synchronous>, transform_indices = @transform_14, window_bounds = array<i64: 9, 32, 32>}, {pipeline_mode = #tpu.pipeline_mode<synchronous>, transform_indices = @transform_15, window_bounds = array<i64: 9, 32, 32>}, {pipeline_mode = #tpu.pipeline_mode<synchronous>, transform_indices = @transform_16, window_bounds = array<i64: 32, 1>}, {pipeline_mode = #tpu.pipeline_mode<synchronous>, transform_indices = @transform_17, window_bounds = array<i64: 9, 4, 32>}, {transform_indices = @transform_18, window_bounds = array<i64: 1, 4, 256>}]} {
    %0 = arith.index_cast %arg0 : i32 to index
    %1 = memref.load %arg1[%0] : memref<2xf32, #tpu.memory_space<smem>>
    %2 = arith.index_cast %arg0 : i32 to index
    %3 = memref.load %arg2[%2] : memref<2xf32, #tpu.memory_space<smem>>
    %cst = arith.constant 0.000000e+00 : f32
    %4 = vector.broadcast %cst : f32 to vector<32x290xf32>
    %c0 = arith.constant 0 : index
    %c0_0 = arith.constant 0 : index
    %5 = vector.load %arg20[%c0, %c0_0] : memref<32x290xf32, #tpu.memory_space<vmem>>, vector<32x290xf32>
    tpu.vector_store %arg20[%c0, %c0_0], %4 {strides = array<i32>} : memref<32x290xf32, #tpu.memory_space<vmem>>, vector<32x290xf32>,
    %c0_1 = arith.constant 0 : index
    %c0_2 = arith.constant 0 : index
    %c0_3 = arith.constant 0 : index
    %6 = vector.load %arg5[%c0_1, %c0_2, %c0_3] : memref<1x1x256xf32, #tpu.memory_space<vmem>>, vector<1x1x256xf32>
    %7 = vector.shape_cast %6 : vector<1x1x256xf32> to vector<1x256xf32>
    %8 = vector.broadcast %1 : f32 to vector<1x256xf32>
    %9 = arith.subf %7, %8 : vector<1x256xf32>
    %10 = arith.subf %3, %1 : f32
    %11 = vector.broadcast %10 : f32 to vector<1x256xf32>
    %12 = arith.divf %9, %11 : vector<1x256xf32>
    %c0_4 = arith.constant 0 : index
    %c17 = arith.constant 17 : index
    %13 = vector.load %arg20[%c0_4, %c17] : memref<32x290xf32, #tpu.memory_space<vmem>>, vector<1x256xf32>
    tpu.vector_store %arg20[%c0_4, %c17], %12 {strides = array<i32>} : memref<32x290xf32, #tpu.memory_space<vmem>>, vector<1x256xf32>,
    %c0_5 = arith.constant 0 : index
    %c0_6 = arith.constant 0 : index
    %14 = vector.load %arg20[%c0_5, %c0_6] : memref<32x290xf32, #tpu.memory_space<vmem>>, vector<1x256xf32>
    %c0_7 = arith.constant 0 : index
    %c0_8 = arith.constant 0 : index
    %15 = vector.load %arg3[%c0_7, %c0_8] : memref<1x256xf32, #tpu.memory_space<vmem>>, vector<1x256xf32>
    %16 = arith.mulf %14, %15 : vector<1x256xf32>
    %c0_9 = arith.constant 0 : index
    %c0_10 = arith.constant 0 : index
    %c0_11 = arith.constant 0 : index
    %17 = vector.load %arg7[%c0_9, %c0_10, %c0_11] : memref<9x8x1xf32, #tpu.memory_space<vmem>>, vector<1x8x1xf32>
    %18 = vector.shape_cast %17 : vector<1x8x1xf32> to vector<8x1xf32>
    %19 = vector.broadcast %18 : vector<8x1xf32> to vector<8x256xf32>
    %20 = vector.broadcast %16 : vector<1x256xf32> to vector<8x256xf32>
    %21 = arith.mulf %19, %20 : vector<8x256xf32>
    %c0_12 = arith.constant 0 : index
    %c1 = arith.constant 1 : index
    %22 = vector.load %arg20[%c0_12, %c1] : memref<32x290xf32, #tpu.memory_space<vmem>>, vector<1x256xf32>
    %c1_13 = arith.constant 1 : index
    %c0_14 = arith.constant 0 : index
    %c0_15 = arith.constant 0 : index
    %23 = vector.load %arg7[%c1_13, %c0_14, %c0_15] : memref<9x8x1xf32, #tpu.memory_space<vmem>>, vector<1x8x1xf32>
    %24 = vector.shape_cast %23 : vector<1x8x1xf32> to vector<8x1xf32>
    %25 = vector.broadcast %24 : vector<8x1xf32> to vector<8x256xf32>
    %26 = vector.broadcast %22 : vector<1x256xf32> to vector<8x256xf32>
    %27 = arith.mulf %25, %26 : vector<8x256xf32>
    %28 = arith.addf %21, %27 : vector<8x256xf32>
    %c0_16 = arith.constant 0 : index
    %c2 = arith.constant 2 : index
    %29 = vector.load %arg20[%c0_16, %c2] : memref<32x290xf32, #tpu.memory_space<vmem>>, vector<1x256xf32>
    %c0_17 = arith.constant 0 : index
    %c0_18 = arith.constant 0 : index
    %30 = vector.load %arg4[%c0_17, %c0_18] : memref<1x256xf32, #tpu.memory_space<vmem>>, vector<1x256xf32>
    %31 = arith.mulf %29, %30 : vector<1x256xf32>
    %c2_19 = arith.constant 2 : index
    %c0_20 = arith.constant 0 : index
    %c0_21 = arith.constant 0 : index
    %32 = vector.load %arg7[%c2_19, %c0_20, %c0_21] : memref<9x8x1xf32, #tpu.memory_space<vmem>>, vector<1x8x1xf32>
    %33 = vector.shape_cast %32 : vector<1x8x1xf32> to vector<8x1xf32>
    %34 = vector.broadcast %33 : vector<8x1xf32> to vector<8x256xf32>
    %35 = vector.broadcast %31 : vector<1x256xf32> to vector<8x256xf32>
    %36 = arith.mulf %34, %35 : vector<8x256xf32>
    %37 = arith.addf %28, %36 : vector<8x256xf32>
    %c0_22 = arith.constant 0 : index
    %c16 = arith.constant 16 : index
    %38 = vector.load %arg20[%c0_22, %c16] : memref<32x290xf32, #tpu.memory_space<vmem>>, vector<1x256xf32>
    %c0_23 = arith.constant 0 : index
    %c0_24 = arith.constant 0 : index
    %39 = vector.load %arg3[%c0_23, %c0_24] : memref<1x256xf32, #tpu.memory_space<vmem>>, vector<1x256xf32>
    %40 = arith.mulf %38, %39 : vector<1x256xf32>
    %c3 = arith.constant 3 : index
    %c0_25 = arith.constant 0 : index
    %c0_26 = arith.constant 0 : index
    %41 = vector.load %arg7[%c3, %c0_25, %c0_26] : memref<9x8x1xf32, #tpu.memory_space<vmem>>, vector<1x8x1xf32>
    %42 = vector.shape_cast %41 : vector<1x8x1xf32> to vector<8x1xf32>
    %43 = vector.broadcast %42 : vector<8x1xf32> to vector<8x256xf32>
    %44 = vector.broadcast %40 : vector<1x256xf32> to vector<8x256xf32>
    %45 = arith.mulf %43, %44 : vector<8x256xf32>
    %46 = arith.addf %37, %45 : vector<8x256xf32>
    %c0_27 = arith.constant 0 : index
    %c17_28 = arith.constant 17 : index
    %47 = vector.load %arg20[%c0_27, %c17_28] : memref<32x290xf32, #tpu.memory_space<vmem>>, vector<1x256xf32>
    %c4 = arith.constant 4 : index
    %c0_29 = arith.constant 0 : index
    %c0_30 = arith.constant 0 : index
    %48 = vector.load %arg7[%c4, %c0_29, %c0_30] : memref<9x8x1xf32, #tpu.memory_space<vmem>>, vector<1x8x1xf32>
    %49 = vector.shape_cast %48 : vector<1x8x1xf32> to vector<8x1xf32>
    %50 = vector.broadcast %49 : vector<8x1xf32> to vector<8x256xf32>
    %51 = vector.broadcast %47 : vector<1x256xf32> to vector<8x256xf32>
    %52 = arith.mulf %50, %51 : vector<8x256xf32>
    %53 = arith.addf %46, %52 : vector<8x256xf32>
    %c0_31 = arith.constant 0 : index
    %c18 = arith.constant 18 : index
    %54 = vector.load %arg20[%c0_31, %c18] : memref<32x290xf32, #tpu.memory_space<vmem>>, vector<1x256xf32>
    %c0_32 = arith.constant 0 : index
    %c0_33 = arith.constant 0 : index
    %55 = vector.load %arg4[%c0_32, %c0_33] : memref<1x256xf32, #tpu.memory_space<vmem>>, vector<1x256xf32>
    %56 = arith.mulf %54, %55 : vector<1x256xf32>
    %c5 = arith.constant 5 : index
    %c0_34 = arith.constant 0 : index
    %c0_35 = arith.constant 0 : index
    %57 = vector.load %arg7[%c5, %c0_34, %c0_35] : memref<9x8x1xf32, #tpu.memory_space<vmem>>, vector<1x8x1xf32>
    %58 = vector.shape_cast %57 : vector<1x8x1xf32> to vector<8x1xf32>
    %59 = vector.broadcast %58 : vector<8x1xf32> to vector<8x256xf32>
    %60 = vector.broadcast %56 : vector<1x256xf32> to vector<8x256xf32>
    %61 = arith.mulf %59, %60 : vector<8x256xf32>
    %62 = arith.addf %53, %61 : vector<8x256xf32>
    %c0_36 = arith.constant 0 : index
    %c32 = arith.constant 32 : index
    %63 = vector.load %arg20[%c0_36, %c32] : memref<32x290xf32, #tpu.memory_space<vmem>>, vector<1x256xf32>
    %c0_37 = arith.constant 0 : index
    %c0_38 = arith.constant 0 : index
    %64 = vector.load %arg3[%c0_37, %c0_38] : memref<1x256xf32, #tpu.memory_space<vmem>>, vector<1x256xf32>
    %65 = arith.mulf %63, %64 : vector<1x256xf32>
    %c6 = arith.constant 6 : index
    %c0_39 = arith.constant 0 : index
    %c0_40 = arith.constant 0 : index
    %66 = vector.load %arg7[%c6, %c0_39, %c0_40] : memref<9x8x1xf32, #tpu.memory_space<vmem>>, vector<1x8x1xf32>
    %67 = vector.shape_cast %66 : vector<1x8x1xf32> to vector<8x1xf32>
    %68 = vector.broadcast %67 : vector<8x1xf32> to vector<8x256xf32>
    %69 = vector.broadcast %65 : vector<1x256xf32> to vector<8x256xf32>
    %70 = arith.mulf %68, %69 : vector<8x256xf32>
    %71 = arith.addf %62, %70 : vector<8x256xf32>
    %c0_41 = arith.constant 0 : index
    %c33 = arith.constant 33 : index
    %72 = vector.load %arg20[%c0_41, %c33] : memref<32x290xf32, #tpu.memory_space<vmem>>, vector<1x256xf32>
    %c7 = arith.constant 7 : index
    %c0_42 = arith.constant 0 : index
    %c0_43 = arith.constant 0 : index
    %73 = vector.load %arg7[%c7, %c0_42, %c0_43] : memref<9x8x1xf32, #tpu.memory_space<vmem>>, vector<1x8x1xf32>
    %74 = vector.shape_cast %73 : vector<1x8x1xf32> to vector<8x1xf32>
    %75 = vector.broadcast %74 : vector<8x1xf32> to vector<8x256xf32>
    %76 = vector.broadcast %72 : vector<1x256xf32> to vector<8x256xf32>
    %77 = arith.mulf %75, %76 : vector<8x256xf32>
    %78 = arith.addf %71, %77 : vector<8x256xf32>
    %c0_44 = arith.constant 0 : index
    %c34 = arith.constant 34 : index
    %79 = vector.load %arg20[%c0_44, %c34] : memref<32x290xf32, #tpu.memory_space<vmem>>, vector<1x256xf32>
    %c0_45 = arith.constant 0 : index
    %c0_46 = arith.constant 0 : index
    %80 = vector.load %arg4[%c0_45, %c0_46] : memref<1x256xf32, #tpu.memory_space<vmem>>, vector<1x256xf32>
    %81 = arith.mulf %79, %80 : vector<1x256xf32>
    %c8 = arith.constant 8 : index
    %c0_47 = arith.constant 0 : index
    %c0_48 = arith.constant 0 : index
    %82 = vector.load %arg7[%c8, %c0_47, %c0_48] : memref<9x8x1xf32, #tpu.memory_space<vmem>>, vector<1x8x1xf32>
    %83 = vector.shape_cast %82 : vector<1x8x1xf32> to vector<8x1xf32>
    %84 = vector.broadcast %83 : vector<8x1xf32> to vector<8x256xf32>
    %85 = vector.broadcast %81 : vector<1x256xf32> to vector<8x256xf32>
    %86 = arith.mulf %84, %85 : vector<8x256xf32>
    %87 = arith.addf %78, %86 : vector<8x256xf32>
    %c0_49 = arith.constant 0 : index
    %c0_50 = arith.constant 0 : index
    %88 = vector.load %arg8[%c0_49, %c0_50] : memref<8x1xf32, #tpu.memory_space<vmem>>, vector<8x1xf32>
    %89 = vector.broadcast %88 : vector<8x1xf32> to vector<8x256xf32>
    %90 = arith.addf %87, %89 : vector<8x256xf32>
    %cst_51 = arith.constant 0.000000e+00 : f32
    %91 = vector.broadcast %cst_51 : f32 to vector<8x256xf32>
    %92 = arith.maximumf %90, %91 : vector<8x256xf32>
    %c0_52 = arith.constant 0 : index
    %c17_53 = arith.constant 17 : index
    %93 = vector.load %arg20[%c0_52, %c17_53] : memref<32x290xf32, #tpu.memory_space<vmem>>, vector<8x256xf32>
    tpu.vector_store %arg20[%c0_52, %c17_53], %92 {strides = array<i32>} : memref<32x290xf32, #tpu.memory_space<vmem>>, vector<8x256xf32>,
    %c0_54 = arith.constant 0 : index
    %c0_55 = arith.constant 0 : index
    %94 = vector.load %arg20[%c0_54, %c0_55] : memref<32x290xf32, #tpu.memory_space<vmem>>, vector<8x256xf32>
    %c0_56 = arith.constant 0 : index
    %c0_57 = arith.constant 0 : index
    %95 = vector.load %arg3[%c0_56, %c0_57] : memref<1x256xf32, #tpu.memory_space<vmem>>, vector<1x256xf32>
    %96 = vector.broadcast %95 : vector<1x256xf32> to vector<8x256xf32>
    %97 = arith.mulf %94, %96 : vector<8x256xf32>
    %c0_58 = arith.constant 0 : index
    %c0_59 = arith.constant 0 : index
    %c0_60 = arith.constant 0 : index
    %98 = vector.load %arg9[%c0_58, %c0_59, %c0_60] : memref<9x8x8xf32, #tpu.memory_space<vmem>>, vector<1x8x8xf32>
    %99 = vector.shape_cast %98 : vector<1x8x8xf32> to vector<8x8xf32>
    %cst_61 = arith.constant dense<0.000000e+00> : vector<8x256xf32>
    %100 = tpu.matmul %99, %97, %cst_61 {dimension_numbers = #tpu.dot_dimension_numbers<[1], [0], [0], [1], [0, 0, 1, 1], [], []>} : vector<8x8xf32>, vector<8x256xf32>, vector<8x256xf32> -> vector<8x256xf32>
    %c0_62 = arith.constant 0 : index
    %c1_63 = arith.constant 1 : index
    %101 = vector.load %arg20[%c0_62, %c1_63] : memref<32x290xf32, #tpu.memory_space<vmem>>, vector<8x256xf32>
    %c1_64 = arith.constant 1 : index
    %c0_65 = arith.constant 0 : index
    %c0_66 = arith.constant 0 : index
    %102 = vector.load %arg9[%c1_64, %c0_65, %c0_66] : memref<9x8x8xf32, #tpu.memory_space<vmem>>, vector<1x8x8xf32>
    %103 = vector.shape_cast %102 : vector<1x8x8xf32> to vector<8x8xf32>
    %cst_67 = arith.constant dense<0.000000e+00> : vector<8x256xf32>
    %104 = tpu.matmul %103, %101, %cst_67 {dimension_numbers = #tpu.dot_dimension_numbers<[1], [0], [0], [1], [0, 0, 1, 1], [], []>} : vector<8x8xf32>, vector<8x256xf32>, vector<8x256xf32> -> vector<8x256xf32>
    %105 = arith.addf %100, %104 : vector<8x256xf32>
    %c0_68 = arith.constant 0 : index
    %c2_69 = arith.constant 2 : index
    %106 = vector.load %arg20[%c0_68, %c2_69] : memref<32x290xf32, #tpu.memory_space<vmem>>, vector<8x256xf32>
    %c0_70 = arith.constant 0 : index
    %c0_71 = arith.constant 0 : index
    %107 = vector.load %arg4[%c0_70, %c0_71] : memref<1x256xf32, #tpu.memory_space<vmem>>, vector<1x256xf32>
    %108 = vector.broadcast %107 : vector<1x256xf32> to vector<8x256xf32>
    %109 = arith.mulf %106, %108 : vector<8x256xf32>
    %c2_72 = arith.constant 2 : index
    %c0_73 = arith.constant 0 : index
    %c0_74 = arith.constant 0 : index
    %110 = vector.load %arg9[%c2_72, %c0_73, %c0_74] : memref<9x8x8xf32, #tpu.memory_space<vmem>>, vector<1x8x8xf32>
    %111 = vector.shape_cast %110 : vector<1x8x8xf32> to vector<8x8xf32>
    %cst_75 = arith.constant dense<0.000000e+00> : vector<8x256xf32>
    %112 = tpu.matmul %111, %109, %cst_75 {dimension_numbers = #tpu.dot_dimension_numbers<[1], [0], [0], [1], [0, 0, 1, 1], [], []>} : vector<8x8xf32>, vector<8x256xf32>, vector<8x256xf32> -> vector<8x256xf32>
    %113 = arith.addf %105, %112 : vector<8x256xf32>
    %c0_76 = arith.constant 0 : index
    %c16_77 = arith.constant 16 : index
    %114 = vector.load %arg20[%c0_76, %c16_77] : memref<32x290xf32, #tpu.memory_space<vmem>>, vector<8x256xf32>
    %c0_78 = arith.constant 0 : index
    %c0_79 = arith.constant 0 : index
    %115 = vector.load %arg3[%c0_78, %c0_79] : memref<1x256xf32, #tpu.memory_space<vmem>>, vector<1x256xf32>
    %116 = vector.broadcast %115 : vector<1x256xf32> to vector<8x256xf32>
    %117 = arith.mulf %114, %116 : vector<8x256xf32>
    %c3_80 = arith.constant 3 : index
    %c0_81 = arith.constant 0 : index
    %c0_82 = arith.constant 0 : index
    %118 = vector.load %arg9[%c3_80, %c0_81, %c0_82] : memref<9x8x8xf32, #tpu.memory_space<vmem>>, vector<1x8x8xf32>
    %119 = vector.shape_cast %118 : vector<1x8x8xf32> to vector<8x8xf32>
    %cst_83 = arith.constant dense<0.000000e+00> : vector<8x256xf32>
    %120 = tpu.matmul %119, %117, %cst_83 {dimension_numbers = #tpu.dot_dimension_numbers<[1], [0], [0], [1], [0, 0, 1, 1], [], []>} : vector<8x8xf32>, vector<8x256xf32>, vector<8x256xf32> -> vector<8x256xf32>
    %121 = arith.addf %113, %120 : vector<8x256xf32>
    %c0_84 = arith.constant 0 : index
    %c17_85 = arith.constant 17 : index
    %122 = vector.load %arg20[%c0_84, %c17_85] : memref<32x290xf32, #tpu.memory_space<vmem>>, vector<8x256xf32>
    %c4_86 = arith.constant 4 : index
    %c0_87 = arith.constant 0 : index
    %c0_88 = arith.constant 0 : index
    %123 = vector.load %arg9[%c4_86, %c0_87, %c0_88] : memref<9x8x8xf32, #tpu.memory_space<vmem>>, vector<1x8x8xf32>
    %124 = vector.shape_cast %123 : vector<1x8x8xf32> to vector<8x8xf32>
    %cst_89 = arith.constant dense<0.000000e+00> : vector<8x256xf32>
    %125 = tpu.matmul %124, %122, %cst_89 {dimension_numbers = #tpu.dot_dimension_numbers<[1], [0], [0], [1], [0, 0, 1, 1], [], []>} : vector<8x8xf32>, vector<8x256xf32>, vector<8x256xf32> -> vector<8x256xf32>
    %126 = arith.addf %121, %125 : vector<8x256xf32>
    %c0_90 = arith.constant 0 : index
    %c18_91 = arith.constant 18 : index
    %127 = vector.load %arg20[%c0_90, %c18_91] : memref<32x290xf32, #tpu.memory_space<vmem>>, vector<8x256xf32>
    %c0_92 = arith.constant 0 : index
    %c0_93 = arith.constant 0 : index
    %128 = vector.load %arg4[%c0_92, %c0_93] : memref<1x256xf32, #tpu.memory_space<vmem>>, vector<1x256xf32>
    %129 = vector.broadcast %128 : vector<1x256xf32> to vector<8x256xf32>
    %130 = arith.mulf %127, %129 : vector<8x256xf32>
    %c5_94 = arith.constant 5 : index
    %c0_95 = arith.constant 0 : index
    %c0_96 = arith.constant 0 : index
    %131 = vector.load %arg9[%c5_94, %c0_95, %c0_96] : memref<9x8x8xf32, #tpu.memory_space<vmem>>, vector<1x8x8xf32>
    %132 = vector.shape_cast %131 : vector<1x8x8xf32> to vector<8x8xf32>
    %cst_97 = arith.constant dense<0.000000e+00> : vector<8x256xf32>
    %133 = tpu.matmul %132, %130, %cst_97 {dimension_numbers = #tpu.dot_dimension_numbers<[1], [0], [0], [1], [0, 0, 1, 1], [], []>} : vector<8x8xf32>, vector<8x256xf32>, vector<8x256xf32> -> vector<8x256xf32>
    %134 = arith.addf %126, %133 : vector<8x256xf32>
    %c0_98 = arith.constant 0 : index
    %c32_99 = arith.constant 32 : index
    %135 = vector.load %arg20[%c0_98, %c32_99] : memref<32x290xf32, #tpu.memory_space<vmem>>, vector<8x256xf32>
    %c0_100 = arith.constant 0 : index
    %c0_101 = arith.constant 0 : index
    %136 = vector.load %arg3[%c0_100, %c0_101] : memref<1x256xf32, #tpu.memory_space<vmem>>, vector<1x256xf32>
    %137 = vector.broadcast %136 : vector<1x256xf32> to vector<8x256xf32>
    %138 = arith.mulf %135, %137 : vector<8x256xf32>
    %c6_102 = arith.constant 6 : index
    %c0_103 = arith.constant 0 : index
    %c0_104 = arith.constant 0 : index
    %139 = vector.load %arg9[%c6_102, %c0_103, %c0_104] : memref<9x8x8xf32, #tpu.memory_space<vmem>>, vector<1x8x8xf32>
    %140 = vector.shape_cast %139 : vector<1x8x8xf32> to vector<8x8xf32>
    %cst_105 = arith.constant dense<0.000000e+00> : vector<8x256xf32>
    %141 = tpu.matmul %140, %138, %cst_105 {dimension_numbers = #tpu.dot_dimension_numbers<[1], [0], [0], [1], [0, 0, 1, 1], [], []>} : vector<8x8xf32>, vector<8x256xf32>, vector<8x256xf32> -> vector<8x256xf32>
    %142 = arith.addf %134, %141 : vector<8x256xf32>
    %c0_106 = arith.constant 0 : index
    %c33_107 = arith.constant 33 : index
    %143 = vector.load %arg20[%c0_106, %c33_107] : memref<32x290xf32, #tpu.memory_space<vmem>>, vector<8x256xf32>
    %c7_108 = arith.constant 7 : index
    %c0_109 = arith.constant 0 : index
    %c0_110 = arith.constant 0 : index
    %144 = vector.load %arg9[%c7_108, %c0_109, %c0_110] : memref<9x8x8xf32, #tpu.memory_space<vmem>>, vector<1x8x8xf32>
    %145 = vector.shape_cast %144 : vector<1x8x8xf32> to vector<8x8xf32>
    %cst_111 = arith.constant dense<0.000000e+00> : vector<8x256xf32>
    %146 = tpu.matmul %145, %143, %cst_111 {dimension_numbers = #tpu.dot_dimension_numbers<[1], [0], [0], [1], [0, 0, 1, 1], [], []>} : vector<8x8xf32>, vector<8x256xf32>, vector<8x256xf32> -> vector<8x256xf32>
    %147 = arith.addf %142, %146 : vector<8x256xf32>
    %c0_112 = arith.constant 0 : index
    %c34_113 = arith.constant 34 : index
    %148 = vector.load %arg20[%c0_112, %c34_113] : memref<32x290xf32, #tpu.memory_space<vmem>>, vector<8x256xf32>
    %c0_114 = arith.constant 0 : index
    %c0_115 = arith.constant 0 : index
    %149 = vector.load %arg4[%c0_114, %c0_115] : memref<1x256xf32, #tpu.memory_space<vmem>>, vector<1x256xf32>
    %150 = vector.broadcast %149 : vector<1x256xf32> to vector<8x256xf32>
    %151 = arith.mulf %148, %150 : vector<8x256xf32>
    %c8_116 = arith.constant 8 : index
    %c0_117 = arith.constant 0 : index
    %c0_118 = arith.constant 0 : index
    %152 = vector.load %arg9[%c8_116, %c0_117, %c0_118] : memref<9x8x8xf32, #tpu.memory_space<vmem>>, vector<1x8x8xf32>
    %153 = vector.shape_cast %152 : vector<1x8x8xf32> to vector<8x8xf32>
    %cst_119 = arith.constant dense<0.000000e+00> : vector<8x256xf32>
    %154 = tpu.matmul %153, %151, %cst_119 {dimension_numbers = #tpu.dot_dimension_numbers<[1], [0], [0], [1], [0, 0, 1, 1], [], []>} : vector<8x8xf32>, vector<8x256xf32>, vector<8x256xf32> -> vector<8x256xf32>
    %155 = arith.addf %147, %154 : vector<8x256xf32>
    %c0_120 = arith.constant 0 : index
    %c0_121 = arith.constant 0 : index
    %156 = vector.load %arg10[%c0_120, %c0_121] : memref<8x1xf32, #tpu.memory_space<vmem>>, vector<8x1xf32>
    %157 = vector.broadcast %156 : vector<8x1xf32> to vector<8x256xf32>
    %158 = arith.addf %155, %157 : vector<8x256xf32>
    %cst_122 = arith.constant 0.000000e+00 : f32
    %159 = vector.broadcast %cst_122 : f32 to vector<8x256xf32>
    %160 = arith.maximumf %158, %159 : vector<8x256xf32>
    %c0_123 = arith.constant 0 : index
    %c17_124 = arith.constant 17 : index
    %161 = vector.load %arg20[%c0_123, %c17_124] : memref<32x290xf32, #tpu.memory_space<vmem>>, vector<8x256xf32>
    tpu.vector_store %arg20[%c0_123, %c17_124], %160 {strides = array<i32>} : memref<32x290xf32, #tpu.memory_space<vmem>>, vector<8x256xf32>,
    %c0_125 = arith.constant 0 : index
    %c17_126 = arith.constant 17 : index
    %162 = vector.load %arg20[%c0_125, %c17_126] : memref<32x290xf32, #tpu.memory_space<vmem>>, vector<8x256xf32>
    %c0_127 = arith.constant 0 : index
    %c0_128 = arith.constant 0 : index
    %c0_129 = arith.constant 0 : index
    %163 = vector.load %arg11[%c0_127, %c0_128, %c0_129] : memref<4x32x8xf32, #tpu.memory_space<vmem>>, vector<1x32x8xf32>
    %164 = vector.shape_cast %163 : vector<1x32x8xf32> to vector<32x8xf32>
    %cst_130 = arith.constant dense<0.000000e+00> : vector<32x256xf32>
    %165 = tpu.matmul %164, %162, %cst_130 {dimension_numbers = #tpu.dot_dimension_numbers<[1], [0], [0], [1], [0, 0, 1, 1], [], []>} : vector<32x8xf32>, vector<8x256xf32>, vector<32x256xf32> -> vector<32x256xf32>
    %c0_131 = arith.constant 0 : index
    %c18_132 = arith.constant 18 : index
    %166 = vector.load %arg20[%c0_131, %c18_132] : memref<32x290xf32, #tpu.memory_space<vmem>>, vector<8x256xf32>
    %c0_133 = arith.constant 0 : index
    %c0_134 = arith.constant 0 : index
    %167 = vector.load %arg4[%c0_133, %c0_134] : memref<1x256xf32, #tpu.memory_space<vmem>>, vector<1x256xf32>
    %168 = vector.broadcast %167 : vector<1x256xf32> to vector<8x256xf32>
    %169 = arith.mulf %166, %168 : vector<8x256xf32>
    %c1_135 = arith.constant 1 : index
    %c0_136 = arith.constant 0 : index
    %c0_137 = arith.constant 0 : index
    %170 = vector.load %arg11[%c1_135, %c0_136, %c0_137] : memref<4x32x8xf32, #tpu.memory_space<vmem>>, vector<1x32x8xf32>
    %171 = vector.shape_cast %170 : vector<1x32x8xf32> to vector<32x8xf32>
    %cst_138 = arith.constant dense<0.000000e+00> : vector<32x256xf32>
    %172 = tpu.matmul %171, %169, %cst_138 {dimension_numbers = #tpu.dot_dimension_numbers<[1], [0], [0], [1], [0, 0, 1, 1], [], []>} : vector<32x8xf32>, vector<8x256xf32>, vector<32x256xf32> -> vector<32x256xf32>
    %173 = arith.addf %165, %172 : vector<32x256xf32>
    %c0_139 = arith.constant 0 : index
    %c33_140 = arith.constant 33 : index
    %174 = vector.load %arg20[%c0_139, %c33_140] : memref<32x290xf32, #tpu.memory_space<vmem>>, vector<8x256xf32>
    %c2_141 = arith.constant 2 : index
    %c0_142 = arith.constant 0 : index
    %c0_143 = arith.constant 0 : index
    %175 = vector.load %arg11[%c2_141, %c0_142, %c0_143] : memref<4x32x8xf32, #tpu.memory_space<vmem>>, vector<1x32x8xf32>
    %176 = vector.shape_cast %175 : vector<1x32x8xf32> to vector<32x8xf32>
    %cst_144 = arith.constant dense<0.000000e+00> : vector<32x256xf32>
    %177 = tpu.matmul %176, %174, %cst_144 {dimension_numbers = #tpu.dot_dimension_numbers<[1], [0], [0], [1], [0, 0, 1, 1], [], []>} : vector<32x8xf32>, vector<8x256xf32>, vector<32x256xf32> -> vector<32x256xf32>
    %178 = arith.addf %173, %177 : vector<32x256xf32>
    %c0_145 = arith.constant 0 : index
    %c34_146 = arith.constant 34 : index
    %179 = vector.load %arg20[%c0_145, %c34_146] : memref<32x290xf32, #tpu.memory_space<vmem>>, vector<8x256xf32>
    %c0_147 = arith.constant 0 : index
    %c0_148 = arith.constant 0 : index
    %180 = vector.load %arg4[%c0_147, %c0_148] : memref<1x256xf32, #tpu.memory_space<vmem>>, vector<1x256xf32>
    %181 = vector.broadcast %180 : vector<1x256xf32> to vector<8x256xf32>
    %182 = arith.mulf %179, %181 : vector<8x256xf32>
    %c3_149 = arith.constant 3 : index
    %c0_150 = arith.constant 0 : index
    %c0_151 = arith.constant 0 : index
    %183 = vector.load %arg11[%c3_149, %c0_150, %c0_151] : memref<4x32x8xf32, #tpu.memory_space<vmem>>, vector<1x32x8xf32>
    %184 = vector.shape_cast %183 : vector<1x32x8xf32> to vector<32x8xf32>
    %cst_152 = arith.constant dense<0.000000e+00> : vector<32x256xf32>
    %185 = tpu.matmul %184, %182, %cst_152 {dimension_numbers = #tpu.dot_dimension_numbers<[1], [0], [0], [1], [0, 0, 1, 1], [], []>} : vector<32x8xf32>, vector<8x256xf32>, vector<32x256xf32> -> vector<32x256xf32>
    %186 = arith.addf %178, %185 : vector<32x256xf32>
    %c0_153 = arith.constant 0 : index
    %c0_154 = arith.constant 0 : index
    %187 = vector.load %arg12[%c0_153, %c0_154] : memref<32x1xf32, #tpu.memory_space<vmem>>, vector<32x1xf32>
    %188 = vector.broadcast %187 : vector<32x1xf32> to vector<32x256xf32>
    %189 = arith.addf %186, %188 : vector<32x256xf32>
    %cst_155 = arith.constant 0.000000e+00 : f32
    %190 = vector.broadcast %cst_155 : f32 to vector<32x256xf32>
    %191 = arith.maximumf %189, %190 : vector<32x256xf32>
    %c0_156 = arith.constant 0 : index
    %c0_157 = arith.constant 0 : index
    %c0_158 = arith.constant 0 : index
    %192 = vector.load %arg6[%c0_156, %c0_157, %c0_158] : memref<1x12x256xf32, #tpu.memory_space<vmem>>, vector<1x12x256xf32>
    %193 = vector.shape_cast %192 : vector<1x12x256xf32> to vector<12x256xf32>
    %c0_159 = arith.constant 0 : index
    %c17_160 = arith.constant 17 : index
    %194 = vector.load %arg20[%c0_159, %c17_160] : memref<32x290xf32, #tpu.memory_space<vmem>>, vector<12x256xf32>
    tpu.vector_store %arg20[%c0_159, %c17_160], %193 {strides = array<i32>} : memref<32x290xf32, #tpu.memory_space<vmem>>, vector<12x256xf32>,
    %c0_161 = arith.constant 0 : index
    %c0_162 = arith.constant 0 : index
    %195 = vector.load %arg20[%c0_161, %c0_162] : memref<32x290xf32, #tpu.memory_space<vmem>>, vector<12x256xf32>
    %c0_163 = arith.constant 0 : index
    %c0_164 = arith.constant 0 : index
    %196 = vector.load %arg3[%c0_163, %c0_164] : memref<1x256xf32, #tpu.memory_space<vmem>>, vector<1x256xf32>
    %197 = vector.broadcast %196 : vector<1x256xf32> to vector<12x256xf32>
    %198 = arith.mulf %195, %197 : vector<12x256xf32>
    %c0_165 = arith.constant 0 : index
    %c0_166 = arith.constant 0 : index
    %c0_167 = arith.constant 0 : index
    %199 = vector.load %arg13[%c0_165, %c0_166, %c0_167] : memref<9x32x12xf32, #tpu.memory_space<vmem>>, vector<1x32x12xf32>
    %200 = vector.shape_cast %199 : vector<1x32x12xf32> to vector<32x12xf32>
    %cst_168 = arith.constant dense<0.000000e+00> : vector<32x256xf32>
    %201 = tpu.matmul %200, %198, %cst_168 {dimension_numbers = #tpu.dot_dimension_numbers<[1], [0], [0], [1], [0, 0, 1, 1], [], []>} : vector<32x12xf32>, vector<12x256xf32>, vector<32x256xf32> -> vector<32x256xf32>
    %c0_169 = arith.constant 0 : index
    %c1_170 = arith.constant 1 : index
    %202 = vector.load %arg20[%c0_169, %c1_170] : memref<32x290xf32, #tpu.memory_space<vmem>>, vector<12x256xf32>
    %c1_171 = arith.constant 1 : index
    %c0_172 = arith.constant 0 : index
    %c0_173 = arith.constant 0 : index
    %203 = vector.load %arg13[%c1_171, %c0_172, %c0_173] : memref<9x32x12xf32, #tpu.memory_space<vmem>>, vector<1x32x12xf32>
    %204 = vector.shape_cast %203 : vector<1x32x12xf32> to vector<32x12xf32>
    %cst_174 = arith.constant dense<0.000000e+00> : vector<32x256xf32>
    %205 = tpu.matmul %204, %202, %cst_174 {dimension_numbers = #tpu.dot_dimension_numbers<[1], [0], [0], [1], [0, 0, 1, 1], [], []>} : vector<32x12xf32>, vector<12x256xf32>, vector<32x256xf32> -> vector<32x256xf32>
    %206 = arith.addf %201, %205 : vector<32x256xf32>
    %c0_175 = arith.constant 0 : index
    %c2_176 = arith.constant 2 : index
    %207 = vector.load %arg20[%c0_175, %c2_176] : memref<32x290xf32, #tpu.memory_space<vmem>>, vector<12x256xf32>
    %c0_177 = arith.constant 0 : index
    %c0_178 = arith.constant 0 : index
    %208 = vector.load %arg4[%c0_177, %c0_178] : memref<1x256xf32, #tpu.memory_space<vmem>>, vector<1x256xf32>
    %209 = vector.broadcast %208 : vector<1x256xf32> to vector<12x256xf32>
    %210 = arith.mulf %207, %209 : vector<12x256xf32>
    %c2_179 = arith.constant 2 : index
    %c0_180 = arith.constant 0 : index
    %c0_181 = arith.constant 0 : index
    %211 = vector.load %arg13[%c2_179, %c0_180, %c0_181] : memref<9x32x12xf32, #tpu.memory_space<vmem>>, vector<1x32x12xf32>
    %212 = vector.shape_cast %211 : vector<1x32x12xf32> to vector<32x12xf32>
    %cst_182 = arith.constant dense<0.000000e+00> : vector<32x256xf32>
    %213 = tpu.matmul %212, %210, %cst_182 {dimension_numbers = #tpu.dot_dimension_numbers<[1], [0], [0], [1], [0, 0, 1, 1], [], []>} : vector<32x12xf32>, vector<12x256xf32>, vector<32x256xf32> -> vector<32x256xf32>
    %214 = arith.addf %206, %213 : vector<32x256xf32>
    %c0_183 = arith.constant 0 : index
    %c16_184 = arith.constant 16 : index
    %215 = vector.load %arg20[%c0_183, %c16_184] : memref<32x290xf32, #tpu.memory_space<vmem>>, vector<12x256xf32>
    %c0_185 = arith.constant 0 : index
    %c0_186 = arith.constant 0 : index
    %216 = vector.load %arg3[%c0_185, %c0_186] : memref<1x256xf32, #tpu.memory_space<vmem>>, vector<1x256xf32>
    %217 = vector.broadcast %216 : vector<1x256xf32> to vector<12x256xf32>
    %218 = arith.mulf %215, %217 : vector<12x256xf32>
    %c3_187 = arith.constant 3 : index
    %c0_188 = arith.constant 0 : index
    %c0_189 = arith.constant 0 : index
    %219 = vector.load %arg13[%c3_187, %c0_188, %c0_189] : memref<9x32x12xf32, #tpu.memory_space<vmem>>, vector<1x32x12xf32>
    %220 = vector.shape_cast %219 : vector<1x32x12xf32> to vector<32x12xf32>
    %cst_190 = arith.constant dense<0.000000e+00> : vector<32x256xf32>
    %221 = tpu.matmul %220, %218, %cst_190 {dimension_numbers = #tpu.dot_dimension_numbers<[1], [0], [0], [1], [0, 0, 1, 1], [], []>} : vector<32x12xf32>, vector<12x256xf32>, vector<32x256xf32> -> vector<32x256xf32>
    %222 = arith.addf %214, %221 : vector<32x256xf32>
    %c0_191 = arith.constant 0 : index
    %c17_192 = arith.constant 17 : index
    %223 = vector.load %arg20[%c0_191, %c17_192] : memref<32x290xf32, #tpu.memory_space<vmem>>, vector<12x256xf32>
    %c4_193 = arith.constant 4 : index
    %c0_194 = arith.constant 0 : index
    %c0_195 = arith.constant 0 : index
    %224 = vector.load %arg13[%c4_193, %c0_194, %c0_195] : memref<9x32x12xf32, #tpu.memory_space<vmem>>, vector<1x32x12xf32>
    %225 = vector.shape_cast %224 : vector<1x32x12xf32> to vector<32x12xf32>
    %cst_196 = arith.constant dense<0.000000e+00> : vector<32x256xf32>
    %226 = tpu.matmul %225, %223, %cst_196 {dimension_numbers = #tpu.dot_dimension_numbers<[1], [0], [0], [1], [0, 0, 1, 1], [], []>} : vector<32x12xf32>, vector<12x256xf32>, vector<32x256xf32> -> vector<32x256xf32>
    %227 = arith.addf %222, %226 : vector<32x256xf32>
    %c0_197 = arith.constant 0 : index
    %c18_198 = arith.constant 18 : index
    %228 = vector.load %arg20[%c0_197, %c18_198] : memref<32x290xf32, #tpu.memory_space<vmem>>, vector<12x256xf32>
    %c0_199 = arith.constant 0 : index
    %c0_200 = arith.constant 0 : index
    %229 = vector.load %arg4[%c0_199, %c0_200] : memref<1x256xf32, #tpu.memory_space<vmem>>, vector<1x256xf32>
    %230 = vector.broadcast %229 : vector<1x256xf32> to vector<12x256xf32>
    %231 = arith.mulf %228, %230 : vector<12x256xf32>
    %c5_201 = arith.constant 5 : index
    %c0_202 = arith.constant 0 : index
    %c0_203 = arith.constant 0 : index
    %232 = vector.load %arg13[%c5_201, %c0_202, %c0_203] : memref<9x32x12xf32, #tpu.memory_space<vmem>>, vector<1x32x12xf32>
    %233 = vector.shape_cast %232 : vector<1x32x12xf32> to vector<32x12xf32>
    %cst_204 = arith.constant dense<0.000000e+00> : vector<32x256xf32>
    %234 = tpu.matmul %233, %231, %cst_204 {dimension_numbers = #tpu.dot_dimension_numbers<[1], [0], [0], [1], [0, 0, 1, 1], [], []>} : vector<32x12xf32>, vector<12x256xf32>, vector<32x256xf32> -> vector<32x256xf32>
    %235 = arith.addf %227, %234 : vector<32x256xf32>
    %c0_205 = arith.constant 0 : index
    %c32_206 = arith.constant 32 : index
    %236 = vector.load %arg20[%c0_205, %c32_206] : memref<32x290xf32, #tpu.memory_space<vmem>>, vector<12x256xf32>
    %c0_207 = arith.constant 0 : index
    %c0_208 = arith.constant 0 : index
    %237 = vector.load %arg3[%c0_207, %c0_208] : memref<1x256xf32, #tpu.memory_space<vmem>>, vector<1x256xf32>
    %238 = vector.broadcast %237 : vector<1x256xf32> to vector<12x256xf32>
    %239 = arith.mulf %236, %238 : vector<12x256xf32>
    %c6_209 = arith.constant 6 : index
    %c0_210 = arith.constant 0 : index
    %c0_211 = arith.constant 0 : index
    %240 = vector.load %arg13[%c6_209, %c0_210, %c0_211] : memref<9x32x12xf32, #tpu.memory_space<vmem>>, vector<1x32x12xf32>
    %241 = vector.shape_cast %240 : vector<1x32x12xf32> to vector<32x12xf32>
    %cst_212 = arith.constant dense<0.000000e+00> : vector<32x256xf32>
    %242 = tpu.matmul %241, %239, %cst_212 {dimension_numbers = #tpu.dot_dimension_numbers<[1], [0], [0], [1], [0, 0, 1, 1], [], []>} : vector<32x12xf32>, vector<12x256xf32>, vector<32x256xf32> -> vector<32x256xf32>
    %243 = arith.addf %235, %242 : vector<32x256xf32>
    %c0_213 = arith.constant 0 : index
    %c33_214 = arith.constant 33 : index
    %244 = vector.load %arg20[%c0_213, %c33_214] : memref<32x290xf32, #tpu.memory_space<vmem>>, vector<12x256xf32>
    %c7_215 = arith.constant 7 : index
    %c0_216 = arith.constant 0 : index
    %c0_217 = arith.constant 0 : index
    %245 = vector.load %arg13[%c7_215, %c0_216, %c0_217] : memref<9x32x12xf32, #tpu.memory_space<vmem>>, vector<1x32x12xf32>
    %246 = vector.shape_cast %245 : vector<1x32x12xf32> to vector<32x12xf32>
    %cst_218 = arith.constant dense<0.000000e+00> : vector<32x256xf32>
    %247 = tpu.matmul %246, %244, %cst_218 {dimension_numbers = #tpu.dot_dimension_numbers<[1], [0], [0], [1], [0, 0, 1, 1], [], []>} : vector<32x12xf32>, vector<12x256xf32>, vector<32x256xf32> -> vector<32x256xf32>
    %248 = arith.addf %243, %247 : vector<32x256xf32>
    %c0_219 = arith.constant 0 : index
    %c34_220 = arith.constant 34 : index
    %249 = vector.load %arg20[%c0_219, %c34_220] : memref<32x290xf32, #tpu.memory_space<vmem>>, vector<12x256xf32>
    %c0_221 = arith.constant 0 : index
    %c0_222 = arith.constant 0 : index
    %250 = vector.load %arg4[%c0_221, %c0_222] : memref<1x256xf32, #tpu.memory_space<vmem>>, vector<1x256xf32>
    %251 = vector.broadcast %250 : vector<1x256xf32> to vector<12x256xf32>
    %252 = arith.mulf %249, %251 : vector<12x256xf32>
    %c8_223 = arith.constant 8 : index
    %c0_224 = arith.constant 0 : index
    %c0_225 = arith.constant 0 : index
    %253 = vector.load %arg13[%c8_223, %c0_224, %c0_225] : memref<9x32x12xf32, #tpu.memory_space<vmem>>, vector<1x32x12xf32>
    %254 = vector.shape_cast %253 : vector<1x32x12xf32> to vector<32x12xf32>
    %cst_226 = arith.constant dense<0.000000e+00> : vector<32x256xf32>
    %255 = tpu.matmul %254, %252, %cst_226 {dimension_numbers = #tpu.dot_dimension_numbers<[1], [0], [0], [1], [0, 0, 1, 1], [], []>} : vector<32x12xf32>, vector<12x256xf32>, vector<32x256xf32> -> vector<32x256xf32>
    %256 = arith.addf %248, %255 : vector<32x256xf32>
    %c0_227 = arith.constant 0 : index
    %c0_228 = arith.constant 0 : index
    %257 = vector.load %arg14[%c0_227, %c0_228] : memref<32x1xf32, #tpu.memory_space<vmem>>, vector<32x1xf32>
    %258 = vector.broadcast %257 : vector<32x1xf32> to vector<32x256xf32>
    %259 = arith.addf %256, %258 : vector<32x256xf32>
    %cst_229 = arith.constant 0.000000e+00 : f32
    %260 = vector.broadcast %cst_229 : f32 to vector<32x256xf32>
    %261 = arith.maximumf %259, %260 : vector<32x256xf32>
    %c0_230 = arith.constant 0 : index
    %c17_231 = arith.constant 17 : index
    %262 = vector.load %arg20[%c0_230, %c17_231] : memref<32x290xf32, #tpu.memory_space<vmem>>, vector<32x256xf32>
    tpu.vector_store %arg20[%c0_230, %c17_231], %191 {strides = array<i32>} : memref<32x290xf32, #tpu.memory_space<vmem>>, vector<32x256xf32>,
    %c0_232 = arith.constant 0 : index
    %c0_233 = arith.constant 0 : index
    %263 = vector.load %arg20[%c0_232, %c0_233] : memref<32x290xf32, #tpu.memory_space<vmem>>, vector<32x256xf32>
    %c0_234 = arith.constant 0 : index
    %c0_235 = arith.constant 0 : index
    %264 = vector.load %arg3[%c0_234, %c0_235] : memref<1x256xf32, #tpu.memory_space<vmem>>, vector<1x256xf32>
    %265 = vector.broadcast %264 : vector<1x256xf32> to vector<32x256xf32>
    %266 = arith.mulf %263, %265 : vector<32x256xf32>
    %c0_236 = arith.constant 0 : index
    %c0_237 = arith.constant 0 : index
    %c0_238 = arith.constant 0 : index
    %267 = vector.load %arg15[%c0_236, %c0_237, %c0_238] : memref<9x32x32xf32, #tpu.memory_space<vmem>>, vector<1x32x32xf32>
    %268 = vector.shape_cast %267 : vector<1x32x32xf32> to vector<32x32xf32>
    %cst_239 = arith.constant dense<0.000000e+00> : vector<32x256xf32>
    %269 = tpu.matmul %268, %266, %cst_239 {dimension_numbers = #tpu.dot_dimension_numbers<[1], [0], [0], [1], [0, 0, 1, 1], [], []>} : vector<32x32xf32>, vector<32x256xf32>, vector<32x256xf32> -> vector<32x256xf32>
    %c0_240 = arith.constant 0 : index
    %c1_241 = arith.constant 1 : index
    %270 = vector.load %arg20[%c0_240, %c1_241] : memref<32x290xf32, #tpu.memory_space<vmem>>, vector<32x256xf32>
    %c1_242 = arith.constant 1 : index
    %c0_243 = arith.constant 0 : index
    %c0_244 = arith.constant 0 : index
    %271 = vector.load %arg15[%c1_242, %c0_243, %c0_244] : memref<9x32x32xf32, #tpu.memory_space<vmem>>, vector<1x32x32xf32>
    %272 = vector.shape_cast %271 : vector<1x32x32xf32> to vector<32x32xf32>
    %cst_245 = arith.constant dense<0.000000e+00> : vector<32x256xf32>
    %273 = tpu.matmul %272, %270, %cst_245 {dimension_numbers = #tpu.dot_dimension_numbers<[1], [0], [0], [1], [0, 0, 1, 1], [], []>} : vector<32x32xf32>, vector<32x256xf32>, vector<32x256xf32> -> vector<32x256xf32>
    %274 = arith.addf %269, %273 : vector<32x256xf32>
    %c0_246 = arith.constant 0 : index
    %c2_247 = arith.constant 2 : index
    %275 = vector.load %arg20[%c0_246, %c2_247] : memref<32x290xf32, #tpu.memory_space<vmem>>, vector<32x256xf32>
    %c0_248 = arith.constant 0 : index
    %c0_249 = arith.constant 0 : index
    %276 = vector.load %arg4[%c0_248, %c0_249] : memref<1x256xf32, #tpu.memory_space<vmem>>, vector<1x256xf32>
    %277 = vector.broadcast %276 : vector<1x256xf32> to vector<32x256xf32>
    %278 = arith.mulf %275, %277 : vector<32x256xf32>
    %c2_250 = arith.constant 2 : index
    %c0_251 = arith.constant 0 : index
    %c0_252 = arith.constant 0 : index
    %279 = vector.load %arg15[%c2_250, %c0_251, %c0_252] : memref<9x32x32xf32, #tpu.memory_space<vmem>>, vector<1x32x32xf32>
    %280 = vector.shape_cast %279 : vector<1x32x32xf32> to vector<32x32xf32>
    %cst_253 = arith.constant dense<0.000000e+00> : vector<32x256xf32>
    %281 = tpu.matmul %280, %278, %cst_253 {dimension_numbers = #tpu.dot_dimension_numbers<[1], [0], [0], [1], [0, 0, 1, 1], [], []>} : vector<32x32xf32>, vector<32x256xf32>, vector<32x256xf32> -> vector<32x256xf32>
    %282 = arith.addf %274, %281 : vector<32x256xf32>
    %c0_254 = arith.constant 0 : index
    %c16_255 = arith.constant 16 : index
    %283 = vector.load %arg20[%c0_254, %c16_255] : memref<32x290xf32, #tpu.memory_space<vmem>>, vector<32x256xf32>
    %c0_256 = arith.constant 0 : index
    %c0_257 = arith.constant 0 : index
    %284 = vector.load %arg3[%c0_256, %c0_257] : memref<1x256xf32, #tpu.memory_space<vmem>>, vector<1x256xf32>
    %285 = vector.broadcast %284 : vector<1x256xf32> to vector<32x256xf32>
    %286 = arith.mulf %283, %285 : vector<32x256xf32>
    %c3_258 = arith.constant 3 : index
    %c0_259 = arith.constant 0 : index
    %c0_260 = arith.constant 0 : index
    %287 = vector.load %arg15[%c3_258, %c0_259, %c0_260] : memref<9x32x32xf32, #tpu.memory_space<vmem>>, vector<1x32x32xf32>
    %288 = vector.shape_cast %287 : vector<1x32x32xf32> to vector<32x32xf32>
    %cst_261 = arith.constant dense<0.000000e+00> : vector<32x256xf32>
    %289 = tpu.matmul %288, %286, %cst_261 {dimension_numbers = #tpu.dot_dimension_numbers<[1], [0], [0], [1], [0, 0, 1, 1], [], []>} : vector<32x32xf32>, vector<32x256xf32>, vector<32x256xf32> -> vector<32x256xf32>
    %290 = arith.addf %282, %289 : vector<32x256xf32>
    %c0_262 = arith.constant 0 : index
    %c17_263 = arith.constant 17 : index
    %291 = vector.load %arg20[%c0_262, %c17_263] : memref<32x290xf32, #tpu.memory_space<vmem>>, vector<32x256xf32>
    %c4_264 = arith.constant 4 : index
    %c0_265 = arith.constant 0 : index
    %c0_266 = arith.constant 0 : index
    %292 = vector.load %arg15[%c4_264, %c0_265, %c0_266] : memref<9x32x32xf32, #tpu.memory_space<vmem>>, vector<1x32x32xf32>
    %293 = vector.shape_cast %292 : vector<1x32x32xf32> to vector<32x32xf32>
    %cst_267 = arith.constant dense<0.000000e+00> : vector<32x256xf32>
    %294 = tpu.matmul %293, %291, %cst_267 {dimension_numbers = #tpu.dot_dimension_numbers<[1], [0], [0], [1], [0, 0, 1, 1], [], []>} : vector<32x32xf32>, vector<32x256xf32>, vector<32x256xf32> -> vector<32x256xf32>
    %295 = arith.addf %290, %294 : vector<32x256xf32>
    %c0_268 = arith.constant 0 : index
    %c18_269 = arith.constant 18 : index
    %296 = vector.load %arg20[%c0_268, %c18_269] : memref<32x290xf32, #tpu.memory_space<vmem>>, vector<32x256xf32>
    %c0_270 = arith.constant 0 : index
    %c0_271 = arith.constant 0 : index
    %297 = vector.load %arg4[%c0_270, %c0_271] : memref<1x256xf32, #tpu.memory_space<vmem>>, vector<1x256xf32>
    %298 = vector.broadcast %297 : vector<1x256xf32> to vector<32x256xf32>
    %299 = arith.mulf %296, %298 : vector<32x256xf32>
    %c5_272 = arith.constant 5 : index
    %c0_273 = arith.constant 0 : index
    %c0_274 = arith.constant 0 : index
    %300 = vector.load %arg15[%c5_272, %c0_273, %c0_274] : memref<9x32x32xf32, #tpu.memory_space<vmem>>, vector<1x32x32xf32>
    %301 = vector.shape_cast %300 : vector<1x32x32xf32> to vector<32x32xf32>
    %cst_275 = arith.constant dense<0.000000e+00> : vector<32x256xf32>
    %302 = tpu.matmul %301, %299, %cst_275 {dimension_numbers = #tpu.dot_dimension_numbers<[1], [0], [0], [1], [0, 0, 1, 1], [], []>} : vector<32x32xf32>, vector<32x256xf32>, vector<32x256xf32> -> vector<32x256xf32>
    %303 = arith.addf %295, %302 : vector<32x256xf32>
    %c0_276 = arith.constant 0 : index
    %c32_277 = arith.constant 32 : index
    %304 = vector.load %arg20[%c0_276, %c32_277] : memref<32x290xf32, #tpu.memory_space<vmem>>, vector<32x256xf32>
    %c0_278 = arith.constant 0 : index
    %c0_279 = arith.constant 0 : index
    %305 = vector.load %arg3[%c0_278, %c0_279] : memref<1x256xf32, #tpu.memory_space<vmem>>, vector<1x256xf32>
    %306 = vector.broadcast %305 : vector<1x256xf32> to vector<32x256xf32>
    %307 = arith.mulf %304, %306 : vector<32x256xf32>
    %c6_280 = arith.constant 6 : index
    %c0_281 = arith.constant 0 : index
    %c0_282 = arith.constant 0 : index
    %308 = vector.load %arg15[%c6_280, %c0_281, %c0_282] : memref<9x32x32xf32, #tpu.memory_space<vmem>>, vector<1x32x32xf32>
    %309 = vector.shape_cast %308 : vector<1x32x32xf32> to vector<32x32xf32>
    %cst_283 = arith.constant dense<0.000000e+00> : vector<32x256xf32>
    %310 = tpu.matmul %309, %307, %cst_283 {dimension_numbers = #tpu.dot_dimension_numbers<[1], [0], [0], [1], [0, 0, 1, 1], [], []>} : vector<32x32xf32>, vector<32x256xf32>, vector<32x256xf32> -> vector<32x256xf32>
    %311 = arith.addf %303, %310 : vector<32x256xf32>
    %c0_284 = arith.constant 0 : index
    %c33_285 = arith.constant 33 : index
    %312 = vector.load %arg20[%c0_284, %c33_285] : memref<32x290xf32, #tpu.memory_space<vmem>>, vector<32x256xf32>
    %c7_286 = arith.constant 7 : index
    %c0_287 = arith.constant 0 : index
    %c0_288 = arith.constant 0 : index
    %313 = vector.load %arg15[%c7_286, %c0_287, %c0_288] : memref<9x32x32xf32, #tpu.memory_space<vmem>>, vector<1x32x32xf32>
    %314 = vector.shape_cast %313 : vector<1x32x32xf32> to vector<32x32xf32>
    %cst_289 = arith.constant dense<0.000000e+00> : vector<32x256xf32>
    %315 = tpu.matmul %314, %312, %cst_289 {dimension_numbers = #tpu.dot_dimension_numbers<[1], [0], [0], [1], [0, 0, 1, 1], [], []>} : vector<32x32xf32>, vector<32x256xf32>, vector<32x256xf32> -> vector<32x256xf32>
    %316 = arith.addf %311, %315 : vector<32x256xf32>
    %c0_290 = arith.constant 0 : index
    %c34_291 = arith.constant 34 : index
    %317 = vector.load %arg20[%c0_290, %c34_291] : memref<32x290xf32, #tpu.memory_space<vmem>>, vector<32x256xf32>
    %c0_292 = arith.constant 0 : index
    %c0_293 = arith.constant 0 : index
    %318 = vector.load %arg4[%c0_292, %c0_293] : memref<1x256xf32, #tpu.memory_space<vmem>>, vector<1x256xf32>
    %319 = vector.broadcast %318 : vector<1x256xf32> to vector<32x256xf32>
    %320 = arith.mulf %317, %319 : vector<32x256xf32>
    %c8_294 = arith.constant 8 : index
    %c0_295 = arith.constant 0 : index
    %c0_296 = arith.constant 0 : index
    %321 = vector.load %arg15[%c8_294, %c0_295, %c0_296] : memref<9x32x32xf32, #tpu.memory_space<vmem>>, vector<1x32x32xf32>
    %322 = vector.shape_cast %321 : vector<1x32x32xf32> to vector<32x32xf32>
    %cst_297 = arith.constant dense<0.000000e+00> : vector<32x256xf32>
    %323 = tpu.matmul %322, %320, %cst_297 {dimension_numbers = #tpu.dot_dimension_numbers<[1], [0], [0], [1], [0, 0, 1, 1], [], []>} : vector<32x32xf32>, vector<32x256xf32>, vector<32x256xf32> -> vector<32x256xf32>
    %324 = arith.addf %316, %323 : vector<32x256xf32>
    %c0_298 = arith.constant 0 : index
    %c17_299 = arith.constant 17 : index
    %325 = vector.load %arg20[%c0_298, %c17_299] : memref<32x290xf32, #tpu.memory_space<vmem>>, vector<32x256xf32>
    tpu.vector_store %arg20[%c0_298, %c17_299], %261 {strides = array<i32>} : memref<32x290xf32, #tpu.memory_space<vmem>>, vector<32x256xf32>,
    %c0_300 = arith.constant 0 : index
    %c0_301 = arith.constant 0 : index
    %326 = vector.load %arg20[%c0_300, %c0_301] : memref<32x290xf32, #tpu.memory_space<vmem>>, vector<32x256xf32>
    %c0_302 = arith.constant 0 : index
    %c0_303 = arith.constant 0 : index
    %327 = vector.load %arg3[%c0_302, %c0_303] : memref<1x256xf32, #tpu.memory_space<vmem>>, vector<1x256xf32>
    %328 = vector.broadcast %327 : vector<1x256xf32> to vector<32x256xf32>
    %329 = arith.mulf %326, %328 : vector<32x256xf32>
    %c0_304 = arith.constant 0 : index
    %c0_305 = arith.constant 0 : index
    %c0_306 = arith.constant 0 : index
    %330 = vector.load %arg16[%c0_304, %c0_305, %c0_306] : memref<9x32x32xf32, #tpu.memory_space<vmem>>, vector<1x32x32xf32>
    %331 = vector.shape_cast %330 : vector<1x32x32xf32> to vector<32x32xf32>
    %cst_307 = arith.constant dense<0.000000e+00> : vector<32x256xf32>
    %332 = tpu.matmul %331, %329, %cst_307 {dimension_numbers = #tpu.dot_dimension_numbers<[1], [0], [0], [1], [0, 0, 1, 1], [], []>} : vector<32x32xf32>, vector<32x256xf32>, vector<32x256xf32> -> vector<32x256xf32>
    %333 = arith.addf %324, %332 : vector<32x256xf32>
    %c0_308 = arith.constant 0 : index
    %c1_309 = arith.constant 1 : index
    %334 = vector.load %arg20[%c0_308, %c1_309] : memref<32x290xf32, #tpu.memory_space<vmem>>, vector<32x256xf32>
    %c1_310 = arith.constant 1 : index
    %c0_311 = arith.constant 0 : index
    %c0_312 = arith.constant 0 : index
    %335 = vector.load %arg16[%c1_310, %c0_311, %c0_312] : memref<9x32x32xf32, #tpu.memory_space<vmem>>, vector<1x32x32xf32>
    %336 = vector.shape_cast %335 : vector<1x32x32xf32> to vector<32x32xf32>
    %cst_313 = arith.constant dense<0.000000e+00> : vector<32x256xf32>
    %337 = tpu.matmul %336, %334, %cst_313 {dimension_numbers = #tpu.dot_dimension_numbers<[1], [0], [0], [1], [0, 0, 1, 1], [], []>} : vector<32x32xf32>, vector<32x256xf32>, vector<32x256xf32> -> vector<32x256xf32>
    %338 = arith.addf %333, %337 : vector<32x256xf32>
    %c0_314 = arith.constant 0 : index
    %c2_315 = arith.constant 2 : index
    %339 = vector.load %arg20[%c0_314, %c2_315] : memref<32x290xf32, #tpu.memory_space<vmem>>, vector<32x256xf32>
    %c0_316 = arith.constant 0 : index
    %c0_317 = arith.constant 0 : index
    %340 = vector.load %arg4[%c0_316, %c0_317] : memref<1x256xf32, #tpu.memory_space<vmem>>, vector<1x256xf32>
    %341 = vector.broadcast %340 : vector<1x256xf32> to vector<32x256xf32>
    %342 = arith.mulf %339, %341 : vector<32x256xf32>
    %c2_318 = arith.constant 2 : index
    %c0_319 = arith.constant 0 : index
    %c0_320 = arith.constant 0 : index
    %343 = vector.load %arg16[%c2_318, %c0_319, %c0_320] : memref<9x32x32xf32, #tpu.memory_space<vmem>>, vector<1x32x32xf32>
    %344 = vector.shape_cast %343 : vector<1x32x32xf32> to vector<32x32xf32>
    %cst_321 = arith.constant dense<0.000000e+00> : vector<32x256xf32>
    %345 = tpu.matmul %344, %342, %cst_321 {dimension_numbers = #tpu.dot_dimension_numbers<[1], [0], [0], [1], [0, 0, 1, 1], [], []>} : vector<32x32xf32>, vector<32x256xf32>, vector<32x256xf32> -> vector<32x256xf32>
    %346 = arith.addf %338, %345 : vector<32x256xf32>
    %c0_322 = arith.constant 0 : index
    %c16_323 = arith.constant 16 : index
    %347 = vector.load %arg20[%c0_322, %c16_323] : memref<32x290xf32, #tpu.memory_space<vmem>>, vector<32x256xf32>
    %c0_324 = arith.constant 0 : index
    %c0_325 = arith.constant 0 : index
    %348 = vector.load %arg3[%c0_324, %c0_325] : memref<1x256xf32, #tpu.memory_space<vmem>>, vector<1x256xf32>
    %349 = vector.broadcast %348 : vector<1x256xf32> to vector<32x256xf32>
    %350 = arith.mulf %347, %349 : vector<32x256xf32>
    %c3_326 = arith.constant 3 : index
    %c0_327 = arith.constant 0 : index
    %c0_328 = arith.constant 0 : index
    %351 = vector.load %arg16[%c3_326, %c0_327, %c0_328] : memref<9x32x32xf32, #tpu.memory_space<vmem>>, vector<1x32x32xf32>
    %352 = vector.shape_cast %351 : vector<1x32x32xf32> to vector<32x32xf32>
    %cst_329 = arith.constant dense<0.000000e+00> : vector<32x256xf32>
    %353 = tpu.matmul %352, %350, %cst_329 {dimension_numbers = #tpu.dot_dimension_numbers<[1], [0], [0], [1], [0, 0, 1, 1], [], []>} : vector<32x32xf32>, vector<32x256xf32>, vector<32x256xf32> -> vector<32x256xf32>
    %354 = arith.addf %346, %353 : vector<32x256xf32>
    %c0_330 = arith.constant 0 : index
    %c17_331 = arith.constant 17 : index
    %355 = vector.load %arg20[%c0_330, %c17_331] : memref<32x290xf32, #tpu.memory_space<vmem>>, vector<32x256xf32>
    %c4_332 = arith.constant 4 : index
    %c0_333 = arith.constant 0 : index
    %c0_334 = arith.constant 0 : index
    %356 = vector.load %arg16[%c4_332, %c0_333, %c0_334] : memref<9x32x32xf32, #tpu.memory_space<vmem>>, vector<1x32x32xf32>
    %357 = vector.shape_cast %356 : vector<1x32x32xf32> to vector<32x32xf32>
    %cst_335 = arith.constant dense<0.000000e+00> : vector<32x256xf32>
    %358 = tpu.matmul %357, %355, %cst_335 {dimension_numbers = #tpu.dot_dimension_numbers<[1], [0], [0], [1], [0, 0, 1, 1], [], []>} : vector<32x32xf32>, vector<32x256xf32>, vector<32x256xf32> -> vector<32x256xf32>
    %359 = arith.addf %354, %358 : vector<32x256xf32>
    %c0_336 = arith.constant 0 : index
    %c18_337 = arith.constant 18 : index
    %360 = vector.load %arg20[%c0_336, %c18_337] : memref<32x290xf32, #tpu.memory_space<vmem>>, vector<32x256xf32>
    %c0_338 = arith.constant 0 : index
    %c0_339 = arith.constant 0 : index
    %361 = vector.load %arg4[%c0_338, %c0_339] : memref<1x256xf32, #tpu.memory_space<vmem>>, vector<1x256xf32>
    %362 = vector.broadcast %361 : vector<1x256xf32> to vector<32x256xf32>
    %363 = arith.mulf %360, %362 : vector<32x256xf32>
    %c5_340 = arith.constant 5 : index
    %c0_341 = arith.constant 0 : index
    %c0_342 = arith.constant 0 : index
    %364 = vector.load %arg16[%c5_340, %c0_341, %c0_342] : memref<9x32x32xf32, #tpu.memory_space<vmem>>, vector<1x32x32xf32>
    %365 = vector.shape_cast %364 : vector<1x32x32xf32> to vector<32x32xf32>
    %cst_343 = arith.constant dense<0.000000e+00> : vector<32x256xf32>
    %366 = tpu.matmul %365, %363, %cst_343 {dimension_numbers = #tpu.dot_dimension_numbers<[1], [0], [0], [1], [0, 0, 1, 1], [], []>} : vector<32x32xf32>, vector<32x256xf32>, vector<32x256xf32> -> vector<32x256xf32>
    %367 = arith.addf %359, %366 : vector<32x256xf32>
    %c0_344 = arith.constant 0 : index
    %c32_345 = arith.constant 32 : index
    %368 = vector.load %arg20[%c0_344, %c32_345] : memref<32x290xf32, #tpu.memory_space<vmem>>, vector<32x256xf32>
    %c0_346 = arith.constant 0 : index
    %c0_347 = arith.constant 0 : index
    %369 = vector.load %arg3[%c0_346, %c0_347] : memref<1x256xf32, #tpu.memory_space<vmem>>, vector<1x256xf32>
    %370 = vector.broadcast %369 : vector<1x256xf32> to vector<32x256xf32>
    %371 = arith.mulf %368, %370 : vector<32x256xf32>
    %c6_348 = arith.constant 6 : index
    %c0_349 = arith.constant 0 : index
    %c0_350 = arith.constant 0 : index
    %372 = vector.load %arg16[%c6_348, %c0_349, %c0_350] : memref<9x32x32xf32, #tpu.memory_space<vmem>>, vector<1x32x32xf32>
    %373 = vector.shape_cast %372 : vector<1x32x32xf32> to vector<32x32xf32>
    %cst_351 = arith.constant dense<0.000000e+00> : vector<32x256xf32>
    %374 = tpu.matmul %373, %371, %cst_351 {dimension_numbers = #tpu.dot_dimension_numbers<[1], [0], [0], [1], [0, 0, 1, 1], [], []>} : vector<32x32xf32>, vector<32x256xf32>, vector<32x256xf32> -> vector<32x256xf32>
    %375 = arith.addf %367, %374 : vector<32x256xf32>
    %c0_352 = arith.constant 0 : index
    %c33_353 = arith.constant 33 : index
    %376 = vector.load %arg20[%c0_352, %c33_353] : memref<32x290xf32, #tpu.memory_space<vmem>>, vector<32x256xf32>
    %c7_354 = arith.constant 7 : index
    %c0_355 = arith.constant 0 : index
    %c0_356 = arith.constant 0 : index
    %377 = vector.load %arg16[%c7_354, %c0_355, %c0_356] : memref<9x32x32xf32, #tpu.memory_space<vmem>>, vector<1x32x32xf32>
    %378 = vector.shape_cast %377 : vector<1x32x32xf32> to vector<32x32xf32>
    %cst_357 = arith.constant dense<0.000000e+00> : vector<32x256xf32>
    %379 = tpu.matmul %378, %376, %cst_357 {dimension_numbers = #tpu.dot_dimension_numbers<[1], [0], [0], [1], [0, 0, 1, 1], [], []>} : vector<32x32xf32>, vector<32x256xf32>, vector<32x256xf32> -> vector<32x256xf32>
    %380 = arith.addf %375, %379 : vector<32x256xf32>
    %c0_358 = arith.constant 0 : index
    %c34_359 = arith.constant 34 : index
    %381 = vector.load %arg20[%c0_358, %c34_359] : memref<32x290xf32, #tpu.memory_space<vmem>>, vector<32x256xf32>
    %c0_360 = arith.constant 0 : index
    %c0_361 = arith.constant 0 : index
    %382 = vector.load %arg4[%c0_360, %c0_361] : memref<1x256xf32, #tpu.memory_space<vmem>>, vector<1x256xf32>
    %383 = vector.broadcast %382 : vector<1x256xf32> to vector<32x256xf32>
    %384 = arith.mulf %381, %383 : vector<32x256xf32>
    %c8_362 = arith.constant 8 : index
    %c0_363 = arith.constant 0 : index
    %c0_364 = arith.constant 0 : index
    %385 = vector.load %arg16[%c8_362, %c0_363, %c0_364] : memref<9x32x32xf32, #tpu.memory_space<vmem>>, vector<1x32x32xf32>
    %386 = vector.shape_cast %385 : vector<1x32x32xf32> to vector<32x32xf32>
    %cst_365 = arith.constant dense<0.000000e+00> : vector<32x256xf32>
    %387 = tpu.matmul %386, %384, %cst_365 {dimension_numbers = #tpu.dot_dimension_numbers<[1], [0], [0], [1], [0, 0, 1, 1], [], []>} : vector<32x32xf32>, vector<32x256xf32>, vector<32x256xf32> -> vector<32x256xf32>
    %388 = arith.addf %380, %387 : vector<32x256xf32>
    %c0_366 = arith.constant 0 : index
    %c0_367 = arith.constant 0 : index
    %389 = vector.load %arg17[%c0_366, %c0_367] : memref<32x1xf32, #tpu.memory_space<vmem>>, vector<32x1xf32>
    %390 = vector.broadcast %389 : vector<32x1xf32> to vector<32x256xf32>
    %391 = arith.addf %388, %390 : vector<32x256xf32>
    %cst_368 = arith.constant 0.000000e+00 : f32
    %392 = vector.broadcast %cst_368 : f32 to vector<32x256xf32>
    %393 = arith.maximumf %391, %392 : vector<32x256xf32>
    %c0_369 = arith.constant 0 : index
    %c17_370 = arith.constant 17 : index
    %394 = vector.load %arg20[%c0_369, %c17_370] : memref<32x290xf32, #tpu.memory_space<vmem>>, vector<32x256xf32>
    tpu.vector_store %arg20[%c0_369, %c17_370], %393 {strides = array<i32>} : memref<32x290xf32, #tpu.memory_space<vmem>>, vector<32x256xf32>,
    %c0_371 = arith.constant 0 : index
    %c0_372 = arith.constant 0 : index
    %395 = vector.load %arg20[%c0_371, %c0_372] : memref<32x290xf32, #tpu.memory_space<vmem>>, vector<32x256xf32>
    %c0_373 = arith.constant 0 : index
    %c0_374 = arith.constant 0 : index
    %396 = vector.load %arg3[%c0_373, %c0_374] : memref<1x256xf32, #tpu.memory_space<vmem>>, vector<1x256xf32>
    %397 = vector.broadcast %396 : vector<1x256xf32> to vector<32x256xf32>
    %398 = arith.mulf %395, %397 : vector<32x256xf32>
    %c0_375 = arith.constant 0 : index
    %c0_376 = arith.constant 0 : index
    %c0_377 = arith.constant 0 : index
    %399 = vector.load %arg18[%c0_375, %c0_376, %c0_377] : memref<9x4x32xf32, #tpu.memory_space<vmem>>, vector<1x4x32xf32>
    %400 = vector.shape_cast %399 : vector<1x4x32xf32> to vector<4x32xf32>
    %cst_378 = arith.constant dense<0.000000e+00> : vector<4x256xf32>
    %401 = tpu.matmul %400, %398, %cst_378 {dimension_numbers = #tpu.dot_dimension_numbers<[1], [0], [0], [1], [0, 0, 1, 1], [], []>} : vector<4x32xf32>, vector<32x256xf32>, vector<4x256xf32> -> vector<4x256xf32>
    %c0_379 = arith.constant 0 : index
    %c1_380 = arith.constant 1 : index
    %402 = vector.load %arg20[%c0_379, %c1_380] : memref<32x290xf32, #tpu.memory_space<vmem>>, vector<32x256xf32>
    %c1_381 = arith.constant 1 : index
    %c0_382 = arith.constant 0 : index
    %c0_383 = arith.constant 0 : index
    %403 = vector.load %arg18[%c1_381, %c0_382, %c0_383] : memref<9x4x32xf32, #tpu.memory_space<vmem>>, vector<1x4x32xf32>
    %404 = vector.shape_cast %403 : vector<1x4x32xf32> to vector<4x32xf32>
    %cst_384 = arith.constant dense<0.000000e+00> : vector<4x256xf32>
    %405 = tpu.matmul %404, %402, %cst_384 {dimension_numbers = #tpu.dot_dimension_numbers<[1], [0], [0], [1], [0, 0, 1, 1], [], []>} : vector<4x32xf32>, vector<32x256xf32>, vector<4x256xf32> -> vector<4x256xf32>
    %406 = arith.addf %401, %405 : vector<4x256xf32>
    %c0_385 = arith.constant 0 : index
    %c2_386 = arith.constant 2 : index
    %407 = vector.load %arg20[%c0_385, %c2_386] : memref<32x290xf32, #tpu.memory_space<vmem>>, vector<32x256xf32>
    %c0_387 = arith.constant 0 : index
    %c0_388 = arith.constant 0 : index
    %408 = vector.load %arg4[%c0_387, %c0_388] : memref<1x256xf32, #tpu.memory_space<vmem>>, vector<1x256xf32>
    %409 = vector.broadcast %408 : vector<1x256xf32> to vector<32x256xf32>
    %410 = arith.mulf %407, %409 : vector<32x256xf32>
    %c2_389 = arith.constant 2 : index
    %c0_390 = arith.constant 0 : index
    %c0_391 = arith.constant 0 : index
    %411 = vector.load %arg18[%c2_389, %c0_390, %c0_391] : memref<9x4x32xf32, #tpu.memory_space<vmem>>, vector<1x4x32xf32>
    %412 = vector.shape_cast %411 : vector<1x4x32xf32> to vector<4x32xf32>
    %cst_392 = arith.constant dense<0.000000e+00> : vector<4x256xf32>
    %413 = tpu.matmul %412, %410, %cst_392 {dimension_numbers = #tpu.dot_dimension_numbers<[1], [0], [0], [1], [0, 0, 1, 1], [], []>} : vector<4x32xf32>, vector<32x256xf32>, vector<4x256xf32> -> vector<4x256xf32>
    %414 = arith.addf %406, %413 : vector<4x256xf32>
    %c0_393 = arith.constant 0 : index
    %c16_394 = arith.constant 16 : index
    %415 = vector.load %arg20[%c0_393, %c16_394] : memref<32x290xf32, #tpu.memory_space<vmem>>, vector<32x256xf32>
    %c0_395 = arith.constant 0 : index
    %c0_396 = arith.constant 0 : index
    %416 = vector.load %arg3[%c0_395, %c0_396] : memref<1x256xf32, #tpu.memory_space<vmem>>, vector<1x256xf32>
    %417 = vector.broadcast %416 : vector<1x256xf32> to vector<32x256xf32>
    %418 = arith.mulf %415, %417 : vector<32x256xf32>
    %c3_397 = arith.constant 3 : index
    %c0_398 = arith.constant 0 : index
    %c0_399 = arith.constant 0 : index
    %419 = vector.load %arg18[%c3_397, %c0_398, %c0_399] : memref<9x4x32xf32, #tpu.memory_space<vmem>>, vector<1x4x32xf32>
    %420 = vector.shape_cast %419 : vector<1x4x32xf32> to vector<4x32xf32>
    %cst_400 = arith.constant dense<0.000000e+00> : vector<4x256xf32>
    %421 = tpu.matmul %420, %418, %cst_400 {dimension_numbers = #tpu.dot_dimension_numbers<[1], [0], [0], [1], [0, 0, 1, 1], [], []>} : vector<4x32xf32>, vector<32x256xf32>, vector<4x256xf32> -> vector<4x256xf32>
    %422 = arith.addf %414, %421 : vector<4x256xf32>
    %c0_401 = arith.constant 0 : index
    %c17_402 = arith.constant 17 : index
    %423 = vector.load %arg20[%c0_401, %c17_402] : memref<32x290xf32, #tpu.memory_space<vmem>>, vector<32x256xf32>
    %c4_403 = arith.constant 4 : index
    %c0_404 = arith.constant 0 : index
    %c0_405 = arith.constant 0 : index
    %424 = vector.load %arg18[%c4_403, %c0_404, %c0_405] : memref<9x4x32xf32, #tpu.memory_space<vmem>>, vector<1x4x32xf32>
    %425 = vector.shape_cast %424 : vector<1x4x32xf32> to vector<4x32xf32>
    %cst_406 = arith.constant dense<0.000000e+00> : vector<4x256xf32>
    %426 = tpu.matmul %425, %423, %cst_406 {dimension_numbers = #tpu.dot_dimension_numbers<[1], [0], [0], [1], [0, 0, 1, 1], [], []>} : vector<4x32xf32>, vector<32x256xf32>, vector<4x256xf32> -> vector<4x256xf32>
    %427 = arith.addf %422, %426 : vector<4x256xf32>
    %c0_407 = arith.constant 0 : index
    %c18_408 = arith.constant 18 : index
    %428 = vector.load %arg20[%c0_407, %c18_408] : memref<32x290xf32, #tpu.memory_space<vmem>>, vector<32x256xf32>
    %c0_409 = arith.constant 0 : index
    %c0_410 = arith.constant 0 : index
    %429 = vector.load %arg4[%c0_409, %c0_410] : memref<1x256xf32, #tpu.memory_space<vmem>>, vector<1x256xf32>
    %430 = vector.broadcast %429 : vector<1x256xf32> to vector<32x256xf32>
    %431 = arith.mulf %428, %430 : vector<32x256xf32>
    %c5_411 = arith.constant 5 : index
    %c0_412 = arith.constant 0 : index
    %c0_413 = arith.constant 0 : index
    %432 = vector.load %arg18[%c5_411, %c0_412, %c0_413] : memref<9x4x32xf32, #tpu.memory_space<vmem>>, vector<1x4x32xf32>
    %433 = vector.shape_cast %432 : vector<1x4x32xf32> to vector<4x32xf32>
    %cst_414 = arith.constant dense<0.000000e+00> : vector<4x256xf32>
    %434 = tpu.matmul %433, %431, %cst_414 {dimension_numbers = #tpu.dot_dimension_numbers<[1], [0], [0], [1], [0, 0, 1, 1], [], []>} : vector<4x32xf32>, vector<32x256xf32>, vector<4x256xf32> -> vector<4x256xf32>
    %435 = arith.addf %427, %434 : vector<4x256xf32>
    %c0_415 = arith.constant 0 : index
    %c32_416 = arith.constant 32 : index
    %436 = vector.load %arg20[%c0_415, %c32_416] : memref<32x290xf32, #tpu.memory_space<vmem>>, vector<32x256xf32>
    %c0_417 = arith.constant 0 : index
    %c0_418 = arith.constant 0 : index
    %437 = vector.load %arg3[%c0_417, %c0_418] : memref<1x256xf32, #tpu.memory_space<vmem>>, vector<1x256xf32>
    %438 = vector.broadcast %437 : vector<1x256xf32> to vector<32x256xf32>
    %439 = arith.mulf %436, %438 : vector<32x256xf32>
    %c6_419 = arith.constant 6 : index
    %c0_420 = arith.constant 0 : index
    %c0_421 = arith.constant 0 : index
    %440 = vector.load %arg18[%c6_419, %c0_420, %c0_421] : memref<9x4x32xf32, #tpu.memory_space<vmem>>, vector<1x4x32xf32>
    %441 = vector.shape_cast %440 : vector<1x4x32xf32> to vector<4x32xf32>
    %cst_422 = arith.constant dense<0.000000e+00> : vector<4x256xf32>
    %442 = tpu.matmul %441, %439, %cst_422 {dimension_numbers = #tpu.dot_dimension_numbers<[1], [0], [0], [1], [0, 0, 1, 1], [], []>} : vector<4x32xf32>, vector<32x256xf32>, vector<4x256xf32> -> vector<4x256xf32>
    %443 = arith.addf %435, %442 : vector<4x256xf32>
    %c0_423 = arith.constant 0 : index
    %c33_424 = arith.constant 33 : index
    %444 = vector.load %arg20[%c0_423, %c33_424] : memref<32x290xf32, #tpu.memory_space<vmem>>, vector<32x256xf32>
    %c7_425 = arith.constant 7 : index
    %c0_426 = arith.constant 0 : index
    %c0_427 = arith.constant 0 : index
    %445 = vector.load %arg18[%c7_425, %c0_426, %c0_427] : memref<9x4x32xf32, #tpu.memory_space<vmem>>, vector<1x4x32xf32>
    %446 = vector.shape_cast %445 : vector<1x4x32xf32> to vector<4x32xf32>
    %cst_428 = arith.constant dense<0.000000e+00> : vector<4x256xf32>
    %447 = tpu.matmul %446, %444, %cst_428 {dimension_numbers = #tpu.dot_dimension_numbers<[1], [0], [0], [1], [0, 0, 1, 1], [], []>} : vector<4x32xf32>, vector<32x256xf32>, vector<4x256xf32> -> vector<4x256xf32>
    %448 = arith.addf %443, %447 : vector<4x256xf32>
    %c0_429 = arith.constant 0 : index
    %c34_430 = arith.constant 34 : index
    %449 = vector.load %arg20[%c0_429, %c34_430] : memref<32x290xf32, #tpu.memory_space<vmem>>, vector<32x256xf32>
    %c0_431 = arith.constant 0 : index
    %c0_432 = arith.constant 0 : index
    %450 = vector.load %arg4[%c0_431, %c0_432] : memref<1x256xf32, #tpu.memory_space<vmem>>, vector<1x256xf32>
    %451 = vector.broadcast %450 : vector<1x256xf32> to vector<32x256xf32>
    %452 = arith.mulf %449, %451 : vector<32x256xf32>
    %c8_433 = arith.constant 8 : index
    %c0_434 = arith.constant 0 : index
    %c0_435 = arith.constant 0 : index
    %453 = vector.load %arg18[%c8_433, %c0_434, %c0_435] : memref<9x4x32xf32, #tpu.memory_space<vmem>>, vector<1x4x32xf32>
    %454 = vector.shape_cast %453 : vector<1x4x32xf32> to vector<4x32xf32>
    %cst_436 = arith.constant dense<0.000000e+00> : vector<4x256xf32>
    %455 = tpu.matmul %454, %452, %cst_436 {dimension_numbers = #tpu.dot_dimension_numbers<[1], [0], [0], [1], [0, 0, 1, 1], [], []>} : vector<4x32xf32>, vector<32x256xf32>, vector<4x256xf32> -> vector<4x256xf32>
    %456 = arith.addf %448, %455 : vector<4x256xf32>
    %457 = vector.broadcast %12 : vector<1x256xf32> to vector<4x256xf32>
    %458 = arith.addf %457, %456 : vector<4x256xf32>
    %459 = arith.subf %3, %1 : f32
    %460 = vector.broadcast %459 : f32 to vector<4x256xf32>
    %461 = arith.mulf %458, %460 : vector<4x256xf32>
    %462 = vector.broadcast %1 : f32 to vector<4x256xf32>
    %463 = arith.addf %461, %462 : vector<4x256xf32>
    %c0_437 = arith.constant 0 : index
    %c0_438 = arith.constant 0 : index
    %c0_439 = arith.constant 0 : index
    %464 = vector.load %arg19[%c0_437, %c0_438, %c0_439] : memref<1x4x256xf32, #tpu.memory_space<vmem>>, vector<1x4x256xf32>
    %465 = vector.shape_cast %464 : vector<1x4x256xf32> to vector<4x256xf32>
    %466 = vector.shape_cast %463 : vector<4x256xf32> to vector<1x4x256xf32>
    tpu.vector_store %arg19[%c0_437, %c0_438, %c0_439], %466 {strides = array<i32>} : memref<1x4x256xf32, #tpu.memory_space<vmem>>, vector<1x4x256xf32>,
    return
  }
  func.func @transform_0(%arg0: i32) -> i32 {
    %c0_i32 = arith.constant 0 : i32
    %c0_i32_0 = arith.constant 0 : i32
    return %c0_i32 : i32
  }
  func.func @transform_1(%arg0: i32) -> i32 {
    %c0_i32 = arith.constant 0 : i32
    %c0_i32_0 = arith.constant 0 : i32
    return %c0_i32 : i32
  }
  func.func @transform_2(%arg0: i32) -> (i32, i32) {
    %c0_i32 = arith.constant 0 : i32
    %c0_i32_0 = arith.constant 0 : i32
    %c0_i32_1 = arith.constant 0 : i32
    return %c0_i32, %c0_i32_0 : i32, i32
  }
  func.func @transform_3(%arg0: i32) -> (i32, i32) {
    %c0_i32 = arith.constant 0 : i32
    %c0_i32_0 = arith.constant 0 : i32
    %c0_i32_1 = arith.constant 0 : i32
    return %c0_i32, %c0_i32_0 : i32, i32
  }
  func.func @transform_4(%arg0: i32) -> (i32, i32, i32) {
    %c0_i32 = arith.constant 0 : i32
    %c0_i32_0 = arith.constant 0 : i32
    %c0_i32_1 = arith.constant 0 : i32
    return %arg0, %c0_i32, %c0_i32_0 : i32, i32, i32
  }
  func.func @transform_5(%arg0: i32) -> (i32, i32, i32) {
    %c0_i32 = arith.constant 0 : i32
    %c0_i32_0 = arith.constant 0 : i32
    %c0_i32_1 = arith.constant 0 : i32
    return %arg0, %c0_i32, %c0_i32_0 : i32, i32, i32
  }
  func.func @transform_6(%arg0: i32) -> (i32, i32, i32) {
    %c0_i32 = arith.constant 0 : i32
    %c0_i32_0 = arith.constant 0 : i32
    %c0_i32_1 = arith.constant 0 : i32
    %c0_i32_2 = arith.constant 0 : i32
    return %c0_i32, %c0_i32_0, %c0_i32_1 : i32, i32, i32
  }
  func.func @transform_7(%arg0: i32) -> (i32, i32) {
    %c0_i32 = arith.constant 0 : i32
    %c0_i32_0 = arith.constant 0 : i32
    %c0_i32_1 = arith.constant 0 : i32
    return %c0_i32, %c0_i32_0 : i32, i32
  }
  func.func @transform_8(%arg0: i32) -> (i32, i32, i32) {
    %c0_i32 = arith.constant 0 : i32
    %c0_i32_0 = arith.constant 0 : i32
    %c0_i32_1 = arith.constant 0 : i32
    %c0_i32_2 = arith.constant 0 : i32
    return %c0_i32, %c0_i32_0, %c0_i32_1 : i32, i32, i32
  }
  func.func @transform_9(%arg0: i32) -> (i32, i32) {
    %c0_i32 = arith.constant 0 : i32
    %c0_i32_0 = arith.constant 0 : i32
    %c0_i32_1 = arith.constant 0 : i32
    return %c0_i32, %c0_i32_0 : i32, i32
  }
  func.func @transform_10(%arg0: i32) -> (i32, i32, i32) {
    %c0_i32 = arith.constant 0 : i32
    %c0_i32_0 = arith.constant 0 : i32
    %c0_i32_1 = arith.constant 0 : i32
    %c0_i32_2 = arith.constant 0 : i32
    return %c0_i32, %c0_i32_0, %c0_i32_1 : i32, i32, i32
  }
  func.func @transform_11(%arg0: i32) -> (i32, i32) {
    %c0_i32 = arith.constant 0 : i32
    %c0_i32_0 = arith.constant 0 : i32
    %c0_i32_1 = arith.constant 0 : i32
    return %c0_i32, %c0_i32_0 : i32, i32
  }
  func.func @transform_12(%arg0: i32) -> (i32, i32, i32) {
    %c0_i32 = arith.constant 0 : i32
    %c0_i32_0 = arith.constant 0 : i32
    %c0_i32_1 = arith.constant 0 : i32
    %c0_i32_2 = arith.constant 0 : i32
    return %c0_i32, %c0_i32_0, %c0_i32_1 : i32, i32, i32
  }
  func.func @transform_13(%arg0: i32) -> (i32, i32) {
    %c0_i32 = arith.constant 0 : i32
    %c0_i32_0 = arith.constant 0 : i32
    %c0_i32_1 = arith.constant 0 : i32
    return %c0_i32, %c0_i32_0 : i32, i32
  }
  func.func @transform_14(%arg0: i32) -> (i32, i32, i32) {
    %c0_i32 = arith.constant 0 : i32
    %c0_i32_0 = arith.constant 0 : i32
    %c0_i32_1 = arith.constant 0 : i32
    %c0_i32_2 = arith.constant 0 : i32
    return %c0_i32, %c0_i32_0, %c0_i32_1 : i32, i32, i32
  }
  func.func @transform_15(%arg0: i32) -> (i32, i32, i32) {
    %c0_i32 = arith.constant 0 : i32
    %c0_i32_0 = arith.constant 0 : i32
    %c0_i32_1 = arith.constant 0 : i32
    %c0_i32_2 = arith.constant 0 : i32
    return %c0_i32, %c0_i32_0, %c0_i32_1 : i32, i32, i32
  }
  func.func @transform_16(%arg0: i32) -> (i32, i32) {
    %c0_i32 = arith.constant 0 : i32
    %c0_i32_0 = arith.constant 0 : i32
    %c0_i32_1 = arith.constant 0 : i32
    return %c0_i32, %c0_i32_0 : i32, i32
  }
  func.func @transform_17(%arg0: i32) -> (i32, i32, i32) {
    %c0_i32 = arith.constant 0 : i32
    %c0_i32_0 = arith.constant 0 : i32
    %c0_i32_1 = arith.constant 0 : i32
    %c0_i32_2 = arith.constant 0 : i32
    return %c0_i32, %c0_i32_0, %c0_i32_1 : i32, i32, i32
  }
  func.func @transform_18(%arg0: i32) -> (i32, i32, i32) {
    %c0_i32 = arith.constant 0 : i32
    %c0_i32_0 = arith.constant 0 : i32
    %c0_i32_1 = arith.constant 0 : i32
    return %arg0, %c0_i32, %c0_i32_0 : i32, i32, i32
  }
}

</mosaic_0001>

<bundles_post_ra>
// kernel: refinement_forward.1
= control target key start
LH: loop header
LB: loop body
LE: loop exit
PB: predicated region body
PF: predicated region fallthrough
CT: control target
= control target key end

     0   :  { %s13160_s0 = inlined_call_operand.vmem [shape: f32[2], index: 0, kind: input, shape index: {}]   ;;  %s13161_s1 = inlined_call_operand.vmem [shape: f32[2], index: 1, kind: input, shape index: {}]   ;;  %s13162_s2 = inlined_call_operand.vmem [shape: f32[1,256], index: 2, kind: input, shape index: {}]   ;;  %s13163_s3 = inlined_call_operand.vmem [shape: f32[1,256], index: 3, kind: input, shape index: {}]   ;;  %s13164_s4 = inlined_call_operand.vmem [shape: f32[2,1,256], index: 4, kind: input, shape index: {}]   ;;  %s13165_s5 = inlined_call_operand.vmem [shape: f32[2,12,256], index: 5, kind: input, shape index: {}]   ;;  %s13166_s6 = inlined_call_operand.vmem [shape: f32[9,8,1], index: 6, kind: input, shape index: {}]   ;;  %s13167_s7 = inlined_call_operand.vmem [shape: f32[8,1], index: 7, kind: input, shape index: {}]   ;;  %s13168_s8 = inlined_call_operand.vmem [shape: f32[9,8,8], index: 8, kind: input, shape index: {}]   ;;  %s13169_s9 = inlined_call_operand.vmem [shape: f32[8,1], index: 9, kind: input, shape index: {}]   ;;  %s13170_s10 = inlined_call_operand.vmem [shape: f32[4,32,8], index: 10, kind: input, shape index: {}]   ;;  %s13171_s11 = inlined_call_operand.vmem [shape: f32[32,1], index: 11, kind: input, shape index: {}]   ;;  %s13172_s12 = inlined_call_operand.vmem [shape: f32[9,32,12], index: 12, kind: input, shape index: {}]   ;;  %s13173_s13 = inlined_call_operand.vmem [shape: f32[32,1], index: 13, kind: input, shape index: {}]   ;;  %s13174_s14 = inlined_call_operand.vmem [shape: f32[9,32,32], index: 14, kind: input, shape index: {}]   ;;  %s13175_s15 = inlined_call_operand.vmem [shape: f32[9,32,32], index: 15, kind: input, shape index: {}]   ;;  %s13176_s16 = inlined_call_operand.vmem [shape: f32[32,1], index: 16, kind: input, shape index: {}]   ;;  %s13177_s17 = inlined_call_operand.vmem [shape: f32[9,4,32], index: 17, kind: input, shape index: {}]   ;;  %s13178_s18 = inlined_call_operand.vmem [shape: f32[2,4,256], index: 18, kind: output, shape index: {}]  }
   0x1   :  { %13220 = sst [smem:[#allocation11_spill]] %s13160_s0 }
   0x2   :  { %13221 = sst [smem:[#allocation12_spill]] %s13161_s1 }
   0x3   :  { %13222 = sst [smem:[#allocation13_spill]] %s13162_s2 }
   0x4   :  { %13223 = sst [smem:[#allocation14_spill]] %s13164_s4 }
   0x5   :  { %13224 = sst [smem:[#allocation15_spill]] %s13165_s5 }
   0x6   :  { %13225 = sst [smem:[#allocation16_spill]] %s13166_s6 }
   0x7   :  { %13226 = sst [smem:[#allocation17_spill]] %s13167_s7 }
   0x8   :  { %13227 = sst [smem:[#allocation18_spill]] %s13168_s8 }
   0x9   :  { %13228 = sst [smem:[#allocation19_spill]] %s13169_s9 }
   0xa   :  { %13229 = sst [smem:[#allocation20_spill]] %s13170_s10 }
   0xb   :  { %13230 = sst [smem:[#allocation21_spill]] %s13171_s11 }
   0xc   :  { %23 = vsyncpa [#allocation4], 0 }
   0xd   :  { %24 = vsyncpa [#allocation6], 0  ;;  %s10446_s27 = smov 0  }
   0xe LB: > { %s10452_s28 = sadd.s32 4294967295, %s10330_s27   ;;  %p8559_p0 = scmp.ge.s32.totalorder %s10330_s27, 1  ;;  %s10330_s27 = sphi %s10446_s27, %s30_s27  }
   0xf   : > { %p449_p1 = scmp.lt.s32.totalorder %s10330_s27, 3  ;;  %s13231_s0 = sld [smem:[#allocation11_spill]] }
  0x10   : > { %p13180_p3 = scmp.eq.s32.totalorder %s10452_s28, 0  ;;  %s13233_s22 = sld [smem:[#allocation12_spill]] }
  0x11   : > { %p10459_p2 = pnand %p8559_p0, %p449_p1 }
  0x13   : > { %s13232_s1 = scalar_select %p10459_p2, 1, 0 }
  0x14   : > { %p9403_p4 = pneg %p10459_p2 }
  0x15   : > { %s462_s19 = sshll.u32 %s13231_s0, 4  ;;  %s463_s19 = int_to_ptr.vmem [resolvable:$true] %s462_s19 }
  0x16   : > { %s473_s2 = sshll.u32 %s13233_s22, 4  ;;  %p10471_p5 = pnand %p13180_p3, %p9403_p4  ;;  %s474_s2 = int_to_ptr.vmem [resolvable:$true] %s473_s2 }
  0x17   : > { %s10286_s24 = scalar_lea.vmem %s463_s19, 16  ;;  %p10294_p10 = scmp.lt.s32.totalorder %s463_s19, %s463_s19 }
  0x18   : > { %p10287_p6 = scmp.ne.s32.totalorder %s463_s19, %s10286_s24  ;;  %p10288_p7 = pneg %p10471_p5 }
  0x19   : > { %p10295_p11 = scmp.lt.s32.totalorder %s10286_s24, %s10286_s24 }
  0x1a   : > { %p10289_p8 = pnand %p10288_p7, %p10287_p6 }
  0x1b   : > { %p10296_p12 = por %p10295_p11, %p10294_p10 }
  0x1c   : > { %p10290_p9 = pneg %p10289_p8 }
  0x1e   : > { %p10297_p13 = pnand %p10296_p12, %p10290_p9 }
  0x20   : > { %10300 = shalt.err (!%p10297_p13)
}
  0x21   : > { %s10332_s25 = smov [#allocation3]   ;;  %s10301_s26 = scalar_lea.vmem %s474_s2, 16 }
  0x22   : > { %9406 = dma.vmem_to_smem (!%p10471_p5), %s463_s19, 16, %s10332_s25, [#allocation4]  }
  0x23   : > { %p10302_p0 = scmp.ne.s32.totalorder %s474_s2, %s10301_s26  ;;  %p10309_p3 = scmp.lt.s32.totalorder %s474_s2, %s474_s2 }
  0x24   : > { %p10310_p2 = scmp.lt.s32.totalorder %s10301_s26, %s10301_s26 }
  0x25   : > { %p10304_p1 = pnand %p10302_p0, %p10288_p7 }
  0x26   : > { %p10311_p6 = por %p10310_p2, %p10309_p3 }
  0x27   : > { %p10305_p4 = pneg %p10304_p1 }
  0x29   : > { %p10312_p8 = pnand %p10311_p6, %p10305_p4 }
  0x2b   : > { %10315 = shalt.err (!%p10312_p8)
}
  0x2c   : > { %s10333_s29 = smov [#allocation5]   ;;  %p13235_p9 = scmp.ne.s32.totalorder %s13232_s1, 0 }
  0x2d   : > { %9409 = dma.vmem_to_smem (!%p10471_p5), %s474_s2, 16, %s10333_s29, [#allocation6]  }
  0x2e   : > { %543 = sbr.rel (%p13235_p9) target bundleno = 3048 (0xbe8), region = 92 }
  0x35   : > { %p13236_p10 = scmp.eq.s32.totalorder %s10452_s28, 0 }
  0x37   : > { %10321 = dma.done.wait (%p13236_p10), [#allocation4], 16   ;;  %p13237_p11 = pmov %p13236_p10 }
  0x38   : > { %p13238_p7 = pmov %p13236_p10 }
  0x39   : > { %10323 = vsyncadd (%p13237_p11), [#allocation4], 4294967280 }
  0x3a   : > { %10325 = dma.done.wait (%p13238_p7), [#allocation6], 16   ;;  %p13239_p2 = pmov %p13238_p7 }
  0x3c   : > { %10327 = vsyncadd (%p13239_p2), [#allocation6], 4294967280 }
  0x3d   : > { %553 = sfence }
  0x3e   : > { %v720_v0 = vld [vmem:[%s13163_s3] sm:$0x3]  ;;  %s13240_s6 = sld [smem:[#allocation16_spill]]  ;;  %s13202_s20 = smov 2   ;;  %v10335_v2 = vmov 0   ;;  %vm13213_vm0 = vcmask 277504   ;;  %v649_v21 = vlaneseq }
  0x3f   : > { %722 = vrot.lane.b32.xlu1 %v720_v0, %s13202_s20  ;;  %9441 = vset.pattern.permute.xlu0 %v10335_v2  ;;  %p606_p3 = scmp.lt.s32.totalorder %s10452_s28, 1  ;;  %s10503_s2 = sld [smem:[#allocation3 + %s10452_s28]]  ;;  %v10337_v7 = vmov 0.0   ;;  %vm646_vm3 = vcmask 138240   ;;  %vm725_vm5 = vcmask 15360   ;;  %vm775_vm6 = vcmask 130048  }
  0x40   : > { %9442 = vset.pattern.permute.xlu1 %v10335_v2  ;;  %s621_s23 = sld [smem:[#allocation5 + %s10452_s28]]  ;;  %s13200_s30 = smov 16   ;;  %622 = vst [vmem:[#allocation2] sm:$0xff] %v10337_v7  ;;  %623 = vst [vmem:[#allocation2 + $0x8] sm:$0xff] %v10337_v7  ;;  %1144 = vmatprep.mubr.f32.mxu0 %v10337_v7  ;;  %vm650_vm1 = vcmp.ge.s32.totalorder %v649_v21, 17  ;;  %vm651_vm2 = vcmp.lt.s32.totalorder %v649_v21, 273 }
  0x41   : > { %s13374_s28 = smov (!%p606_p3, %s10452_s28), 1  ;;  %s13241_s26 = sld [smem:[#allocation13_spill]]  ;;  %625 = vst.msk [vmem:[#allocation2 + $0x10] sm:$0xff] %vm13213_vm0, %v10337_v7  ;;  %626 = vst [vmem:[#allocation2 + $0x18] sm:$0xff] %v10337_v7  ;;  %2440 = vmatprep.mubr.f32.mxu1 %v10337_v7  ;;  %v666_v26 = vshrl.u32 %v649_v21, 7  ;;  %vm850_vm7 = vcmask 146432  }
  0x42   : > { %s8566_s0 = sshll.u32 %s13374_s28, 1  ;;  %s13243_s4 = sld [smem:[#allocation14_spill]]  ;;  %627 = vst [vmem:[#allocation2 + $0x20] sm:$0xff] %v10337_v7  ;;  %628 = vst.msk [vmem:[#allocation2 + $0x28] sm:$0xff] %vm13213_vm0, %v10337_v7  ;;  %vm899_vm8 = vcmask 261120   ;;  %vm713_vm9 = vcmask 1039360  }
  0x43   : > { %629 = vst [vmem:[#allocation2 + $0x30] sm:$0xff] %v10337_v7  ;;  %631 = vst.msk [vmem:[#allocation2 + $0x40] sm:$0xff] %vm13213_vm0, %v10337_v7  ;;  %s13207_s19 = smov 17   ;;  %s13204_s1 = smov 34   ;;  %v10579_v28 = vsub.s32 0, %v666_v26  ;;  %v10581_v29 = vsub.s32 1, %v666_v26 }
  0x44   : > { %v8571_v1 = vld [vmem:[%s13240_s6 + $0x8] sm:$0xff]  ;;  %v8572_v3 = vld [vmem:[%s13240_s6 + $0x10] sm:$0xff]  ;;  %v8574_v5 = vld [vmem:[%s13240_s6 + $0x20] sm:$0xff]  ;;  %632 = vst [vmem:[#allocation2 + $0x48] sm:$0xff] %v10337_v7  ;;  %s13194_s25 = smov 32   ;;  %s13245_s7 = sld [smem:[#allocation17_spill]] }
  0x45   : > { %682 = vperm.xlu0 %9441, %v8571_v1   ;;  %733 = vperm.xlu1 %9442, %v8572_v3   ;;  %634 = vst.msk [vmem:[#allocation2 + $0x58] sm:$0xff] %vm13213_vm0, %v10337_v7  ;;  %v8575_v8 = vld [vmem:[%s13240_s6 + $0x28] sm:$0xff]  ;;  %v10547_v10 = vstv %s10503_s2  ;;  %v8576_v11 = vld [vmem:[%s13240_s6 + $0x30] sm:$0xff]  ;;  %v8573_v15 = vld [vmem:[%s13240_s6 + $0x18] sm:$0xff]  ;;  %v10583_v30 = vsub.s32 2, %v666_v26  ;;  %s13196_s21 = smov 126  }
  0x46   : > { %s638_s29 = ssub.f32 %s621_s23, %s10503_s2  ;;  %13244 = vst [vmem:[#allocation10_spill] sm:$0xff] %v10547_v10  ;;  %v658_v16 = vld [vmem:[%s13240_s6] sm:$0xff]  ;;  %s13210_s23 = smov 18   ;;  %v8577_v17 = vld [vmem:[%s13240_s6 + $0x38] sm:$0xff]  ;;  %vm652_vm4 = vmand %vm650_vm1, %vm651_vm2  ;;  %vm764_vm10 = vcmask 1031168   ;;  %vm13215_vm11 = vcmask 916480  }
  0x47   : > { %v10512_v4 = vld [vmem:[%s13241_s26] sm:$0x3]  ;;  %s13182_s2 = smov 95   ;;  %s13192_s22 = smov 112   ;;  %vm13214_vm12 = vcmask 908288   ;;  %vm13212_vm13 = vcmask 900096  }
  0x48   : > { %v10521_v6 = vstv %s638_s29  ;;  %s609_s24 = scalar_lea.vmem %s13243_s4, %s8566_s0  ;;  %v8578_v18 = vld [vmem:[%s13240_s6 + $0x40] sm:$0xff]  ;;  %s13198_s29 = smov 127   ;;  %vm13209_vm14 = vcmask 785408   ;;  %vm964_vm15 = vcmask 777216   ;;  %vm1012_vm1 = vcmask 769024  }
  0x49   : > { %772 = vrot.lane.b32.xlu1 %v10512_v4, %s13200_s30  ;;  %13242 = vst [vmem:[#allocation9_spill] sm:$0xff] %v10521_v6  ;;  %10283 = vrcp.f32 %v10521_v6  ;;  %v635_v9 = vld [vmem:[%s609_s24] sm:$0x3]  ;;  %s13184_s0 = smov 111   ;;  %s13190_s24 = smov 110   ;;  %vm13206_vm2 = vcmask 1047688  }
  0x4a   : > { %v637_v12 = vsub.f32 %v635_v9, %v10547_v10  ;;  %v1019_v19 = vld [vmem:[%s13245_s7] sm:$0xff]  ;;  %s13251_s8 = sld [smem:[#allocation18_spill]]  ;;  %s13253_s9 = sld [smem:[#allocation19_spill]] }
  0x4b   : > { %s13254_s5 = sld [smem:[#allocation15_spill]]  ;;  %s13259_s10 = sld [smem:[#allocation20_spill]] }
  0x4c   : > { %s13262_s6 = smov 32   ;;  %s13265_s11 = sld [smem:[#allocation21_spill]] }
  0x4d   : > { %825 = vperm.xlu1 %9442, %v8574_v5  }
  0x51   : > { %858 = vperm.xlu1 %9442, %v8575_v8  }
  0x53   : > { %v10284_v13 = vpop.eup %10283 }
  0x54   : > { %v10553_v14 = vmul.f32 %v10284_v13, %v637_v12 }
  0x55   : > { %907 = vperm.xlu1 %9442, %v8576_v11  }
  0x56   : > { %643 = vrot.lane.b32.xlu0 %v10553_v14, %s13207_s19 }
  0x59   : > { %971 = vrot.lane.b32.xlu1 %v720_v0, %s13204_s1 }
  0x5a   : > { %783 = vperm.xlu0 %9441, %v8573_v15  }
  0x5d   : > { %661 = vperm.xlu1 %9442, %v658_v16  }
  0x5e   : > { %847 = vrot.lane.b32.xlu0 %v720_v0, %s13210_s23 }
  0x62   : > { %896 = vrot.lane.b32.xlu0 %v10512_v4, %s13194_s25 }
  0x66   : > { %949 = vperm.xlu0 %9441, %v8577_v17  }
  0x6a   : > { %981 = vperm.xlu0 %9441, %v8578_v18  }
  0x6e   : > { %1022 = vperm.xlu0 %9441, %v1019_v19  }
  0xb1   : > { %v723_v22 = vpop.permute.xlu1 %722 }
  0xb2   : > { %v724_v42 = vrot.slane %v723_v22, 7 }
  0xb4   : > { %v726_v46 = vsel %vm725_vm5, %v724_v42, %v723_v22 }
  0xc4   : > { %v683_v20 = vpop.permute.xlu0 %682  ;;  %v10577_v27 = vpop.permute.xlu1 %733 }
  0xc8   : > { %v644_v23 = vpop.permute.xlu0 %643  ;;  %v773_v31 = vpop.permute.xlu1 %772 }
  0xc9   : > { %v645_v24 = vrot.slane %v644_v23, 7  ;;  %v774_v49 = vrot.slane %v773_v31, 7 }
  0xcb   : > { %v647_v25 = vsel %vm646_vm3, %v645_v24, %v644_v23  ;;  %v776_v55 = vsel %vm775_vm6, %v774_v49, %v773_v31 }
  0xcc   : > { %653 = vst.msk [vmem:[#allocation2] ss:$8 sm:$0x7] %vm652_vm4, %v647_v25  ;;  %v826_v38 = vpop.permute.xlu1 %825  ;;  %vm1076_vm4 = vcmask 64512  }
  0xd0   : > { %v859_v51 = vpop.permute.xlu1 %858 }
  0xd3   : > { %v10585_v32 = vld [vmem:[#allocation2] ss:$8 sm:$0x7] }
  0xd4   : > { %v693_v33 = vrot.slane %v10585_v32, %v10581_v29  ;;  %v689_v34 = vrot.slane %v10585_v32, %v10579_v28  ;;  %v697_v37 = vrot.slane %v10585_v32, %v10583_v30  ;;  %v728_v48 = vmul.f32 %v726_v46, %v10585_v32  ;;  %v908_v62 = vpop.permute.xlu1 %907 }
  0xd5   : > { %v778_v57 = vmul.f32 %v776_v55, %v10585_v32 }
  0xd6   : > { %v702_v35 = vmul.f32 %v693_v33, %v683_v20  ;;  %v701_v36 = vmul.f32 %v689_v34, %v683_v20  ;;  %v828_v40 = vmul.f32 %v826_v38, %v689_v34  ;;  %v703_v41 = vmul.f32 %v697_v37, %v683_v20 }
  0xd7   : > { %v830_v44 = vmul.f32 %v826_v38, %v697_v37  ;;  %v829_v45 = vmul.f32 %v826_v38, %v693_v33  ;;  %v744_v54 = vrot.slane %v728_v48, %v10581_v29  ;;  %v740_v60 = vrot.slane %v728_v48, %v10579_v28 }
  0xd8   : > { %709 = vrot.lane.b32.xlu1 %v702_v35, %s13198_s29  ;;  %707 = vrot.lane.b32.xlu0 %v701_v36, %s13198_s29  ;;  %v790_v63 = vrot.slane %v778_v57, %v10579_v28  ;;  %v748_v3 = vrot.slane %v728_v48, %v10583_v30  ;;  %v798_v8 = vrot.slane %v778_v57, %v10583_v30  ;;  %v972_v9 = vpop.permute.xlu1 %971 }
  0xd9   : > { %v784_v39 = vpop.permute.xlu0 %783  ;;  %v753_v58 = vmul.f32 %v744_v54, %v10577_v27  ;;  %v752_v2 = vmul.f32 %v740_v60, %v10577_v27  ;;  %v794_v16 = vrot.slane %v778_v57, %v10581_v29  ;;  %v973_v17 = vrot.slane %v972_v9, 7 }
  0xda   : > { %v802_v1 = vmul.f32 %v790_v63, %v784_v39  ;;  %v804_v11 = vmul.f32 %v798_v8, %v784_v39  ;;  %v754_v12 = vmul.f32 %v748_v3, %v10577_v27 }
  0xdb   : > { %v803_v18 = vmul.f32 %v794_v16, %v784_v39  ;;  %v974_v23 = vsel %vm13213_vm0, %v973_v17, %v972_v9 }
  0xdc   : > { %834 = vrot.lane.b32.xlu1 %v828_v40, %s13184_s0  ;;  %711 = vrot.lane.b32.xlu0 %v703_v41, %s13198_s29  ;;  %v976_v31 = vmul.f32 %v974_v23, %v10585_v32 }
  0xdd   : > { %v848_v43 = vpop.permute.xlu0 %847 }
  0xde   : > { %v849_v56 = vrot.slane %v848_v43, 7  ;;  %v996_v40 = vrot.slane %v976_v31, %v10583_v30 }
  0xe0   : > { %838 = vrot.lane.b32.xlu1 %v830_v44, %s13184_s0  ;;  %836 = vrot.lane.b32.xlu0 %v829_v45, %s13184_s0  ;;  %v851_v61 = vsel %vm850_vm7, %v849_v56, %v848_v43  ;;  %s13186_s0 = smov 94   ;;  %v662_v43 = vpop.permute.xlu1 %661 }
  0xe1   : > { %v897_v47 = vpop.permute.xlu0 %896  ;;  %v853_v0 = vmul.f32 %v851_v61, %v10585_v32 }
  0xe2   : > { %v898_v5 = vrot.slane %v897_v47, 7 }
  0xe3   : > { %v865_v13 = vrot.slane %v853_v0, %v10579_v28  ;;  %v873_v21 = vrot.slane %v853_v0, %v10583_v30  ;;  %v869_v22 = vrot.slane %v853_v0, %v10581_v29 }
  0xe4   : > { %v900_v15 = vsel %vm899_vm8, %v898_v5, %v897_v47 }
  0xe5   : > { %v950_v50 = vpop.permute.xlu0 %949  ;;  %v902_v19 = vmul.f32 %v900_v15, %v10585_v32  ;;  %v877_v20 = vmul.f32 %v865_v13, %v859_v51  ;;  %v879_v24 = vmul.f32 %v873_v21, %v859_v51  ;;  %v878_v25 = vmul.f32 %v869_v22, %v859_v51 }
  0xe6   : > { %v953_v52 = vmul.f32 %v950_v50, %v693_v33  ;;  %v952_v53 = vmul.f32 %v950_v50, %v689_v34  ;;  %v954_v59 = vmul.f32 %v950_v50, %v697_v37  ;;  %v988_v37 = vrot.slane %v976_v31, %v10579_v28 }
  0xe7   : > { %v918_v26 = vrot.slane %v902_v19, %v10581_v29  ;;  %v914_v27 = vrot.slane %v902_v19, %v10579_v28  ;;  %v922_v35 = vrot.slane %v902_v19, %v10583_v30  ;;  %v992_v32 = vrot.slane %v976_v31, %v10581_v29 }
  0xe8   : > { %960 = vrot.lane.b32.xlu0 %v953_v52, %s13182_s2  ;;  %958 = vrot.lane.b32.xlu1 %v952_v53, %s13182_s2  ;;  %v655_v53 = vld [vmem:[#allocation2] ss:$8 sm:$0x3] }
  0xe9   : > { %v927_v33 = vmul.f32 %v918_v26, %v908_v62  ;;  %v926_v34 = vmul.f32 %v914_v27, %v908_v62  ;;  %v982_v36 = vpop.permute.xlu0 %981  ;;  %v928_v38 = vmul.f32 %v922_v35, %v908_v62  ;;  %v657_v55 = vmul.f32 %v10512_v4, %v655_v53 }
  0xea   : > { %v1000_v39 = vmul.f32 %v988_v37, %v982_v36  ;;  %v1001_v41 = vmul.f32 %v992_v32, %v982_v36  ;;  %v1002_v42 = vmul.f32 %v996_v40, %v982_v36 }
  0xeb   : > { %v672_v60 = vrot.slane %v657_v55, %v10581_v29 }
  0xec   : > { %760 = vrot.lane.b32.xlu0 %v753_v58, %s13196_s21  ;;  %962 = vrot.lane.b32.xlu1 %v954_v59, %s13182_s2  ;;  %s13188_s2 = smov 96   ;;  %v668_v58 = vrot.slane %v657_v55, %v10579_v28 }
  0xed   : > { %v10645_v44 = vpop.permute.xlu0 %1022 }
  0xee   : > { %v675_v61 = vmul.f32 %v668_v58, %v662_v43 }
  0xf0   : > { %808 = vrot.lane.b32.xlu0 %v802_v1, %s13192_s22  ;;  %758 = vrot.lane.b32.xlu1 %v752_v2, %s13196_s21  ;;  %v676_v2 = vmul.f32 %v672_v60, %v662_v43 }
  0xf4   : > { %812 = vrot.lane.b32.xlu0 %v804_v11, %s13192_s22  ;;  %762 = vrot.lane.b32.xlu1 %v754_v12, %s13196_s21 }
  0xf8   : > { %883 = vrot.lane.b32.xlu0 %v877_v20, %s13190_s24  ;;  %810 = vrot.lane.b32.xlu1 %v803_v18, %s13192_s22  ;;  %s13248_s22 = smov 110  }
  0xfc   : > { %887 = vrot.lane.b32.xlu0 %v879_v24, %s13190_s24  ;;  %885 = vrot.lane.b32.xlu1 %v878_v25, %s13190_s24  ;;  %s13249_s24 = smov 96  }
 0x100   : > { %934 = vrot.lane.b32.xlu0 %v927_v33, %s13188_s2  ;;  %932 = vrot.lane.b32.xlu1 %v926_v34, %s13188_s2 }
 0x104   : > { %936 = vrot.lane.b32.xlu1 %v928_v38, %s13188_s2  ;;  %1006 = vrot.lane.b32.xlu0 %v1000_v39, %s13186_s0  ;;  %s13247_s2 = smov 111  }
 0x108   : > { %1008 = vrot.lane.b32.xlu1 %v1001_v41, %s13186_s0  ;;  %1010 = vrot.lane.b32.xlu0 %v1002_v42, %s13186_s0  ;;  %s13246_s0 = smov 112  }
 0x14a   : > { %v710_v45 = vpop.permute.xlu1 %709  ;;  %v708_v46 = vpop.permute.xlu0 %707 }
 0x14b   : > { %v714_v59 = vsel %vm713_vm9, %v708_v46, %v710_v45 }
 0x14c   : > { %v718_v3 = vadd.f32 %v714_v59, %v675_v61 }
 0x14e   : > { %v835_v47 = vpop.permute.xlu1 %834  ;;  %v712_v48 = vpop.permute.xlu0 %711 }
 0x14f   : > { %v715_v0 = vsel %vm713_vm9, %v710_v45, %v712_v48 }
 0x150   : > { %v719_v5 = vadd.f32 %v715_v0, %v676_v2 }
 0x152   : > { %v839_v49 = vpop.permute.xlu1 %838  ;;  %v837_v50 = vpop.permute.xlu0 %836 }
 0x153   : > { %v841_v20 = vsel %vm13214_vm12, %v835_v47, %v837_v50  ;;  %v842_v22 = vsel %vm13214_vm12, %v837_v50, %v839_v49 }
 0x15a   : > { %v959_v51 = vpop.permute.xlu1 %958  ;;  %v961_v52 = vpop.permute.xlu0 %960 }
 0x15b   : > { %v965_v32 = vsel %vm964_vm15, %v959_v51, %v961_v52  ;;  %v1225_v51 = vld [vmem:[%s13163_s3] sm:$0x3] }
 0x15c   : > { %v1234_v55 = vrot.slane %v1225_v51, %v10581_v29 }
 0x15e   : > { %v963_v54 = vpop.permute.xlu1 %962  ;;  %v761_v30 = vpop.permute.xlu0 %760 }
 0x15f   : > { %v966_v40 = vsel %vm964_vm15, %v961_v52, %v963_v54  ;;  %v1230_v54 = vrot.slane %v1225_v51, %v10579_v28 }
 0x162   : > { %v759_v56 = vpop.permute.xlu1 %758  ;;  %v809_v57 = vpop.permute.xlu0 %808 }
 0x163   : > { %v765_v1 = vsel %vm764_vm10, %v759_v56, %v761_v30  ;;  %v1045_v56 = vld [vmem:[%s13241_s26] sm:$0x3] }
 0x164   : > { %v769_v8 = vadd.f32 %v765_v1, %v718_v3 }
 0x166   : > { %v763_v62 = vpop.permute.xlu1 %762  ;;  %v813_v63 = vpop.permute.xlu0 %812 }
 0x167   : > { %v766_v4 = vsel %vm764_vm10, %v761_v30, %v763_v62 }
 0x168   : > { %v770_v15 = vadd.f32 %v766_v4, %v719_v5 }
 0x16a   : > { %v811_v9 = vpop.permute.xlu1 %810  ;;  %v884_v11 = vpop.permute.xlu0 %883 }
 0x16b   : > { %v815_v12 = vsel %vm13215_vm11, %v809_v57, %v811_v9  ;;  %v816_v13 = vsel %vm13215_vm11, %v811_v9, %v813_v63  ;;  %v10684_v57 = vrot.slane %v1045_v56, %v10581_v29 }
 0x16c   : > { %v819_v16 = vadd.f32 %v815_v12, %v769_v8  ;;  %v820_v17 = vadd.f32 %v816_v13, %v770_v15 }
 0x16e   : > { %v886_v18 = vpop.permute.xlu1 %885  ;;  %v888_v19 = vpop.permute.xlu0 %887  ;;  %v845_v21 = vadd.f32 %v841_v20, %v819_v16  ;;  %v846_v24 = vadd.f32 %v842_v22, %v820_v17 }
 0x16f   : > { %v890_v23 = vsel %vm13212_vm13, %v884_v11, %v886_v18  ;;  %v891_v27 = vsel %vm13212_vm13, %v886_v18, %v888_v19 }
 0x170   : > { %v894_v33 = vadd.f32 %v890_v23, %v845_v21  ;;  %v895_v34 = vadd.f32 %v891_v27, %v846_v24 }
 0x172   : > { %v933_v25 = vpop.permute.xlu1 %932  ;;  %v935_v26 = vpop.permute.xlu0 %934 }
 0x173   : > { %v939_v31 = vsel %vm13209_vm14, %v933_v25, %v935_v26 }
 0x174   : > { %v943_v35 = vadd.f32 %v939_v31, %v894_v33 }
 0x176   : > { %v937_v36 = vpop.permute.xlu1 %936  ;;  %v1007_v37 = vpop.permute.xlu0 %1006  ;;  %v969_v42 = vadd.f32 %v965_v32, %v943_v35 }
 0x177   : > { %v940_v38 = vsel %vm13209_vm14, %v935_v26, %v937_v36 }
 0x178   : > { %v944_v39 = vadd.f32 %v940_v38, %v895_v34 }
 0x17a   : > { %v1009_v41 = vpop.permute.xlu1 %1008  ;;  %v970_v43 = vadd.f32 %v966_v40, %v944_v39  ;;  %v1011_v45 = vpop.permute.xlu0 %1010 }
 0x17b   : > { %v1013_v46 = vsel %vm1012_vm1, %v1007_v37, %v1009_v41  ;;  %v1014_v47 = vsel %vm1012_vm1, %v1009_v41, %v1011_v45  ;;  %v8579_v37 = vld [vmem:[%s13251_s8 + $0x8] sm:$0xff] }
 0x17c   : > { %v1017_v48 = vadd.f32 %v1013_v46, %v969_v42  ;;  %v1018_v49 = vadd.f32 %v1014_v47, %v970_v43  ;;  %v1921_v46 = vld [vmem:[%s13253_s9] sm:$0xff] }
 0x17e   : > { %v1025_v50 = vadd.f32 %v10645_v44, %v1017_v48  ;;  %v1026_v53 = vadd.f32 %v10645_v44, %v1018_v49  ;;  %v10681_v44 = vrot.slane %v1045_v56, %v10579_v28  ;;  %v1059_v49 = vld [vmem:[%s13251_s8] sm:$0xff]  ;;  %v8582_v56 = vld [vmem:[%s13251_s8 + $0x10] sm:$0xff] }
 0x180   : > { %v1027_v30 = vmax.f32 %v1025_v50, 0.0  ;;  %v1028_v52 = vmax.f32 %v1026_v53, 0.0 }
 0x182   : > { %1031 = vrot.lane.b32.xlu1 %v1027_v30, %s13207_s19  ;;  %1033 = vrot.lane.b32.xlu0 %v1028_v52, %s13207_s19 }
 0x186   : > { %1235 = vrot.lane.b32.xlu1 %v1230_v54, %s13202_s20  ;;  %1237 = vrot.lane.b32.xlu0 %v1234_v55, %s13202_s20  ;;  %s8865_s20 = sshll.u32 %s13374_s28, 5 }
 0x18a   : > { %1337 = vrot.lane.b32.xlu1 %v10681_v44, %s13200_s30  ;;  %1339 = vrot.lane.b32.xlu0 %v10684_v57, %s13200_s30  ;;  %s13256_s30 = smov 2  }
 0x18e   : > { %1527 = vrot.lane.b32.xlu1 %v1230_v54, %s13210_s23  ;;  %1529 = vrot.lane.b32.xlu0 %v1234_v55, %s13210_s23 }
 0x192   : > { %1629 = vrot.lane.b32.xlu1 %v10681_v44, %s13194_s25  ;;  %1631 = vrot.lane.b32.xlu0 %v10684_v57, %s13194_s25  ;;  %s13250_s25 = smov 95  }
 0x1f4   : > { %v1032_v58 = vpop.permute.xlu1 %1031  ;;  %v1034_v59 = vpop.permute.xlu0 %1033 }
 0x1f5   : > { %1040 = vst.msk [vmem:[#allocation2] sm:$0xff] %vm13206_vm2, %v1032_v58  ;;  %v10707_v0 = vsel %vm646_vm3, %v1032_v58, %v1034_v59 }
 0x1f6   : > { %1042 = vst.msk [vmem:[#allocation2 + $0x10] sm:$0xff] %vm646_vm3, %v1034_v59  ;;  %v1058_v38 = vmul.f32 %v10684_v57, %v10707_v0 }
 0x1f8   : > { %v1236_v62 = vpop.permute.xlu1 %1235  ;;  %v1238_v63 = vpop.permute.xlu0 %1237 }
 0x1f9   : > { %v1239_v1 = vsel %vm725_vm5, %v1236_v62, %v1238_v63 }
 0x1fa   : > { %v1244_v2 = vmul.f32 %v1239_v1, %v10707_v0 }
 0x1fc   : > { %v10698_v60 = vld [vmem:[#allocation2] sm:$0xff]  ;;  %v1338_v3 = vpop.permute.xlu1 %1337  ;;  %v1340_v4 = vpop.permute.xlu0 %1339 }
 0x1fd   : > { %v10700_v61 = vld [vmem:[#allocation2 + $0x10] sm:$0xff]  ;;  %1066 = vrot.lane.b32.xlu1 %v10698_v60, %s13198_s29  ;;  %v1243_v8 = vmul.f32 %v1236_v62, %v10698_v60  ;;  %v1341_v9 = vsel %vm775_vm6, %v1338_v3, %v1340_v4  ;;  %v1345_v13 = vmul.f32 %v1338_v3, %v10698_v60  ;;  %v1057_v39 = vmul.f32 %v10681_v44, %v10698_v60  ;;  %v8584_v62 = vld [vmem:[%s13251_s8 + $0x18] sm:$0xff]  ;;  %v8586_v3 = vld [vmem:[%s13251_s8 + $0x20] sm:$0xff] }
 0x1fe   : > { %1070 = vrot.lane.b32.xlu0 %v10700_v61, %s13198_s29  ;;  %v1245_v5 = vmul.f32 %v1238_v63, %v10700_v61  ;;  %v1346_v11 = vmul.f32 %v1341_v9, %v10707_v0  ;;  %v1347_v12 = vmul.f32 %v1340_v4, %v10700_v61 }
 0x200   : > { %v1528_v15 = vpop.permute.xlu1 %1527  ;;  %v1530_v16 = vpop.permute.xlu0 %1529 }
 0x201   : > { %1068 = vrot.lane.b32.xlu1 %v10707_v0, %s13198_s29  ;;  %v1531_v17 = vsel %vm850_vm7, %v1528_v15, %v1530_v16  ;;  %v1537_v21 = vmul.f32 %v1530_v16, %v10700_v61  ;;  %v1535_v23 = vmul.f32 %v1528_v15, %v10698_v60  ;;  %s13252_s29 = smov 94  }
 0x202   : > { %1819 = vrot.lane.b32.xlu0 %v1230_v54, %s13204_s1  ;;  %v1536_v20 = vmul.f32 %v1531_v17, %v10707_v0 }
 0x204   : > { %v1630_v18 = vpop.permute.xlu1 %1629  ;;  %v1632_v19 = vpop.permute.xlu0 %1631 }
 0x205   : > { %1821 = vrot.lane.b32.xlu1 %v1234_v55, %s13204_s1  ;;  %v1633_v22 = vsel %vm899_vm8, %v1630_v18, %v1632_v19  ;;  %v1639_v25 = vmul.f32 %v1632_v19, %v10700_v61  ;;  %v1637_v26 = vmul.f32 %v1630_v18, %v10698_v60  ;;  %v8590_v18 = vld [vmem:[%s13251_s8 + $0x30] sm:$0xff]  ;;  %s10841_s1 = scalar_lea.vmem %s13254_s5, %s8865_s20  ;;  %s13257_s20 = smov 16  }
 0x206   : > { %1253 = vrot.lane.b32.xlu0 %v1244_v2, %s13196_s21  ;;  %v1638_v24 = vmul.f32 %v1633_v22, %v10707_v0  ;;  %s13261_s5 = smov 126  }
 0x209   : > { %1255 = vrot.lane.b32.xlu1 %v1245_v5, %s13196_s21 }
 0x20a   : > { %1251 = vrot.lane.b32.xlu0 %v1243_v8, %s13196_s21  ;;  %s13255_s21 = smov 34  }
 0x20d   : > { %1355 = vrot.lane.b32.xlu1 %v1346_v11, %s13246_s0  ;;  %v8588_v11 = vld [vmem:[%s13251_s8 + $0x28] sm:$0xff] }
 0x20e   : > { %1357 = vrot.lane.b32.xlu0 %v1347_v12, %s13246_s0 }
 0x211   : > { %1353 = vrot.lane.b32.xlu1 %v1345_v13, %s13246_s0 }
 0x212   : > { %1443 = vrot.lane.b32.xlu0 %v10707_v0, %s13247_s2 }
 0x215   : > { %1445 = vrot.lane.b32.xlu1 %v10700_v61, %s13247_s2 }
 0x216   : > { %1441 = vrot.lane.b32.xlu0 %v10698_v60, %s13247_s2 }
 0x219   : > { %1545 = vrot.lane.b32.xlu1 %v1536_v20, %s13248_s22  ;;  %v8592_v20 = vld [vmem:[%s13251_s8 + $0x38] sm:$0xff] }
 0x21a   : > { %1547 = vrot.lane.b32.xlu0 %v1537_v21, %s13248_s22 }
 0x21d   : > { %1543 = vrot.lane.b32.xlu1 %v1535_v23, %s13248_s22 }
 0x21e   : > { %1647 = vrot.lane.b32.xlu0 %v1638_v24, %s13249_s24 }
 0x221   : > { %1649 = vrot.lane.b32.xlu1 %v1639_v25, %s13249_s24  ;;  %v8594_v25 = vld [vmem:[%s13251_s8 + $0x40] sm:$0xff] }
 0x222   : > { %1645 = vrot.lane.b32.xlu0 %v1637_v26, %s13249_s24 }
 0x225   : > { %1735 = vrot.lane.b32.xlu1 %v10707_v0, %s13250_s25 }
 0x226   : > { %1737 = vrot.lane.b32.xlu0 %v10700_v61, %s13250_s25 }
 0x229   : > { %1733 = vrot.lane.b32.xlu1 %v10698_v60, %s13250_s25 }
 0x26f   : > { %v1067_v27 = vpop.permute.xlu1 %1066 }
 0x270   : > { %v1071_v31 = vpop.permute.xlu0 %1070 }
 0x273   : > { %v1069_v33 = vpop.permute.xlu1 %1068 }
 0x274   : > { %v1820_v34 = vpop.permute.xlu0 %1819  ;;  %v1073_v35 = vsel %vm713_vm9, %v1069_v33, %v1071_v31  ;;  %v1072_v36 = vsel %vm713_vm9, %v1067_v27, %v1069_v33 }
 0x275   : > { %1080 = vmatprep.subr.mxu0 %v1073_v35  ;;  %v1827_v50 = vmul.f32 %v1820_v34, %v10698_v60 }
 0x276   : > { %1081 = vmatpush1.msra.mxu0 %v1072_v36  ;;  %v1951_v36 = vld [vmem:[%s13163_s3] sm:$0x3] }
 0x277   : > { %v1822_v32 = vpop.permute.xlu1 %1821  ;;  %8580 = vmatmul.mubr.msk.f32.vlgmr.msra.gmra.mrb[0].mxu0 %vm1076_vm4, %v8579_v37  ;;  %1154 = vmatprep.subr.mxu0 %v1058_v38 }
 0x278   : > { %v1823_v40 = vsel %vm13213_vm0, %v1820_v34, %v1822_v32  ;;  %v1829_v41 = vmul.f32 %v1822_v32, %v10700_v61  ;;  %v1254_v42 = vpop.permute.xlu0 %1253  ;;  %1155 = vmatpush1.msra.mxu0 %v1057_v39  ;;  %1218 = vmatprep.mubr.f32.mxu0 %v10337_v7  ;;  %v1956_v39 = vrot.slane %v1951_v36, %v10579_v28 }
 0x279   : > { %v1828_v43 = vmul.f32 %v1823_v40, %v10707_v0  ;;  %v1960_v32 = vrot.slane %v1951_v36, %v10581_v29  ;;  %v2508_v40 = vld [vmem:[%s10841_s1 + $0x8] sm:$0xff]  ;;  %v10940_v36 = vld [vmem:[#allocation2 + $0x30] sm:$0xff] }
 0x27a   : > { %1839 = vrot.lane.b32.xlu1 %v1829_v41, %s13252_s29  ;;  %v2507_v41 = vld [vmem:[%s10841_s1] sm:$0xff] }
 0x27b   : > { %v1256_v45 = vpop.permute.xlu1 %1255  ;;  %1837 = vrot.lane.b32.xlu0 %v1828_v43, %s13252_s29 }
 0x27c   : > { %v1252_v47 = vpop.permute.xlu0 %1251  ;;  %v1258_v48 = vsel %vm764_vm10, %v1254_v42, %v1256_v45 }
 0x27d   : > { %1264 = vmatprep.subr.mxu0 %v1258_v48  ;;  %v1257_v53 = vsel %vm764_vm10, %v1252_v47, %v1254_v42 }
 0x27e   : > { %1924 = vperm.xlu1 %9442, %v1921_v46  }
 0x27f   : > { %v1356_v51 = vpop.permute.xlu1 %1355  ;;  %8581 = vmatmul.mubr.msk.f32.vlgmr.msra.gmra.mrb[0].mxu0 %vm1076_vm4, %v1059_v49  ;;  %1835 = vrot.lane.b32.xlu0 %v1827_v50, %s13252_s29 }
 0x280   : > { %1265 = vmatpush1.msra.mxu0 %v1257_v53  ;;  %v1358_v30 = vpop.permute.xlu0 %1357  ;;  %1328 = vmatprep.mubr.f32.mxu0 %v10337_v7 }
 0x281   : > { %v1360_v52 = vsel %vm13215_vm11, %v1356_v51, %v1358_v30 }
 0x282   : > { %1366 = vmatprep.subr.mxu0 %v1360_v52 }
 0x283   : > { %v1354_v54 = vpop.permute.xlu1 %1353 }
 0x284   : > { %v1444_v55 = vpop.permute.xlu0 %1443  ;;  %v1359_v44 = vsel %vm13215_vm11, %v1354_v54, %v1356_v51 }
 0x287   : > { %v1446_v57 = vpop.permute.xlu1 %1445  ;;  %8583 = vmatmul.mubr.msk.f32.vlgmr.msra.gmra.mrb[0].mxu0 %vm1076_vm4, %v8582_v56  ;;  %v2509_v56 = vld [vmem:[%s10841_s1 + $0x10] sm:$0xf] }
 0x288   : > { %1367 = vmatpush1.msra.mxu0 %v1359_v44  ;;  %v1442_v58 = vpop.permute.xlu0 %1441  ;;  %v1448_v59 = vsel %vm13214_vm12, %v1444_v55, %v1446_v57  ;;  %1430 = vmatprep.mubr.f32.mxu0 %v10337_v7  ;;  %v2510_v57 = vld [vmem:[%s10841_s1 + $0x18] sm:$0xf]  ;;  %s13258_s1 = smov 127  }
 0x289   : > { %1454 = vmatprep.subr.mxu0 %v1448_v59  ;;  %v1447_v63 = vsel %vm13214_vm12, %v1442_v58, %v1444_v55  ;;  %v2808_v58 = vld [vmem:[%s13163_s3] sm:$0x3] }
 0x28a   : > { %v10871_v59 = vrot.slane %v2808_v58, %v10579_v28 }
 0x28b   : > { %v1546_v60 = vpop.permute.xlu1 %1545 }
 0x28c   : > { %v1548_v61 = vpop.permute.xlu0 %1547 }
 0x28d   : > { %v1550_v1 = vsel %vm13212_vm13, %v1546_v60, %v1548_v61  ;;  %v10876_v61 = vrot.slane %v2808_v58, %v10581_v29  ;;  %v1949_v58 = vld [vmem:[%s13259_s10 + $0x10] sm:$0xff] }
 0x28f   : > { %v1544_v0 = vpop.permute.xlu1 %1543  ;;  %8585 = vmatmul.mubr.msk.f32.vlgmr.msra.gmra.mrb[0].mxu0 %vm1076_vm4, %v8584_v62 }
 0x290   : > { %1455 = vmatpush1.msra.mxu0 %v1447_v63  ;;  %1518 = vmatprep.mubr.f32.mxu0 %v10337_v7  ;;  %v1648_v2 = vpop.permute.xlu0 %1647  ;;  %v1549_v5 = vsel %vm13212_vm13, %v1544_v0, %v1546_v60  ;;  %v2543_v63 = vld [vmem:[%s13241_s26] sm:$0x3] }
 0x291   : > { %1556 = vmatprep.subr.mxu0 %v1550_v1 }
 0x293   : > { %v1650_v4 = vpop.permute.xlu1 %1649 }
 0x294   : > { %v1646_v8 = vpop.permute.xlu0 %1645  ;;  %v1652_v9 = vsel %vm13209_vm14, %v1648_v2, %v1650_v4 }
 0x295   : > { %v1651_v15 = vsel %vm13209_vm14, %v1646_v8, %v1648_v2  ;;  %v10888_v2 = vrot.slane %v2543_v63, %v10579_v28  ;;  %vm2537_vm14 = vcmask 134144  }
 0x297   : > { %8587 = vmatmul.mubr.msk.f32.vlgmr.msra.gmra.mrb[0].mxu0 %vm1076_vm4, %v8586_v3  ;;  %v1736_v12 = vpop.permute.xlu1 %1735  ;;  %v10892_v3 = vrot.slane %v2543_v63, %v10581_v29  ;;  %v8617_v63 = vld [vmem:[%s13259_s10 + $0x68] sm:$0xff] }
 0x298   : > { %1557 = vmatpush1.msra.mxu0 %v1549_v5  ;;  %1620 = vmatprep.mubr.f32.mxu0 %v10337_v7  ;;  %v1738_v13 = vpop.permute.xlu0 %1737 }
 0x299   : > { %1658 = vmatprep.subr.mxu0 %v1652_v9  ;;  %v1740_v16 = vsel %vm964_vm15, %v1736_v12, %v1738_v13 }
 0x29b   : > { %v1734_v17 = vpop.permute.xlu1 %1733 }
 0x29c   : > { %v1739_v19 = vsel %vm964_vm15, %v1734_v17, %v1736_v12  ;;  %v8596_v17 = vld [vmem:[%s13259_s10 + $0x20] sm:$0xff] }
 0x29f   : > { %8589 = vmatmul.mubr.msk.f32.vlgmr.msra.gmra.mrb[0].mxu0 %vm1076_vm4, %v8588_v11 }
 0x2a0   : > { %1659 = vmatpush1.msra.mxu0 %v1651_v15  ;;  %1722 = vmatprep.mubr.f32.mxu0 %v10337_v7 }
 0x2a1   : > { %1746 = vmatprep.subr.mxu0 %v1740_v16 }
 0x2a7   : > { %8591 = vmatmul.mubr.msk.f32.vlgmr.msra.gmra.mrb[0].mxu0 %vm1076_vm4, %v8590_v18 }
 0x2a8   : > { %1747 = vmatpush1.msra.mxu0 %v1739_v19  ;;  %1810 = vmatprep.mubr.f32.mxu0 %v10337_v7 }
 0x2af   : > { %8593 = vmatmul.mubr.msk.f32.vlgmr.msra.gmra.mrb[0].mxu0 %vm1076_vm4, %v8592_v20 }
 0x2b0   : > { %1912 = vmatprep.mubr.f32.mxu0 %v10337_v7 }
 0x2ec   : > { %v1840_v21 = vpop.permute.xlu1 %1839 }
 0x2ed   : > { %v1838_v22 = vpop.permute.xlu0 %1837 }
 0x2ee   : > { %v1842_v23 = vsel %vm1012_vm1, %v1838_v22, %v1840_v21  ;;  %v8597_v21 = vld [vmem:[%s13259_s10 + $0x28] sm:$0xff] }
 0x2ef   : > { %1848 = vmatprep.subr.mxu0 %v1842_v23 }
 0x2f1   : > { %v1836_v24 = vpop.permute.xlu0 %1835 }
 0x2f2   : > { %v1841_v26 = vsel %vm1012_vm1, %v1836_v24, %v1838_v22 }
 0x2f3   : > { %1849 = vmatpush1.msra.mxu0 %v1841_v26 }
 0x2f4   : > { %8595 = vmatmul.mubr.msk.f32.vlgmr.msra.gmra.mrb[0].mxu0 %vm1076_vm4, %v8594_v25  ;;  %v8598_v25 = vld [vmem:[%s13259_s10 + $0x30] sm:$0xff] }
 0x2f5   : > { %2066 = vmatprep.mubr.f32.mxu0 %v10337_v7 }
 0x2fd   : > { %v1925_v27 = vpop.permute.xlu1 %1924 }
 0x3c7   : > { %v1914_v31 = vpop.f32.mrb[0].mxu0 }
 0x3c8   : > { %v1927_v33 = vadd.f32 %v1925_v27, %v1914_v31  ;;  %v1916_v34 = vpop.f32.mrb[1].mxu0 }
 0x3c9   : > { %v1928_v35 = vadd.f32 %v1925_v27, %v1916_v34 }
 0x3ca   : > { %v1929_v37 = vmax.f32 %v1927_v33, 0.0 }
 0x3cb   : > { %v1930_v38 = vmax.f32 %v1928_v35, 0.0 }
 0x3cc   : > { %1933 = vrot.lane.b32.xlu0 %v1929_v37, %s13207_s19  ;;  %v8599_v37 = vld [vmem:[%s13259_s10 + $0x38] sm:$0xff] }
 0x3cd   : > { %1935 = vrot.lane.b32.xlu1 %v1930_v38, %s13207_s19 }
 0x3d0   : > { %1961 = vrot.lane.b32.xlu0 %v1956_v39, %s13210_s23 }
 0x3d1   : > { %1963 = vrot.lane.b32.xlu1 %v1960_v32, %s13210_s23 }
 0x3d4   : > { %2329 = vrot.lane.b32.xlu0 %v1956_v39, %s13255_s21 }
 0x3d5   : > { %2331 = vrot.lane.b32.xlu1 %v1960_v32, %s13255_s21 }
 0x3d8   : > { %2517 = vrot.lane.b32.xlu0 %v2508_v40, %s13207_s19 }
 0x3d9   : > { %2515 = vrot.lane.b32.xlu1 %v2507_v41, %s13207_s19 }
 0x43e   : > { %v1934_v42 = vpop.permute.xlu0 %1933 }
 0x43f   : > { %1941 = vst.msk [vmem:[#allocation2] sm:$0xff] %vm13206_vm2, %v1934_v42  ;;  %v1936_v43 = vpop.permute.xlu1 %1935 }
 0x440   : > { %1943 = vst.msk [vmem:[#allocation2 + $0x10] sm:$0xff] %vm646_vm3, %v1936_v43  ;;  %v1937_v52 = vsel %vm646_vm3, %v1934_v42, %v1936_v43  ;;  %v1947_v42 = vld [vmem:[%s13259_s10] sm:$0xff] }
 0x442   : > { %v1962_v45 = vpop.permute.xlu0 %1961 }
 0x443   : > { %v1964_v46 = vpop.permute.xlu1 %1963 }
 0x444   : > { %v1965_v51 = vsel %vm850_vm7, %v1962_v45, %v1964_v46 }
 0x445   : > { %v1970_v55 = vmul.f32 %v1965_v51, %v1937_v52 }
 0x446   : > { %v1944_v47 = vld [vmem:[#allocation2] sm:$0xff]  ;;  %v2330_v48 = vpop.permute.xlu0 %2329 }
 0x447   : > { %v1969_v49 = vmul.f32 %v1962_v45, %v1944_v47  ;;  %v1946_v50 = vld [vmem:[#allocation2 + $0x10] sm:$0xff]  ;;  %v2332_v53 = vpop.permute.xlu1 %2331  ;;  %v2337_v1 = vmul.f32 %v2330_v48, %v1944_v47 }
 0x448   : > { %v1971_v30 = vmul.f32 %v1964_v46, %v1946_v50  ;;  %v2333_v60 = vsel %vm13213_vm0, %v2330_v48, %v2332_v53  ;;  %v2339_v0 = vmul.f32 %v2332_v53, %v1946_v50  ;;  %v1948_v53 = vld [vmem:[%s13259_s10 + $0x8] sm:$0xff] }
 0x449   : > { %1980 = vrot.lane.b32.xlu0 %v1969_v49, %s13248_s22  ;;  %v2338_v62 = vmul.f32 %v2333_v60, %v1937_v52 }
 0x44a   : > { %1984 = vrot.lane.b32.xlu1 %v1971_v30, %s13248_s22  ;;  %v2518_v54 = vpop.permute.xlu0 %2517 }
 0x44b   : > { %2533 = vst.msk [vmem:[#allocation2 + $0x10] sm:$0xff] %vm646_vm3, %v2518_v54  ;;  %v2516_v44 = vpop.permute.xlu1 %2515 }
 0x44c   : > { %2531 = vst.msk [vmem:[#allocation2] sm:$0xff] %vm13206_vm2, %v2516_v44  ;;  %v10895_v4 = vsel %vm646_vm3, %v2516_v44, %v2518_v54  ;;  %vm2534_vm2 = vcmask 1043592  }
 0x44d   : > { %1982 = vrot.lane.b32.xlu0 %v1970_v55, %s13248_s22 }
 0x44e   : > { %2519 = vrot.lane.b32.xlu1 %v2509_v56, %s13207_s19 }
 0x451   : > { %2521 = vrot.lane.b32.xlu0 %v2510_v57, %s13207_s19  ;;  %s13260_s19 = smov 18  }
 0x452   : > { %2096 = vrot.lane.b32.xlu1 %v1937_v52, %s13247_s2  ;;  %v10897_v5 = vld [vmem:[#allocation2 + $0x10] sm:$0xff] }
 0x453   : > { %v10903_v8 = vpack.i.bf16 %v10897_v5, %v10895_v4  ;;  %v10926_v26 = vld [vmem:[#allocation2] sm:$0xff] }
 0x455   : > { %2098 = vrot.lane.b32.xlu0 %v1946_v50, %s13247_s2 }
 0x456   : > { %2094 = vrot.lane.b32.xlu1 %v1944_v47, %s13247_s2 }
 0x459   : > { %2212 = vrot.lane.b32.xlu0 %v1937_v52, %s13250_s25 }
 0x45a   : > { %2214 = vrot.lane.b32.xlu1 %v1946_v50, %s13250_s25 }
 0x45d   : > { %2210 = vrot.lane.b32.xlu0 %v1944_v47, %s13250_s25 }
 0x45e   : > { %2818 = vrot.lane.b32.xlu1 %v10871_v59, %s13256_s30 }
 0x461   : > { %2820 = vrot.lane.b32.xlu0 %v10876_v61, %s13256_s30 }
 0x462   : > { %2350 = vrot.lane.b32.xlu1 %v2338_v62, %s13252_s29 }
 0x465   : > { %2352 = vrot.lane.b32.xlu0 %v2339_v0, %s13252_s29 }
 0x466   : > { %2348 = vrot.lane.b32.xlu1 %v2337_v1, %s13252_s29 }
 0x469   : > { %2974 = vrot.lane.b32.xlu0 %v10888_v2, %s13257_s20 }
 0x46a   : > { %2976 = vrot.lane.b32.xlu1 %v10892_v3, %s13257_s20 }
 0x46d   : > { %9449 = vrot.lane.b32.xlu0 %v10903_v8, %s13258_s1 }
 0x4bb   : > { %v1981_v9 = vpop.permute.xlu0 %1980 }
 0x4bc   : > { %v1985_v11 = vpop.permute.xlu1 %1984 }
 0x4bf   : > { %v1983_v12 = vpop.permute.xlu0 %1982 }
 0x4c0   : > { %v2520_v13 = vpop.permute.xlu1 %2519  ;;  %v1987_v15 = vsel %vm13212_vm13, %v1983_v12, %v1985_v11  ;;  %v1986_v16 = vsel %vm13212_vm13, %v1981_v9, %v1983_v12  ;;  %v1950_v9 = vld [vmem:[%s13259_s10 + $0x18] sm:$0xff] }
 0x4c1   : > { %2535 = vst.msk [vmem:[#allocation2 + $0x18] sm:$0xf] %vm2534_vm2, %v2520_v13  ;;  %2002 = vmatprep.subr.mxu0 %v1987_v15  ;;  %vm10350_vm2 = vmmov 1  }
 0x4c2   : > { %2003 = vmatpush1.msra.mxu0 %v1986_v16 }
 0x4c3   : > { %v2522_v18 = vpop.permute.xlu0 %2521  ;;  %8600 = vmatmul.mubr.msk.f32.vlgmr.msra.gmra.mrb[2].mxu0 %vm1076_vm4, %v8596_v17  ;;  %v8618_v17 = vld [vmem:[%s13259_s10 + $0x70] sm:$0xff] }
 0x4c4   : > { %v2524_v19 = vsel %vm646_vm3, %v2520_v13, %v2522_v18  ;;  %2538 = vst.msk [vmem:[#allocation2 + $0x28] sm:$0xf] %vm2537_vm14, %v2522_v18  ;;  %v2097_v20 = vpop.permute.xlu1 %2096  ;;  %2072 = vmatprep.mubr.f32.mxu0 %v10337_v7  ;;  %vm2607_vm14 = vcmask 1043456  }
 0x4c5   : > { %2536 = vst [vmem:[#allocation2 + $0x20] sm:$0xf] %v2524_v19 }
 0x4c7   : > { %v2099_v22 = vpop.permute.xlu0 %2098  ;;  %8601 = vmatmul.mubr.msk.f32.gmra.mrb[4].mxu0 %vm1076_vm4, %v8597_v21  ;;  %v8608_v21 = vld [vmem:[%s13259_s10 + $0x40] sm:$0xff] }
 0x4c8   : > { %v2095_v23 = vpop.permute.xlu1 %2094  ;;  %v2101_v24 = vsel %vm13214_vm12, %v2097_v20, %v2099_v22  ;;  %2078 = vmatprep.mubr.f32.mxu0 %v10337_v7  ;;  %v10928_v27 = vld [vmem:[#allocation2 + $0x18] sm:$0xf] }
 0x4c9   : > { %v2100_v31 = vsel %vm13214_vm12, %v2095_v23, %v2097_v20  ;;  %2116 = vmatprep.subr.mxu0 %v2101_v24  ;;  %v10933_v33 = vpack.i.bf16 %v10928_v27, %v10926_v26  ;;  %v8619_v23 = vld [vmem:[%s13259_s10 + $0x78] sm:$0xff] }
 0x4ca   : > { %2117 = vmatpush1.msra.mxu0 %v2100_v31  ;;  %v8610_v31 = vld [vmem:[%s13259_s10 + $0x50] sm:$0xff] }
 0x4cb   : > { %v2213_v34 = vpop.permute.xlu0 %2212  ;;  %8602 = vmatmul.mubr.msk.f32.gmra.mrb[6].mxu0 %vm1076_vm4, %v8598_v25  ;;  %9454 = vrot.lane.b32.xlu0 %v10933_v33, %s13258_s1  ;;  %v10938_v7 = vld [vmem:[#allocation2 + $0x28] sm:$0xf] }
 0x4cc   : > { %v2215_v35 = vpop.permute.xlu1 %2214  ;;  %2084 = vmatprep.mubr.f32.mxu0 %v10940_v36  ;;  %v10946_v38 = vld [vmem:[#allocation2 + $0x20] sm:$0xf]  ;;  %v8609_v25 = vld [vmem:[%s13259_s10 + $0x48] sm:$0xff] }
 0x4cd   : > { %v2217_v39 = vsel %vm964_vm15, %v2213_v34, %v2215_v35  ;;  %v10951_v32 = vpack.i.bf16 %v10938_v7, %v10946_v38  ;;  %v8616_v35 = vld [vmem:[%s13259_s10 + $0x60] sm:$0xff] }
 0x4ce   : > { %2232 = vmatprep.subr.mxu0 %v2217_v39 }
 0x4cf   : > { %v2211_v40 = vpop.permute.xlu0 %2210  ;;  %8603 = vmatmul.mubr.msk.f32.gmra.mrb[8].mxu0 %vm1076_vm4, %v8599_v37  ;;  %3268 = vrot.lane.b32.xlu0 %v10876_v61, %s13260_s19 }
 0x4d0   : > { %9444 = vrot.lane.b32.xlu1 %v10951_v32, %s13258_s1  ;;  %v2819_v41 = vpop.permute.xlu1 %2818  ;;  %2180 = vmatprep.mubr.f32.mxu0 %v10940_v36  ;;  %v2216_v46 = vsel %vm964_vm15, %v2211_v40, %v2213_v34  ;;  %v8611_v34 = vld [vmem:[%s13259_s10 + $0x58] sm:$0xff]  ;;  %s13269_s10 = smov 17  }
 0x4d1   : > { %v2826_v43 = vmul.f32 %v2819_v41, %v10926_v26  ;;  %v2829_v45 = vmul.f32 %v2819_v41, %v10928_v27 }
 0x4d3   : > { %v2821_v47 = vpop.permute.xlu0 %2820  ;;  %8604 = vmatmul.mubr.msk.f32.vlgmr.msra.gmra.mrb[2].mxu0 %vm1076_vm4, %v1947_v42  ;;  %v9463_v54 = vpack.i.bf16 %v2829_v45, %v2826_v43 }
 0x4d4   : > { %v2822_v48 = vsel %vm725_vm5, %v2819_v41, %v2821_v47  ;;  %v2831_v49 = vmul.f32 %v2821_v47, %v10938_v7  ;;  %3266 = vrot.lane.b32.xlu1 %v10871_v59, %s13260_s19  ;;  %2233 = vmatpush1.msra.mxu0 %v2216_v46  ;;  %v2351_v50 = vpop.permute.xlu1 %2350  ;;  %v2828_v52 = vmul.f32 %v2821_v47, %v10897_v5 }
 0x4d5   : > { %v2830_v51 = vmul.f32 %v2822_v48, %v10946_v38  ;;  %2186 = vmatprep.mubr.f32.mxu0 %v10940_v36  ;;  %v2827_v30 = vmul.f32 %v2822_v48, %v10895_v4  ;;  %v2558_v46 = vmul.f32 %v10892_v3, %v10946_v38  ;;  %v2556_v47 = vmul.f32 %v10892_v3, %v10895_v4 }
 0x4d7   : > { %v2353_v55 = vpop.permute.xlu0 %2352  ;;  %8605 = vmatmul.mubr.msk.f32.gmra.mrb[4].mxu0 %vm1076_vm4, %v1948_v53  ;;  %v9458_v56 = vpack.i.bf16 %v2831_v49, %v2830_v51  ;;  %v9468_v62 = vpack.i.bf16 %v2828_v52, %v2827_v30  ;;  %v8692_v30 = vld [vmem:[%s13172_s12 + $0xf0] sm:$0xff] }
 0x4d8   : > { %9464 = vrot.lane.b32.xlu1 %v9463_v54, %s13261_s5  ;;  %v2349_v44 = vpop.permute.xlu1 %2348  ;;  %v2355_v57 = vsel %vm1012_vm1, %v2351_v50, %v2353_v55  ;;  %2192 = vmatprep.mubr.f32.mxu0 %v10940_v36 }
 0x4d9   : > { %9459 = vrot.lane.b32.xlu0 %v9458_v56, %s13261_s5  ;;  %2370 = vmatprep.subr.mxu0 %v2355_v57  ;;  %v2354_v60 = vsel %vm1012_vm1, %v2349_v44, %v2351_v50  ;;  %v2557_v44 = vmul.f32 %v10888_v2, %v10928_v27 }
 0x4da   : > { %9137 = vmatprep.subr.mxu1 %v2355_v57 }
 0x4db   : > { %9138 = vmatpush1.msra.mxu1 %v2354_v60  ;;  %v2975_v0 = vpop.permute.xlu0 %2974  ;;  %8606 = vmatmul.mubr.msk.f32.gmra.mrb[6].mxu0 %vm1076_vm4, %v1949_v58 }
 0x4dc   : > { %9469 = vrot.lane.b32.xlu1 %v9468_v62, %s13261_s5  ;;  %v2977_v1 = vpop.permute.xlu1 %2976  ;;  %2198 = vmatprep.mubr.f32.mxu0 %v10940_v36  ;;  %v2982_v18 = vmul.f32 %v2975_v0, %v10926_v26  ;;  %v2985_v19 = vmul.f32 %v2975_v0, %v10928_v27 }
 0x4dd   : > { %v2978_v11 = vsel %vm775_vm6, %v2975_v0, %v2977_v1  ;;  %v2984_v12 = vmul.f32 %v2977_v1, %v10897_v5  ;;  %v2987_v13 = vmul.f32 %v2977_v1, %v10938_v7  ;;  %3422 = vrot.lane.b32.xlu0 %v10888_v2, %s13262_s6  ;;  %8621 = vmatmul.mubr.msk.f32.vlgmr.msra.gmra.mrb[0].mxu1 %vm1076_vm4, %v8617_v63 }
 0x4de   : > { %v2983_v15 = vmul.f32 %v2978_v11, %v10895_v4  ;;  %v2986_v16 = vmul.f32 %v2978_v11, %v10946_v38  ;;  %2446 = vmatprep.mubr.f32.mxu1 %v10940_v36  ;;  %v9483_v24 = vpack.i.bf16 %v2985_v19, %v2982_v18  ;;  %v2555_v63 = vmul.f32 %v10888_v2, %v10926_v26 }
 0x4df   : > { %8607 = vmatmul.mubr.msk.f32.gmra.mrb[8].mxu0 %vm1076_vm4, %v1950_v9  ;;  %v9450_v37 = vpop.permute.xlu0 %9449 }
 0x4e0   : > { %3424 = vrot.lane.b32.xlu1 %v10892_v3, %s13262_s6  ;;  %2296 = vmatprep.mubr.f32.mxu0 %v10940_v36  ;;  %v9478_v20 = vpack.i.bf16 %v2984_v12, %v2983_v15  ;;  %v9473_v22 = vpack.i.bf16 %v2987_v13, %v2986_v16  ;;  %v9452_v40 = vunpack.i.h.bf16 %v9450_v37  ;;  %v9451_v41 = vunpack.i.l.bf16 %v9450_v37  ;;  %v8624_v13 = vld [vmem:[%s13172_s12 + $0x20] sm:$0xff] }
 0x4e1   : > { %8622 = vmatmul.mubr.msk.f32.gmra.mrb[2].mxu1 %vm1076_vm4, %v8618_v17  ;;  %v8873_v3 = vpack.c.bf16 %v2558_v46, %v2556_v47  ;;  %v8876_v2 = vpack.c.bf16 %v2557_v44, %v2555_v63 }
 0x4e2   : > { %9479 = vrot.lane.b32.xlu0 %v9478_v20, %s13246_s0  ;;  %2452 = vmatprep.mubr.f32.mxu1 %v10940_v36  ;;  %v2589_v48 = vsel %vm713_vm9, %v9451_v41, %v9452_v40  ;;  %v8625_v20 = vld [vmem:[%s13172_s12 + $0x28] sm:$0xff] }
 0x4e3   : > { %8612 = vmatmul.mubr.msk.f32.vlgmr.msra.gmra.mrb[2].mxu0 %vm1076_vm4, %v8608_v21 }
 0x4e4   : > { %2371 = vmatpush1.msra.mxu0 %v2354_v60  ;;  %9474 = vrot.lane.b32.xlu1 %v9473_v22, %s13246_s0 }
 0x4e5   : > { %2302 = vmatprep.mubr.f32.mxu0 %v10940_v36  ;;  %8623 = vmatmul.mubr.msk.f32.gmra.mrb[4].mxu1 %vm1076_vm4, %v8619_v23 }
 0x4e6   : > { %9484 = vrot.lane.b32.xlu0 %v9483_v24, %s13246_s0  ;;  %4131 = vmatprep.mubr.f32.mxu1 %v10940_v36 }
 0x4e7   : > { %8613 = vmatmul.mubr.msk.f32.gmra.mrb[4].mxu0 %vm1076_vm4, %v8609_v25 }
 0x4e8   : > { %9489 = vrot.lane.b32.xlu1 %v10903_v8, %s13247_s2  ;;  %2308 = vmatprep.mubr.f32.mxu0 %v10940_v36 }
 0x4ea   : > { %9494 = vrot.lane.b32.xlu0 %v10951_v32, %s13247_s2 }
 0x4eb   : > { %8614 = vmatmul.mubr.msk.f32.gmra.mrb[6].mxu0 %vm1076_vm4, %v8610_v31 }
 0x4ec   : > { %9499 = vrot.lane.b32.xlu1 %v10933_v33, %s13247_s2  ;;  %2314 = vmatprep.mubr.f32.mxu0 %v10940_v36 }
 0x4ee   : > { %3714 = vrot.lane.b32.xlu0 %v10871_v59, %s13255_s21 }
 0x4ef   : > { %8615 = vmatmul.mubr.msk.f32.gmra.mrb[8].mxu0 %vm1076_vm4, %v8611_v34  ;;  %v8626_v34 = vld [vmem:[%s13172_s12 + $0x30] sm:$0xff] }
 0x4f0   : > { %3716 = vrot.lane.b32.xlu1 %v10876_v61, %s13255_s21  ;;  %2434 = vmatprep.mubr.f32.mxu0 %v10940_v36 }
 0x4f3   : > { %8620 = vmatmul.mubr.msk.f32.vlgmr.msra.gmra.mrb[2].mxu0 %vm1076_vm4, %v8616_v35  ;;  %vm11066_vm4 = vmpackc.low %vm2607_vm14, %vm10350_vm2  ;;  %vm2594_vm14 = vcmask 97280   ;;  %vm13266_vm2 = vcmask 785408  }
 0x4f4   : > { %2676 = vmatprep.mubr.f32.mxu0 %v10940_v36 }
 0x53d   : > { %v9455_v39 = vpop.permute.xlu0 %9454 }
 0x53e   : > { %v9456_v59 = vunpack.i.l.bf16 %v9455_v39  ;;  %v9457_v43 = vunpack.i.h.bf16 %v9455_v39 }
 0x540   : > { %v2588_v49 = vsel %vm713_vm9, %v9456_v59, %v9451_v41 }
 0x541   : > { %v3269_v50 = vpop.permute.xlu0 %3268 }
 0x542   : > { %v9445_v42 = vpop.permute.xlu1 %9444  ;;  %v3276_v57 = vmul.f32 %v3269_v50, %v10897_v5  ;;  %v3279_v58 = vmul.f32 %v3269_v50, %v10938_v7 }
 0x543   : > { %v9447_v45 = vunpack.i.h.bf16 %v9445_v42  ;;  %v9446_v61 = vunpack.i.l.bf16 %v9445_v42 }
 0x545   : > { %v2590_v53 = vsel %vm713_vm9, %v9457_v43, %v9446_v61  ;;  %v2591_v51 = vsel %vm713_vm9, %v9446_v61, %v9447_v45 }
 0x546   : > { %v8870_v52 = vpack.c.bf16 %v2590_v53, %v2588_v49  ;;  %v3267_v54 = vpop.permute.xlu1 %3266  ;;  %v8867_v55 = vpack.c.bf16 %v2591_v51, %v2589_v48 }
 0x547   : > { %v3270_v56 = vsel %vm850_vm7, %v3267_v54, %v3269_v50  ;;  %v3274_v0 = vmul.f32 %v3267_v54, %v10926_v26  ;;  %v3277_v1 = vmul.f32 %v3267_v54, %v10928_v27  ;;  %v8627_v50 = vld [vmem:[%s13172_s12 + $0x38] sm:$0xff] }
 0x548   : > { %v3275_v60 = vmul.f32 %v3270_v56, %v10895_v4  ;;  %v3278_v62 = vmul.f32 %v3270_v56, %v10946_v38  ;;  %8869 = vmatprep.subr.msk.bf16.mxu0 %vm11066_vm4, %v8867_v55 }
 0x549   : > { %8872 = vmatpush1.bf16.msk.msra.mxu0 %vm11066_vm4, %v8870_v52  ;;  %v9513_v19 = vpack.i.bf16 %v3277_v1, %v3274_v0 }
 0x54a   : > { %v9465_v9 = vpop.permute.xlu1 %9464  ;;  %8875 = vmatprep.subr.msk.bf16.mxu0 %vm11066_vm4, %v8873_v3  ;;  %v9503_v11 = vpack.i.bf16 %v3279_v58, %v3278_v62  ;;  %v9508_v12 = vpack.i.bf16 %v3276_v57, %v3275_v60  ;;  %v2559_v60 = vld [vmem:[%s13172_s12] sm:$0xff] }
 0x54b   : > { %v9460_v15 = vpop.permute.xlu0 %9459  ;;  %v9466_v53 = vunpack.i.l.bf16 %v9465_v9  ;;  %v9467_v56 = vunpack.i.h.bf16 %v9465_v9 }
 0x54c   : > { %9504 = vrot.lane.b32.xlu1 %v9503_v11, %s13248_s22  ;;  %9509 = vrot.lane.b32.xlu0 %v9508_v12, %s13248_s22  ;;  %v9462_v16 = vunpack.i.h.bf16 %v9460_v15  ;;  %v9461_v17 = vunpack.i.l.bf16 %v9460_v15  ;;  %v2560_v11 = vld [vmem:[%s13172_s12 + $0x8] sm:$0xff] }
 0x54d   : > { %8630 = vmatmul.mubr.msk.f32.vlgmr.msra.gmra.mrb[10].mxu0 %vm2594_vm14, %v8624_v13  ;;  %v2561_v13 = vld [vmem:[%s13172_s12 + $0x10] sm:$0xff] }
 0x54e   : > { %8878 = vmatpush1.bf16.msk.msra.mxu0 %vm11066_vm4, %v8876_v2  ;;  %v9470_v18 = vpop.permute.xlu1 %9469  ;;  %2682 = vmatprep.mubr.f32.mxu0 %v10940_v36  ;;  %v2858_v24 = vsel %vm764_vm10, %v9461_v17, %v9462_v16  ;;  %v2857_v62 = vsel %vm764_vm10, %v9467_v56, %v9461_v17  ;;  %v8662_v56 = vld [vmem:[%s13172_s12 + $0x90] sm:$0xff] }
 0x54f   : > { %v9472_v21 = vunpack.i.h.bf16 %v9470_v18  ;;  %v9471_v22 = vunpack.i.l.bf16 %v9470_v18  ;;  %v3423_v23 = vpop.permute.xlu0 %3422 }
 0x550   : > { %9514 = vrot.lane.b32.xlu0 %v9513_v19, %s13248_s22  ;;  %v3430_v61 = vmul.f32 %v3423_v23, %v10926_v26  ;;  %v3433_v46 = vmul.f32 %v3423_v23, %v10928_v27 }
 0x551   : > { %v2856_v25 = vsel %vm764_vm10, %v9471_v22, %v9472_v21  ;;  %8631 = vmatmul.mubr.msk.f32.gmra.mrb[12].mxu0 %vm2594_vm14, %v8625_v20  ;;  %v2855_v3 = vsel %vm764_vm10, %v9466_v53, %v9471_v22  ;;  %v8651_v53 = vld [vmem:[%s13172_s12 + $0x68] sm:$0xff] }
 0x552   : > { %v3425_v31 = vpop.permute.xlu1 %3424  ;;  %2688 = vmatprep.mubr.f32.mxu0 %v10940_v36  ;;  %v8879_v35 = vpack.c.bf16 %v2858_v24, %v2856_v25  ;;  %v9528_v58 = vpack.i.bf16 %v3433_v46, %v3430_v61  ;;  %v8882_v0 = vpack.c.bf16 %v2857_v62, %v2855_v3  ;;  %v2467_v24 = vld [vmem:[%s13265_s11] sm:$0xff]  ;;  %v8643_v46 = vld [vmem:[%s13172_s12 + $0x58] sm:$0xff] }
 0x553   : > { %v3426_v37 = vsel %vm899_vm8, %v3423_v23, %v3425_v31  ;;  %v3432_v39 = vmul.f32 %v3425_v31, %v10897_v5  ;;  %v3435_v40 = vmul.f32 %v3425_v31, %v10938_v7  ;;  %v8663_v3 = vld [vmem:[%s13172_s12 + $0x98] sm:$0xff] }
 0x554   : > { %v3431_v41 = vmul.f32 %v3426_v37, %v10895_v4  ;;  %v3434_v59 = vmul.f32 %v3426_v37, %v10946_v38  ;;  %8881 = vmatprep.subr.msk.bf16.mxu0 %vm11066_vm4, %v8879_v35  ;;  %v11114_v42 = vpop.permute.xlu0 %9479 }
 0x555   : > { %8632 = vmatmul.mubr.msk.f32.gmra.mrb[14].mxu0 %vm2594_vm14, %v8626_v34  ;;  %v9482_v43 = vunpack.i.h.bf16 %v11114_v42  ;;  %v9481_v45 = vunpack.i.l.bf16 %v11114_v42  ;;  %v8640_v34 = vld [vmem:[%s13172_s12 + $0x40] sm:$0xff]  ;;  %v2470_v42 = vld [vmem:[%s13265_s11 + $0x18] sm:$0xff] }
 0x556   : > { %v9475_v47 = vpop.permute.xlu1 %9474  ;;  %2694 = vmatprep.mubr.f32.mxu0 %v10940_v36  ;;  %v9518_v48 = vpack.i.bf16 %v3435_v40, %v3434_v59  ;;  %v9523_v49 = vpack.i.bf16 %v3432_v39, %v3431_v41  ;;  %v2469_v40 = vld [vmem:[%s13265_s11 + $0x10] sm:$0xff]  ;;  %v2468_v41 = vld [vmem:[%s13265_s11 + $0x8] sm:$0xff]  ;;  %s8866_s11 = sshll.u32 %s13374_s28, 3 }
 0x557   : > { %v9477_v51 = vunpack.i.h.bf16 %v9475_v47  ;;  %v9476_v52 = vunpack.i.l.bf16 %v9475_v47  ;;  %v3012_v54 = vsel %vm13215_vm11, %v9481_v45, %v9482_v43  ;;  %v8641_v59 = vld [vmem:[%s13172_s12 + $0x48] sm:$0xff]  ;;  %v8642_v43 = vld [vmem:[%s13172_s12 + $0x50] sm:$0xff] }
 0x558   : > { %9519 = vrot.lane.b32.xlu0 %v9518_v48, %s13249_s24  ;;  %9524 = vrot.lane.b32.xlu1 %v9523_v49, %s13249_s24  ;;  %v9485_v55 = vpop.permute.xlu0 %9484  ;;  %v8650_v49 = vld [vmem:[%s13172_s12 + $0x60] sm:$0xff] }
 0x559   : > { %v3014_v44 = vsel %vm13215_vm11, %v9476_v52, %v9477_v51  ;;  %8633 = vmatmul.mubr.msk.f32.gmra.mrb[16].mxu0 %vm2594_vm14, %v8627_v50  ;;  %v9487_v17 = vunpack.i.h.bf16 %v9485_v55  ;;  %v9486_v18 = vunpack.i.l.bf16 %v9485_v55  ;;  %v8652_v51 = vld [vmem:[%s13172_s12 + $0x70] sm:$0xff]  ;;  %v8661_v55 = vld [vmem:[%s13172_s12 + $0x88] sm:$0xff] }
 0x55a   : > { %v11133_v57 = vpop.permute.xlu1 %9489  ;;  %2783 = vmatprep.mubr.f32.mxu0 %v10940_v36  ;;  %v8885_v63 = vpack.c.bf16 %v3014_v44, %v3012_v54  ;;  %v8660_v54 = vld [vmem:[%s13172_s12 + $0x80] sm:$0xff] }
 0x55b   : > { %v9491_v23 = vunpack.i.l.bf16 %v11133_v57 }
 0x55c   : > { %9534 = vrot.lane.b32.xlu0 %v10903_v8, %s13250_s25  ;;  %9529 = vrot.lane.b32.xlu1 %v9528_v58, %s13249_s24  ;;  %v11143_v1 = vpop.permute.xlu0 %9494 }
 0x55d   : > { %8636 = vmatmul.mubr.msk.f32.vlgmr.msra.gmra.mrb[10].mxu0 %vm2594_vm14, %v2559_v60  ;;  %v9497_v19 = vunpack.i.h.bf16 %v11143_v1  ;;  %v9496_v20 = vunpack.i.l.bf16 %v11143_v1 }
 0x55e   : > { %8884 = vmatpush1.bf16.msk.msra.mxu0 %vm11066_vm4, %v8882_v0  ;;  %v11148_v9 = vpop.permute.xlu1 %9499  ;;  %2789 = vmatprep.mubr.f32.mxu0 %v10940_v36 }
 0x55f   : > { %8887 = vmatprep.subr.msk.bf16.mxu0 %vm11066_vm4, %v8885_v63  ;;  %v3150_v25 = vsel %vm13214_vm12, %v9496_v20, %v9497_v19  ;;  %v9501_v61 = vunpack.i.l.bf16 %v11148_v9 }
 0x560   : > { %9544 = vrot.lane.b32.xlu0 %v10933_v33, %s13250_s25  ;;  %9539 = vrot.lane.b32.xlu1 %v10951_v32, %s13250_s25  ;;  %v3715_v8 = vpop.permute.xlu0 %3714 }
 0x561   : > { %8637 = vmatmul.mubr.msk.f32.gmra.mrb[12].mxu0 %vm2594_vm14, %v2560_v11  ;;  %v3722_v21 = vmul.f32 %v3715_v8, %v10926_v26  ;;  %v3725_v22 = vmul.f32 %v3715_v8, %v10928_v27  ;;  %v3011_v26 = vsel %vm13215_vm11, %v9486_v18, %v9481_v45  ;;  %v3013_v27 = vsel %vm13215_vm11, %v9487_v17, %v9476_v52  ;;  %v8653_v52 = vld [vmem:[%s13172_s12 + $0x78] sm:$0xff] }
 0x562   : > { %v3717_v12 = vpop.permute.xlu1 %3716  ;;  %2795 = vmatprep.mubr.f32.mxu0 %v10940_v36  ;;  %v8888_v35 = vpack.c.bf16 %v3013_v27, %v3011_v26  ;;  %v9502_v45 = vunpack.i.h.bf16 %v11148_v9  ;;  %v3147_v48 = vsel %vm13214_vm12, %v9501_v61, %v9491_v23 }
 0x563   : > { %v3718_v15 = vsel %vm13213_vm0, %v3715_v8, %v3717_v12  ;;  %v3724_v2 = vmul.f32 %v3717_v12, %v10897_v5  ;;  %v3727_v16 = vmul.f32 %v3717_v12, %v10938_v7  ;;  %v9558_v31 = vpack.i.bf16 %v3725_v22, %v3722_v21 }
 0x564   : > { %v3723_v33 = vmul.f32 %v3718_v15, %v10895_v4  ;;  %v3726_v32 = vmul.f32 %v3718_v15, %v10946_v38  ;;  %v2562_v4 = vld [vmem:[%s13172_s12 + $0x18] sm:$0xff]  ;;  %v9492_v38 = vunpack.i.h.bf16 %v11133_v57  ;;  %v3149_v47 = vsel %vm13214_vm12, %v9502_v45, %v9496_v20 }
 0x565   : > { %8638 = vmatmul.mubr.msk.f32.gmra.mrb[14].mxu0 %vm2594_vm14, %v2561_v13  ;;  %v8894_v50 = vpack.c.bf16 %v3149_v47, %v3147_v48 }
 0x566   : > { %2801 = vmatprep.mubr.f32.mxu0 %v10940_v36  ;;  %v9548_v5 = vpack.i.bf16 %v3727_v16, %v3726_v32  ;;  %v9553_v7 = vpack.i.bf16 %v3724_v2, %v3723_v33  ;;  %v3148_v37 = vsel %vm13214_vm12, %v9491_v23, %v9492_v38 }
 0x567   : > { %v8891_v39 = vpack.c.bf16 %v3150_v25, %v3148_v37 }
 0x568   : > { %9549 = vrot.lane.b32.xlu0 %v9548_v5, %s13252_s29  ;;  %9554 = vrot.lane.b32.xlu1 %v9553_v7, %s13252_s29 }
 0x569   : > { %8639 = vmatmul.mubr.msk.f32.gmra.mrb[16].mxu0 %vm2594_vm14, %v2562_v4 }
 0x56a   : > { %2941 = vmatprep.mubr.f32.mxu0 %v10940_v36 }
 0x56c   : > { %2473 = vperm.xlu0 %9441, %v2467_v24   ;;  %9559 = vrot.lane.b32.xlu1 %v9558_v31, %s13252_s29 }
 0x56d   : > { %8646 = vmatmul.mubr.msk.f32.vlgmr.msra.gmra.mrb[10].mxu0 %vm2594_vm14, %v8640_v34 }
 0x56e   : > { %8890 = vmatpush1.bf16.msk.msra.mxu0 %vm11066_vm4, %v8888_v35  ;;  %2947 = vmatprep.mubr.f32.mxu0 %v10940_v36  ;;  %v8670_v35 = vld [vmem:[%s13172_s12 + $0xa0] sm:$0xff] }
 0x56f   : > { %8893 = vmatprep.subr.msk.bf16.mxu0 %vm11066_vm4, %v8891_v39 }
 0x570   : > { %2483 = vperm.xlu0 %9441, %v2469_v40   ;;  %2478 = vperm.xlu1 %9442, %v2468_v41  }
 0x571   : > { %8647 = vmatmul.mubr.msk.f32.gmra.mrb[12].mxu0 %vm2594_vm14, %v8641_v59 }
 0x572   : > { %2953 = vmatprep.mubr.f32.mxu0 %v10940_v36 }
 0x574   : > { %2488 = vperm.xlu1 %9442, %v2470_v42  }
 0x575   : > { %8648 = vmatmul.mubr.msk.f32.gmra.mrb[14].mxu0 %vm2594_vm14, %v8642_v43  ;;  %v8671_v43 = vld [vmem:[%s13172_s12 + $0xa8] sm:$0xff] }
 0x576   : > { %2959 = vmatprep.mubr.f32.mxu0 %v10940_v36 }
 0x579   : > { %8649 = vmatmul.mubr.msk.f32.gmra.mrb[16].mxu0 %vm2594_vm14, %v8643_v46 }
 0x57a   : > { %3097 = vmatprep.mubr.f32.mxu0 %v10940_v36 }
 0x57d   : > { %8656 = vmatmul.mubr.msk.f32.vlgmr.msra.gmra.mrb[10].mxu0 %vm2594_vm14, %v8650_v49 }
 0x57e   : > { %8896 = vmatpush1.bf16.msk.msra.mxu0 %vm11066_vm4, %v8894_v50  ;;  %3103 = vmatprep.mubr.f32.mxu0 %v10940_v36 }
 0x581   : > { %8657 = vmatmul.mubr.msk.f32.gmra.mrb[12].mxu0 %vm2594_vm14, %v8651_v53  ;;  %v8672_v53 = vld [vmem:[%s13172_s12 + $0xb0] sm:$0xff] }
 0x582   : > { %3109 = vmatprep.mubr.f32.mxu0 %v10940_v36 }
 0x585   : > { %8658 = vmatmul.mubr.msk.f32.gmra.mrb[14].mxu0 %vm2594_vm14, %v8652_v51 }
 0x586   : > { %3115 = vmatprep.mubr.f32.mxu0 %v10940_v36 }
 0x589   : > { %8659 = vmatmul.mubr.msk.f32.gmra.mrb[16].mxu0 %vm2594_vm14, %v8653_v52 }
 0x58a   : > { %3233 = vmatprep.mubr.f32.mxu0 %v10940_v36 }
 0x58d   : > { %8666 = vmatmul.mubr.msk.f32.vlgmr.msra.gmra.mrb[10].mxu0 %vm2594_vm14, %v8660_v54 }
 0x58e   : > { %3239 = vmatprep.mubr.f32.mxu0 %v10940_v36 }
 0x591   : > { %8667 = vmatmul.mubr.msk.f32.gmra.mrb[12].mxu0 %vm2594_vm14, %v8661_v55 }
 0x592   : > { %3245 = vmatprep.mubr.f32.mxu0 %v10940_v36 }
 0x595   : > { %8668 = vmatmul.mubr.msk.f32.gmra.mrb[14].mxu0 %vm2594_vm14, %v8662_v56 }
 0x596   : > { %3251 = vmatprep.mubr.f32.mxu0 %v10940_v36 }
 0x599   : > { %8669 = vmatmul.mubr.msk.f32.gmra.mrb[16].mxu0 %vm2594_vm14, %v8663_v3 }
 0x59a   : > { %3389 = vmatprep.mubr.f32.mxu0 %v10940_v36 }
 0x5b0   : > { %v2442_v44 = vpop.f32.mrb[0].mxu1 }
 0x5b1   : > { %v2444_v57 = vpop.f32.mrb[1].mxu1 }
 0x5b4   : > { %v2448_v58 = vpop.f32.mrb[2].mxu1 }
 0x5b5   : > { %v2450_v60 = vpop.f32.mrb[3].mxu1 }
 0x5b8   : > { %v2454_v62 = vpop.f32.mrb[4].mxu1 }
 0x5b9   : > { %v2456_v63 = vpop.f32.mrb[5].mxu1 }
 0x5ba   : > { %v2304_v0 = vpop.f32.mrb[4].mxu0 }
 0x5bb   : > { %v2306_v1 = vpop.f32.mrb[5].mxu0  ;;  %v11274_v9 = vadd.f32 %v2442_v44, %v2304_v0 }
 0x5bc   : > { %v11276_v11 = vadd.f32 %v2444_v57, %v2306_v1 }
 0x5be   : > { %v9510_v8 = vpop.permute.xlu0 %9509  ;;  %v9505_v12 = vpop.permute.xlu1 %9504 }
 0x5bf   : > { %v9512_v13 = vunpack.i.h.bf16 %v9510_v8  ;;  %v9511_v15 = vunpack.i.l.bf16 %v9510_v8  ;;  %v9507_v2 = vunpack.i.h.bf16 %v9505_v12  ;;  %v9506_v16 = vunpack.i.l.bf16 %v9505_v12  ;;  %v2310_v33 = vpop.f32.mrb[6].mxu0 }
 0x5c0   : > { %v2312_v32 = vpop.f32.mrb[7].mxu0  ;;  %v11278_v17 = vadd.f32 %v2448_v58, %v2310_v33 }
 0x5c1   : > { %v3304_v18 = vsel %vm13212_vm13, %v9511_v15, %v9512_v13  ;;  %v3306_v19 = vsel %vm13212_vm13, %v9506_v16, %v9507_v2  ;;  %v11282_v20 = vadd.f32 %v2450_v60, %v2312_v32 }
 0x5c2   : > { %v9515_v21 = vpop.permute.xlu0 %9514  ;;  %v8897_v22 = vpack.c.bf16 %v3306_v19, %v3304_v18  ;;  %v2316_v5 = vpop.f32.mrb[8].mxu0 }
 0x5c3   : > { %v9517_v7 = vunpack.i.h.bf16 %v9515_v21  ;;  %v9516_v4 = vunpack.i.l.bf16 %v9515_v21  ;;  %v2318_v38 = vpop.f32.mrb[9].mxu0  ;;  %v11284_v23 = vadd.f32 %v2454_v62, %v2316_v5 }
 0x5c4   : > { %8899 = vmatprep.subr.msk.bf16.mxu0 %vm11066_vm4, %v8897_v22  ;;  %v11288_v26 = vadd.f32 %v2456_v63, %v2318_v38  ;;  %v8673_v63 = vld [vmem:[%s13172_s12 + $0xb8] sm:$0xff]  ;;  %v8681_v22 = vld [vmem:[%s13172_s12 + $0xc8] sm:$0xff] }
 0x5c5   : > { %v3303_v27 = vsel %vm13212_vm13, %v9516_v4, %v9511_v15  ;;  %v3305_v24 = vsel %vm13212_vm13, %v9517_v7, %v9506_v16  ;;  %vm13267_vm13 = vmmov %vm13266_vm2  ;;  %v8680_v15 = vld [vmem:[%s13172_s12 + $0xc0] sm:$0xff] }
 0x5c6   : > { %v8900_v25 = vpack.c.bf16 %v3305_v24, %v3303_v27  ;;  %v11292_v31 = vpop.f32.mrb[2].mxu0  ;;  %v8682_v27 = vld [vmem:[%s13172_s12 + $0xd0] sm:$0xff] }
 0x5c7   : > { %v11294_v34 = vpop.f32.mrb[3].mxu0 }
 0x5c8   : > { %8902 = vmatpush1.bf16.msk.msra.mxu0 %vm11066_vm4, %v8900_v25 }
 0x5ca   : > { %v9520_v37 = vpop.permute.xlu0 %9519  ;;  %v9525_v39 = vpop.permute.xlu1 %9524 }
 0x5cb   : > { %v9522_v40 = vunpack.i.h.bf16 %v9520_v37  ;;  %v9521_v41 = vunpack.i.l.bf16 %v9520_v37  ;;  %v9527_v59 = vunpack.i.h.bf16 %v9525_v39  ;;  %v9526_v42 = vunpack.i.l.bf16 %v9525_v39  ;;  %8676 = vmatmul.mubr.msk.f32.vlgmr.msra.gmra.mrb[10].mxu0 %vm2594_vm14, %v8670_v35  ;;  %v8683_v35 = vld [vmem:[%s13172_s12 + $0xd8] sm:$0xff] }
 0x5cc   : > { %3395 = vmatprep.mubr.f32.mxu0 %v10940_v36 }
 0x5cd   : > { %v3462_v45 = vsel %vm13266_vm2, %v9521_v41, %v9522_v40  ;;  %v3460_v61 = vsel %vm13267_vm13, %v9526_v42, %v9527_v59  ;;  %vm13268_vm13 = vmmov %vm13266_vm2  ;;  %v8690_v40 = vld [vmem:[%s13172_s12 + $0xe0] sm:$0xff] }
 0x5ce   : > { %v9535_v46 = vpop.permute.xlu0 %9534  ;;  %v9530_v47 = vpop.permute.xlu1 %9529  ;;  %v8903_v48 = vpack.c.bf16 %v3462_v45, %v3460_v61 }
 0x5cf   : > { %v9532_v49 = vunpack.i.h.bf16 %v9530_v47  ;;  %v9531_v50 = vunpack.i.l.bf16 %v9530_v47  ;;  %8677 = vmatmul.mubr.msk.f32.gmra.mrb[12].mxu0 %vm2594_vm14, %v8671_v43  ;;  %v9537_v51 = vunpack.i.h.bf16 %v9535_v46  ;;  %v9536_v52 = vunpack.i.l.bf16 %v9535_v46 }
 0x5d0   : > { %8905 = vmatprep.subr.msk.bf16.mxu0 %vm11066_vm4, %v8903_v48  ;;  %3401 = vmatprep.mubr.f32.mxu0 %v10940_v36 }
 0x5d1   : > { %v3461_v54 = vsel %vm13266_vm2, %v9532_v49, %v9521_v41  ;;  %v3459_v55 = vsel %vm13268_vm13, %v9531_v50, %v9526_v42  ;;  %v3596_v0 = vsel %vm964_vm15, %v9536_v52, %v9537_v51  ;;  %v8691_v42 = vld [vmem:[%s13172_s12 + $0xe8] sm:$0xff] }
 0x5d2   : > { %v8906_v56 = vpack.c.bf16 %v3461_v54, %v3459_v55  ;;  %v9545_v3 = vpop.permute.xlu0 %9544  ;;  %v9540_v44 = vpop.permute.xlu1 %9539 }
 0x5d3   : > { %v9547_v57 = vunpack.i.h.bf16 %v9545_v3  ;;  %v9546_v58 = vunpack.i.l.bf16 %v9545_v3  ;;  %v9542_v60 = vunpack.i.h.bf16 %v9540_v44  ;;  %v9541_v62 = vunpack.i.l.bf16 %v9540_v44  ;;  %8678 = vmatmul.mubr.msk.f32.gmra.mrb[14].mxu0 %vm2594_vm14, %v8672_v53  ;;  %v4257_v3 = vld [vmem:[%s13163_s3] sm:$0x3] }
 0x5d4   : > { %8908 = vmatpush1.bf16.msk.msra.mxu0 %vm11066_vm4, %v8906_v56  ;;  %3407 = vmatprep.mubr.f32.mxu0 %v10940_v36  ;;  %v8701_v56 = vld [vmem:[%s13172_s12 + $0x108] sm:$0xff] }
 0x5d5   : > { %v3598_v1 = vsel %vm964_vm15, %v9541_v62, %v9542_v60  ;;  %v3595_v12 = vsel %vm964_vm15, %v9546_v58, %v9536_v52  ;;  %v3597_v13 = vsel %vm964_vm15, %v9547_v57, %v9541_v62  ;;  %v8700_v52 = vld [vmem:[%s13172_s12 + $0x100] sm:$0xff]  ;;  %v11414_v57 = vrot.slane %v4257_v3, %v10581_v29  ;;  %v8703_v62 = vld [vmem:[%s13172_s12 + $0x118] sm:$0xff] }
 0x5d6   : > { %v8909_v8 = vpack.c.bf16 %v3598_v1, %v3596_v0  ;;  %v8912_v2 = vpack.c.bf16 %v3597_v13, %v3595_v12  ;;  %v11417_v58 = vrot.slane %v4257_v3, %v10579_v28  ;;  %v3970_v60 = vld [vmem:[%s13241_s26] sm:$0x3] }
 0x5d7   : > { %8679 = vmatmul.mubr.msk.f32.gmra.mrb[16].mxu0 %vm2594_vm14, %v8673_v63  ;;  %v11432_v63 = vrot.slane %v3970_v60, %v10581_v29  ;;  %v11435_v0 = vrot.slane %v3970_v60, %v10579_v28 }
 0x5d8   : > { %8911 = vmatprep.subr.msk.bf16.mxu0 %vm11066_vm4, %v8909_v8  ;;  %3545 = vmatprep.mubr.f32.mxu0 %v10940_v36 }
 0x5da   : > { %v9550_v16 = vpop.permute.xlu0 %9549  ;;  %v9555_v33 = vpop.permute.xlu1 %9554 }
 0x5db   : > { %v9552_v32 = vunpack.i.h.bf16 %v9550_v16  ;;  %v9551_v18 = vunpack.i.l.bf16 %v9550_v16  ;;  %v9557_v19 = vunpack.i.h.bf16 %v9555_v33  ;;  %v9556_v21 = vunpack.i.l.bf16 %v9555_v33  ;;  %8686 = vmatmul.mubr.msk.f32.vlgmr.msra.gmra.mrb[10].mxu0 %vm2594_vm14, %v8680_v15 }
 0x5dc   : > { %8914 = vmatpush1.bf16.msk.msra.mxu0 %vm11066_vm4, %v8912_v2  ;;  %3551 = vmatprep.mubr.f32.mxu0 %v10940_v36 }
 0x5dd   : > { %v3754_v5 = vsel %vm1012_vm1, %v9551_v18, %v9552_v32  ;;  %v3752_v7 = vsel %vm1012_vm1, %v9556_v21, %v9557_v19 }
 0x5de   : > { %v8915_v4 = vpack.c.bf16 %v3754_v5, %v3752_v7  ;;  %v9560_v38 = vpop.permute.xlu1 %9559 }
 0x5df   : > { %8687 = vmatmul.mubr.msk.f32.gmra.mrb[12].mxu0 %vm2594_vm14, %v8681_v22  ;;  %v9562_v24 = vunpack.i.h.bf16 %v9560_v38  ;;  %v9561_v25 = vunpack.i.l.bf16 %v9560_v38 }
 0x5e0   : > { %8917 = vmatprep.subr.msk.bf16.mxu0 %vm11066_vm4, %v8915_v4  ;;  %3557 = vmatprep.mubr.f32.mxu0 %v10940_v36 }
 0x5e1   : > { %v3753_v37 = vsel %vm1012_vm1, %v9562_v24, %v9551_v18  ;;  %v3751_v39 = vsel %vm1012_vm1, %v9561_v25, %v9556_v21 }
 0x5e2   : > { %v8918_v41 = vpack.c.bf16 %v3753_v37, %v3751_v39 }
 0x5e3   : > { %8688 = vmatmul.mubr.msk.f32.gmra.mrb[14].mxu0 %vm2594_vm14, %v8682_v27 }
 0x5e4   : > { %3563 = vmatprep.mubr.f32.mxu0 %v10940_v36 }
 0x5e7   : > { %8689 = vmatmul.mubr.msk.f32.gmra.mrb[16].mxu0 %vm2594_vm14, %v8683_v35 }
 0x5e8   : > { %3681 = vmatprep.mubr.f32.mxu0 %v10940_v36 }
 0x5eb   : > { %v2474_v59 = vpop.permute.xlu0 %2473  ;;  %8696 = vmatmul.mubr.msk.f32.vlgmr.msra.gmra.mrb[10].mxu0 %vm2594_vm14, %v8690_v40 }
 0x5ec   : > { %8920 = vmatpush1.bf16.msk.msra.mxu0 %vm11066_vm4, %v8918_v41  ;;  %3687 = vmatprep.mubr.f32.mxu0 %v10940_v36  ;;  %vm13270_vm4 = vcmask 1047688  }
 0x5ed   : > { %vm13271_vm2 = vmmov %vm13270_vm4 }
 0x5ee   : > { %vm13273_vm13 = vmmov %vm13271_vm2 }
 0x5ef   : > { %v2484_v43 = vpop.permute.xlu0 %2483  ;;  %v2479_v45 = vpop.permute.xlu1 %2478  ;;  %8697 = vmatmul.mubr.msk.f32.gmra.mrb[12].mxu0 %vm2594_vm14, %v8691_v42 }
 0x5f0   : > { %v2493_v61 = vadd.f32 %v11274_v9, %v2479_v45  ;;  %v2494_v46 = vadd.f32 %v11276_v11, %v2479_v45  ;;  %3693 = vmatprep.mubr.f32.mxu0 %v10940_v36  ;;  %v2495_v47 = vadd.f32 %v11278_v17, %v2484_v43  ;;  %v2496_v48 = vadd.f32 %v11282_v20, %v2484_v43  ;;  %v8693_v9 = vld [vmem:[%s13172_s12 + $0xf8] sm:$0xff]  ;;  %v3871_v45 = vld [vmem:[%s13173_s13 + $0x8] sm:$0xff] }
 0x5f1   : > { %v2491_v11 = vadd.f32 %v2474_v59, %v11292_v31  ;;  %v2492_v17 = vadd.f32 %v2474_v59, %v11294_v34 }
 0x5f2   : > { %v2501_v49 = vmax.f32 %v2493_v61, 0.0  ;;  %v2502_v50 = vmax.f32 %v2494_v46, 0.0  ;;  %v2503_v53 = vmax.f32 %v2495_v47, 0.0  ;;  %v2504_v20 = vmax.f32 %v2496_v48, 0.0  ;;  %v3873_v46 = vld [vmem:[%s13173_s13 + $0x18] sm:$0xff] }
 0x5f3   : > { %8698 = vmatmul.mubr.msk.f32.gmra.mrb[14].mxu0 %vm2594_vm14, %v8692_v30  ;;  %v2489_v51 = vpop.permute.xlu1 %2488  ;;  %v2499_v54 = vmax.f32 %v2491_v11, 0.0  ;;  %v2500_v55 = vmax.f32 %v2492_v17, 0.0  ;;  %v3870_v30 = vld [vmem:[%s13173_s13] sm:$0xff] }
 0x5f4   : > { %3924 = vrot.lane.b32.xlu1 %v2502_v50, %s13269_s10  ;;  %3922 = vrot.lane.b32.xlu0 %v2501_v49, %s13269_s10  ;;  %v2497_v31 = vadd.f32 %v11284_v23, %v2489_v51  ;;  %v2498_v34 = vadd.f32 %v11288_v26, %v2489_v51  ;;  %v8702_v26 = vld [vmem:[%s13172_s12 + $0x110] sm:$0xff] }
 0x5f5   : > { %3699 = vmatprep.mubr.f32.mxu0 %v10940_v36  ;;  %v3872_v49 = vld [vmem:[%s13173_s13 + $0x10] sm:$0xff] }
 0x5f6   : > { %v2505_v44 = vmax.f32 %v2497_v31, 0.0  ;;  %v2506_v23 = vmax.f32 %v2498_v34, 0.0 }
 0x5f7   : > { %8699 = vmatmul.mubr.msk.f32.gmra.mrb[16].mxu0 %vm2594_vm14, %v8693_v9 }
 0x5f8   : > { %3928 = vrot.lane.b32.xlu1 %v2504_v20, %s13269_s10  ;;  %3926 = vrot.lane.b32.xlu0 %v2503_v53, %s13269_s10 }
 0x5f9   : > { %3837 = vmatprep.mubr.f32.mxu0 %v10940_v36 }
 0x5fb   : > { %8706 = vmatmul.mubr.msk.f32.vlgmr.msra.gmra.mrb[10].mxu0 %vm2594_vm14, %v8700_v52 }
 0x5fc   : > { %3920 = vrot.lane.b32.xlu1 %v2500_v55, %s13269_s10  ;;  %3918 = vrot.lane.b32.xlu0 %v2499_v54, %s13269_s10 }
 0x5fd   : > { %3843 = vmatprep.mubr.f32.mxu0 %v10940_v36 }
 0x5ff   : > { %8707 = vmatmul.mubr.msk.f32.gmra.mrb[12].mxu0 %vm2594_vm14, %v8701_v56 }
 0x600   : > { %3932 = vrot.lane.b32.xlu1 %v2506_v23, %s13269_s10  ;;  %3930 = vrot.lane.b32.xlu0 %v2505_v44, %s13269_s10 }
 0x601   : > { %3849 = vmatprep.mubr.f32.mxu0 %v10940_v36 }
 0x603   : > { %8708 = vmatmul.mubr.msk.f32.gmra.mrb[14].mxu0 %vm2594_vm14, %v8702_v26 }
 0x604   : > { %4269 = vrot.lane.b32.xlu1 %v11414_v57, %s13256_s30  ;;  %4267 = vrot.lane.b32.xlu0 %v11417_v58, %s13256_s30 }
 0x605   : > { %3855 = vmatprep.mubr.f32.mxu0 %v10940_v36 }
 0x607   : > { %8709 = vmatmul.mubr.msk.f32.gmra.mrb[16].mxu0 %vm2594_vm14, %v8703_v62  ;;  %vm13272_vm14 = vmmov %vm13271_vm2 }
 0x608   : > { %4455 = vrot.lane.b32.xlu1 %v11432_v63, %s13257_s20  ;;  %4453 = vrot.lane.b32.xlu0 %v11435_v0, %s13257_s20 }
 0x609   : > { %7370 = vmatprep.mubr.f32.mxu0 %v10940_v36 }
 0x666   : > { %v3923_v1 = vpop.permute.xlu0 %3922  ;;  %v3925_v8 = vpop.permute.xlu1 %3924 }
 0x667   : > { %3953 = vst.msk [vmem:[#allocation2 + $0x18] sm:$0xff] %vm13270_vm4, %v3923_v1  ;;  %v11449_v15 = vsel %vm646_vm3, %v3923_v1, %v3925_v8  ;;  %vm13274_vm4 = vcmask 900096  }
 0x668   : > { %3955 = vst.msk [vmem:[#allocation2 + $0x28] sm:$0xff] %vm646_vm3, %v3925_v8 }
 0x66a   : > { %v3927_v12 = vpop.permute.xlu0 %3926  ;;  %v3929_v13 = vpop.permute.xlu1 %3928 }
 0x66b   : > { %3956 = vst.msk [vmem:[#allocation2 + $0x30] sm:$0xff] %vm13271_vm2, %v3927_v12  ;;  %v11462_v18 = vsel %vm646_vm3, %v3927_v12, %v3929_v13  ;;  %vm13275_vm2 = vmmov %vm13274_vm4 }
 0x66c   : > { %3958 = vst.msk [vmem:[#allocation2 + $0x40] sm:$0xff] %vm646_vm3, %v3929_v13 }
 0x66e   : > { %v3919_v2 = vpop.permute.xlu0 %3918  ;;  %v3921_v16 = vpop.permute.xlu1 %3920  ;;  %v11476_v4 = vld [vmem:[#allocation2 + $0x18] sm:$0xff] }
 0x66f   : > { %v11451_v33 = vld [vmem:[#allocation2 + $0x28] sm:$0xff]  ;;  %3950 = vst.msk [vmem:[#allocation2] sm:$0xff] %vm13272_vm14, %v3919_v2  ;;  %v11487_v24 = vsel %vm646_vm3, %v3919_v2, %v3921_v16  ;;  %vm13276_vm14 = vmmov %vm13275_vm2 }
 0x670   : > { %3952 = vst.msk [vmem:[#allocation2 + $0x10] sm:$0xff] %vm646_vm3, %v3921_v16  ;;  %v11457_v32 = vpack.i.bf16 %v11451_v33, %v11449_v15 }
 0x672   : > { %9564 = vrot.lane.b32.xlu1 %v11457_v32, %s13258_s1  ;;  %v3931_v19 = vpop.permute.xlu0 %3930  ;;  %v3933_v21 = vpop.permute.xlu1 %3932  ;;  %v11489_v25 = vld [vmem:[#allocation2 + $0x30] sm:$0xff] }
 0x673   : > { %v11464_v22 = vld [vmem:[#allocation2 + $0x40] sm:$0xff]  ;;  %3959 = vst.msk [vmem:[#allocation2 + $0x48] sm:$0xff] %vm13273_vm13, %v3931_v19  ;;  %v11508_v41 = vsel %vm646_vm3, %v3931_v19, %v3933_v21  ;;  %vm13277_vm13 = vmmov %vm13275_vm2 }
 0x674   : > { %3961 = vst.msk [vmem:[#allocation2 + $0x58] sm:$0xff] %vm646_vm3, %v3933_v21  ;;  %v11470_v5 = vpack.i.bf16 %v11464_v22, %v11462_v18 }
 0x676   : > { %9569 = vrot.lane.b32.xlu1 %v11470_v5, %s13258_s1  ;;  %v11474_v7 = vld [vmem:[#allocation2] sm:$0xff]  ;;  %v4268_v42 = vpop.permute.xlu0 %4267  ;;  %v4270_v43 = vpop.permute.xlu1 %4269 }
 0x677   : > { %v11480_v38 = vpack.i.bf16 %v11476_v4, %v11474_v7  ;;  %v11482_v27 = vld [vmem:[#allocation2 + $0x10] sm:$0xff]  ;;  %v4271_v61 = vsel %vm725_vm5, %v4268_v42, %v4270_v43  ;;  %v4280_v48 = vmul.f32 %v4270_v43, %v11451_v33  ;;  %v4275_v9 = vmul.f32 %v4268_v42, %v11474_v7 }
 0x678   : > { %v11499_v39 = vpack.i.bf16 %v11482_v27, %v11487_v24  ;;  %v4279_v47 = vmul.f32 %v4271_v61, %v11449_v15  ;;  %v4278_v11 = vmul.f32 %v4268_v42, %v11476_v4  ;;  %v4282_v17 = vmul.f32 %v4271_v61, %v11462_v18 }
 0x679   : > { %9574 = vrot.lane.b32.xlu0 %v11480_v38, %s13258_s1  ;;  %v4283_v53 = vmul.f32 %v4270_v43, %v11464_v22  ;;  %v4285_v56 = vmul.f32 %v4271_v61, %v11508_v41  ;;  %v4281_v3 = vmul.f32 %v4268_v42, %v11489_v25  ;;  %v4276_v44 = vmul.f32 %v4271_v61, %v11487_v24 }
 0x67a   : > { %v11491_v35 = vld [vmem:[#allocation2 + $0x48] sm:$0xff]  ;;  %v9593_v50 = vpack.i.bf16 %v4280_v48, %v4279_v47  ;;  %v4454_v20 = vpop.permute.xlu0 %4453  ;;  %v4456_v51 = vpop.permute.xlu1 %4455  ;;  %v9613_v52 = vpack.i.bf16 %v4278_v11, %v4275_v9  ;;  %v4277_v23 = vmul.f32 %v4270_v43, %v11482_v27 }
 0x67b   : > { %v11495_v37 = vpack.i.bf16 %v11491_v35, %v11489_v25  ;;  %v11501_v40 = vld [vmem:[#allocation2 + $0x58] sm:$0xff]  ;;  %v9598_v54 = vpack.i.bf16 %v4283_v53, %v4282_v17  ;;  %v4284_v31 = vmul.f32 %v4268_v42, %v11491_v35  ;;  %v4457_v34 = vsel %vm775_vm6, %v4454_v20, %v4456_v51 }
 0x67c   : > { %v11512_v59 = vpack.i.bf16 %v11501_v40, %v11508_v41  ;;  %v4286_v55 = vmul.f32 %v4270_v43, %v11501_v40  ;;  %v4465_v62 = vmul.f32 %v4457_v34, %v11449_v15  ;;  %v4466_v1 = vmul.f32 %v4456_v51, %v11451_v33 }
 0x67d   : > { %9589 = vrot.lane.b32.xlu1 %v11495_v37, %s13258_s1  ;;  %9579 = vrot.lane.b32.xlu0 %v11499_v39, %s13258_s1  ;;  %v9603_v60 = vpack.i.bf16 %v4284_v31, %v4281_v3  ;;  %v4461_v8 = vmul.f32 %v4454_v20, %v11474_v7  ;;  %v4464_v12 = vmul.f32 %v4454_v20, %v11476_v4 }
 0x67e   : > { %v9618_v26 = vpack.i.bf16 %v4286_v55, %v4285_v56  ;;  %v9623_v13 = vpack.i.bf16 %v4277_v23, %v4276_v44  ;;  %v9608_v2 = vpack.i.bf16 %v4466_v1, %v4465_v62  ;;  %v4468_v16 = vmul.f32 %v4457_v34, %v11462_v18 }
 0x67f   : > { %v4469_v19 = vmul.f32 %v4456_v51, %v11464_v22  ;;  %v9628_v21 = vpack.i.bf16 %v4464_v12, %v4461_v8  ;;  %v4471_v42 = vmul.f32 %v4457_v34, %v11508_v41  ;;  %v4467_v61 = vmul.f32 %v4454_v20, %v11489_v25 }
 0x680   : > { %v4462_v48 = vmul.f32 %v4457_v34, %v11487_v24 }
 0x681   : > { %4795 = vrot.lane.b32.xlu1 %v11414_v57, %s13260_s19  ;;  %9584 = vrot.lane.b32.xlu0 %v11512_v59, %s13258_s1  ;;  %v9633_v43 = vpack.i.bf16 %v4469_v19, %v4468_v16 }
 0x685   : > { %3881 = vperm.xlu1 %9442, %v3871_v45   ;;  %4793 = vrot.lane.b32.xlu0 %v11417_v58, %s13260_s19  ;;  %v4472_v45 = vmul.f32 %v4456_v51, %v11501_v40 }
 0x689   : > { %3891 = vperm.xlu1 %9442, %v3873_v46   ;;  %3876 = vperm.xlu0 %9441, %v3870_v30   ;;  %v4470_v46 = vmul.f32 %v4454_v20, %v11491_v35  ;;  %v9638_v30 = vpack.i.bf16 %v4472_v45, %v4471_v42 }
 0x68b   : > { %v9643_v47 = vpack.i.bf16 %v4470_v46, %v4467_v61  ;;  %v3983_v46 = vmul.f32 %v11432_v63, %v11487_v24 }
 0x68d   : > { %3886 = vperm.xlu0 %9441, %v3872_v49   ;;  %9594 = vrot.lane.b32.xlu1 %v9593_v50, %s13261_s5  ;;  %v4463_v49 = vmul.f32 %v4456_v51, %v11482_v27 }
 0x68f   : > { %v9658_v50 = vpack.i.bf16 %v4463_v49, %v4462_v48 }
 0x691   : > { %4981 = vrot.lane.b32.xlu0 %v11432_v63, %s13262_s6  ;;  %4979 = vrot.lane.b32.xlu1 %v11435_v0, %s13262_s6 }
 0x695   : > { %9614 = vrot.lane.b32.xlu0 %v9613_v52, %s13261_s5  ;;  %9599 = vrot.lane.b32.xlu1 %v9598_v54, %s13261_s5 }
 0x699   : > { %9619 = vrot.lane.b32.xlu0 %v9618_v26, %s13261_s5  ;;  %9604 = vrot.lane.b32.xlu1 %v9603_v60, %s13261_s5 }
 0x69d   : > { %9624 = vrot.lane.b32.xlu0 %v9623_v13, %s13261_s5  ;;  %9609 = vrot.lane.b32.xlu1 %v9608_v2, %s13246_s0 }
 0x6a1   : > { %9629 = vrot.lane.b32.xlu0 %v9628_v21, %s13246_s0  ;;  %9634 = vrot.lane.b32.xlu1 %v9633_v43, %s13246_s0 }
 0x6a5   : > { %9639 = vrot.lane.b32.xlu0 %v9638_v30, %s13246_s0  ;;  %9644 = vrot.lane.b32.xlu1 %v9643_v47, %s13246_s0 }
 0x6a9   : > { %9649 = vrot.lane.b32.xlu0 %v11499_v39, %s13247_s2  ;;  %9654 = vrot.lane.b32.xlu1 %v11457_v32, %s13247_s2 }
 0x6ad   : > { %5319 = vrot.lane.b32.xlu1 %v11417_v58, %s13255_s21  ;;  %9659 = vrot.lane.b32.xlu0 %v9658_v50, %s13246_s0 }
 0x6b1   : > { %9669 = vrot.lane.b32.xlu1 %v11470_v5, %s13247_s2  ;;  %9664 = vrot.lane.b32.xlu0 %v11480_v38, %s13247_s2 }
 0x6b5   : > { %9679 = vrot.lane.b32.xlu1 %v11495_v37, %s13247_s2  ;;  %5321 = vrot.lane.b32.xlu0 %v11414_v57, %s13255_s21 }
 0x6b9   : > { %9674 = vrot.lane.b32.xlu0 %v11512_v59, %s13247_s2 }
 0x6ce   : > { %v11590_v9 = vpop.f32.mrb[10].mxu0 }
 0x6cf   : > { %v11592_v58 = vpop.f32.mrb[11].mxu0 }
 0x6d2   : > { %v11594_v11 = vpop.f32.mrb[12].mxu0 }
 0x6d3   : > { %v11596_v17 = vpop.f32.mrb[13].mxu0 }
 0x6d6   : > { %v11598_v53 = vpop.f32.mrb[14].mxu0 }
 0x6d7   : > { %v11600_v20 = vpop.f32.mrb[15].mxu0 }
 0x6da   : > { %v11602_v51 = vpop.f32.mrb[16].mxu0 }
 0x6db   : > { %v11604_v52 = vpop.f32.mrb[17].mxu0 }
 0x6e4   : > { %v9565_v57 = vpop.permute.xlu1 %9564 }
 0x6e5   : > { %v9567_v31 = vunpack.i.h.bf16 %v9565_v57  ;;  %v9566_v34 = vunpack.i.l.bf16 %v9565_v57 }
 0x6e7   : > { %v4042_v8 = vsel %vm713_vm9, %v9566_v34, %v9567_v31  ;;  %v3985_v31 = vmul.f32 %v11432_v63, %v11449_v15 }
 0x6e8   : > { %v9570_v54 = vpop.permute.xlu1 %9569 }
 0x6e9   : > { %v9572_v62 = vunpack.i.h.bf16 %v9570_v54  ;;  %v9571_v1 = vunpack.i.l.bf16 %v9570_v54 }
 0x6eb   : > { %v9575_v55 = vpop.permute.xlu0 %9574  ;;  %v4044_v49 = vsel %vm713_vm9, %v9571_v1, %v9572_v62  ;;  %v3989_v62 = vmul.f32 %v11432_v63, %v11508_v41 }
 0x6ec   : > { %v9577_v56 = vunpack.i.h.bf16 %v9575_v55  ;;  %v9576_v23 = vunpack.i.l.bf16 %v9575_v55 }
 0x6ee   : > { %v4041_v12 = vsel %vm713_vm9, %v9577_v56, %v9566_v34 }
 0x6ef   : > { %v9580_v3 = vpop.permute.xlu0 %9579  ;;  %v9590_v44 = vpop.permute.xlu1 %9589 }
 0x6f0   : > { %v9582_v26 = vunpack.i.h.bf16 %v9580_v3  ;;  %v9581_v60 = vunpack.i.l.bf16 %v9580_v3  ;;  %v9591_v2 = vunpack.i.l.bf16 %v9590_v44  ;;  %v9592_v43 = vunpack.i.h.bf16 %v9590_v44 }
 0x6f1   : > { %v3982_v44 = vmul.f32 %v11435_v0, %v11474_v7 }
 0x6f2   : > { %v4039_v13 = vsel %vm713_vm9, %v9576_v23, %v9581_v60  ;;  %v4040_v16 = vsel %vm713_vm9, %v9581_v60, %v9582_v26  ;;  %v4043_v30 = vsel %vm713_vm9, %v9591_v2, %v9571_v1  ;;  %v8929_v23 = vpack.c.bf16 %v3985_v31, %v3983_v46 }
 0x6f3   : > { %v9585_v19 = vpop.permute.xlu0 %9584  ;;  %v8921_v21 = vpack.c.bf16 %v4042_v8, %v4040_v16  ;;  %v8923_v42 = vpack.c.bf16 %v4041_v12, %v4039_v13  ;;  %v11614_v48 = vpop.permute.xlu1 %4795  ;;  %v8710_v8 = vld [vmem:[%s13174_s14 + $0x20] sm:$0xff]  ;;  %v3984_v12 = vmul.f32 %v11435_v0, %v11476_v4  ;;  %v3987_v16 = vmul.f32 %v11432_v63, %v11462_v18 }
 0x6f4   : > { %v9587_v45 = vunpack.i.h.bf16 %v9585_v19  ;;  %v9586_v61 = vunpack.i.l.bf16 %v9585_v19  ;;  %v4806_v60 = vmul.f32 %v11614_v48, %v11451_v33  ;;  %v4809_v63 = vmul.f32 %v11614_v48, %v11464_v22 }
 0x6f5   : > { %8922 = vmatprep.subr.bf16.mxu1 %v8921_v21  ;;  %v8931_v21 = vpack.c.bf16 %v3984_v12, %v3982_v44  ;;  %v3986_v46 = vmul.f32 %v11435_v0, %v11489_v25  ;;  %v3990_v44 = vld [vmem:[%s13174_s14] sm:$0xff] }
 0x6f6   : > { %v4045_v47 = vsel %vm713_vm9, %v9592_v43, %v9586_v61  ;;  %8924 = vmatpush1.bf16.msra.mxu1 %v8923_v42  ;;  %v4046_v50 = vsel %vm713_vm9, %v9586_v61, %v9587_v45  ;;  %v4812_v42 = vmul.f32 %v11614_v48, %v11501_v40  ;;  %v3988_v43 = vmul.f32 %v11435_v0, %v11491_v35  ;;  %v8712_v0 = vld [vmem:[%s13174_s14 + $0x30] sm:$0xff] }
 0x6f7   : > { %v4794_v57 = vpop.permute.xlu0 %4793  ;;  %v8925_v54 = vpack.c.bf16 %v4046_v50, %v4044_v49  ;;  %v8927_v55 = vpack.c.bf16 %v4045_v47, %v4043_v30  ;;  %v8933_v45 = vpack.c.bf16 %v3989_v62, %v3987_v16  ;;  %v8711_v30 = vld [vmem:[%s13174_s14 + $0x28] sm:$0xff] }
 0x6f8   : > { %v11622_v34 = vsel %vm850_vm7, %v4794_v57, %v11614_v48  ;;  %v4801_v56 = vmul.f32 %v4794_v57, %v11474_v7  ;;  %v4804_v3 = vmul.f32 %v4794_v57, %v11476_v4  ;;  %v4807_v49 = vmul.f32 %v4794_v57, %v11489_v25 }
 0x6f9   : > { %8926 = vmatprep.subr.bf16.mxu1 %v8925_v54  ;;  %v4805_v26 = vmul.f32 %v11622_v34, %v11449_v15  ;;  %v4811_v13 = vmul.f32 %v11622_v34, %v11508_v41  ;;  %v4808_v19 = vmul.f32 %v11622_v34, %v11462_v18  ;;  %v4810_v50 = vmul.f32 %v4794_v57, %v11491_v35  ;;  %v8713_v57 = vld [vmem:[%s13174_s14 + $0x38] sm:$0xff] }
 0x6fa   : > { %8928 = vmatpush1.bf16.msra.mxu1 %v8927_v55  ;;  %v9688_v1 = vpack.i.bf16 %v4804_v3, %v4801_v56  ;;  %v8935_v54 = vpack.c.bf16 %v3988_v43, %v3986_v46 }
 0x6fb   : > { %8930 = vmatprep.subr.bf16.mxu1 %v8929_v23  ;;  %v9683_v2 = vpack.i.bf16 %v4806_v60, %v4805_v26  ;;  %v9698_v61 = vpack.i.bf16 %v4812_v42, %v4811_v13  ;;  %v9693_v47 = vpack.i.bf16 %v4809_v63, %v4808_v19  ;;  %v9703_v55 = vpack.i.bf16 %v4810_v50, %v4807_v49  ;;  %v3991_v60 = vld [vmem:[%s13174_s14 + $0x8] sm:$0xff]  ;;  %v3992_v19 = vld [vmem:[%s13174_s14 + $0x10] sm:$0xff] }
 0x6fc   : > { %9689 = vrot.lane.b32.xlu0 %v9688_v1, %s13248_s22  ;;  %v4802_v42 = vmul.f32 %v11622_v34, %v11487_v24  ;;  %v3993_v34 = vld [vmem:[%s13174_s14 + $0x18] sm:$0xff] }
 0x6fd   : > { %9684 = vrot.lane.b32.xlu1 %v9683_v2, %s13248_s22  ;;  %8714 = vmatmul.mubr.msk.f32.vlgmr.msra.gmra.mrb[6].mxu1 %vm899_vm8, %v8710_v8 }
 0x6fe   : > { %8932 = vmatpush1.bf16.msra.mxu1 %v8931_v21  ;;  %4137 = vmatprep.mubr.f32.mxu1 %v10940_v36 }
 0x6ff   : > { %8934 = vmatprep.subr.bf16.mxu1 %v8933_v45 }
 0x700   : > { %9699 = vrot.lane.b32.xlu0 %v9698_v61, %s13248_s22 }
 0x701   : > { %9694 = vrot.lane.b32.xlu1 %v9693_v47, %s13248_s22  ;;  %8715 = vmatmul.mubr.msk.f32.gmra.mrb[8].mxu1 %vm899_vm8, %v8711_v30  ;;  %v4803_v30 = vmul.f32 %v11614_v48, %v11482_v27 }
 0x702   : > { %8936 = vmatpush1.bf16.msra.mxu1 %v8935_v54  ;;  %4143 = vmatprep.mubr.f32.mxu1 %v10940_v36 }
 0x703   : > { %v9723_v47 = vpack.i.bf16 %v4803_v30, %v4802_v42 }
 0x704   : > { %v3882_v31 = vpop.permute.xlu1 %3881 }
 0x705   : > { %9704 = vrot.lane.b32.xlu1 %v9703_v55, %s13248_s22  ;;  %8716 = vmatmul.mubr.msk.f32.gmra.mrb[10].mxu1 %vm899_vm8, %v8712_v0 }
 0x706   : > { %4149 = vmatprep.mubr.f32.mxu1 %v10940_v36 }
 0x708   : > { %v3877_v56 = vpop.permute.xlu0 %3876  ;;  %v11675_v3 = vpop.permute.xlu1 %3891 }
 0x709   : > { %8717 = vmatmul.mubr.msk.f32.gmra.mrb[12].mxu1 %vm899_vm8, %v8713_v57  ;;  %v3895_v54 = vadd.f32 %v3877_v56, %v11592_v58  ;;  %v3894_v57 = vadd.f32 %v3877_v56, %v11590_v9 }
 0x70a   : > { %4232 = vmatprep.mubr.f32.mxu1 %v10940_v36 }
 0x70b   : > { %v3902_v30 = vmax.f32 %v3894_v57, 0.0 }
 0x70c   : > { %v11682_v23 = vpop.permute.xlu0 %3886  ;;  %v11684_v26 = vpop.permute.xlu1 %9594 }
 0x70d   : > { %8718 = vmatmul.mubr.msk.f32.vlgmr.msra.gmra.mrb[6].mxu1 %vm899_vm8, %v3990_v44  ;;  %v9597_v44 = vunpack.i.h.bf16 %v11684_v26 }
 0x70e   : > { %4238 = vmatprep.mubr.f32.mxu1 %v10940_v36 }
 0x710   : > { %v11691_v62 = vpop.permute.xlu0 %4981  ;;  %v11693_v1 = vpop.permute.xlu1 %4979 }
 0x711   : > { %v11698_v8 = vsel %vm899_vm8, %v11693_v1, %v11691_v62  ;;  %v4987_v12 = vmul.f32 %v11693_v1, %v11474_v7  ;;  %v4990_v13 = vmul.f32 %v11693_v1, %v11476_v4  ;;  %v4992_v2 = vmul.f32 %v11691_v62, %v11451_v33  ;;  %8719 = vmatmul.mubr.msk.f32.gmra.mrb[8].mxu1 %vm899_vm8, %v3991_v60 }
 0x712   : > { %v4991_v16 = vmul.f32 %v11698_v8, %v11449_v15  ;;  %4244 = vmatprep.mubr.f32.mxu1 %v10940_v36  ;;  %v4994_v61 = vmul.f32 %v11698_v8, %v11462_v18  ;;  %v4995_v46 = vmul.f32 %v11691_v62, %v11464_v22  ;;  %v4988_v49 = vmul.f32 %v11698_v8, %v11487_v24 }
 0x713   : > { %v9713_v21 = vpack.i.bf16 %v4990_v13, %v4987_v12  ;;  %v4989_v50 = vmul.f32 %v11691_v62, %v11482_v27  ;;  %v9596_v60 = vunpack.i.l.bf16 %v11684_v26 }
 0x714   : > { %v9615_v43 = vpop.permute.xlu0 %9614  ;;  %v9600_v45 = vpop.permute.xlu1 %9599  ;;  %v9708_v63 = vpack.i.bf16 %v4992_v2, %v4991_v16  ;;  %v9718_v55 = vpack.i.bf16 %v4995_v46, %v4994_v61  ;;  %v3896_v16 = vadd.f32 %v3882_v31, %v11594_v11 }
 0x715   : > { %9714 = vrot.lane.b32.xlu0 %v9713_v21, %s13249_s24  ;;  %8720 = vmatmul.mubr.msk.f32.gmra.mrb[10].mxu1 %vm899_vm8, %v3992_v19  ;;  %v9617_v12 = vunpack.i.h.bf16 %v9615_v43  ;;  %v9728_v2 = vpack.i.bf16 %v4989_v50, %v4988_v49  ;;  %v3897_v19 = vadd.f32 %v3882_v31, %v11596_v17  ;;  %v3903_v21 = vmax.f32 %v3895_v54, 0.0 }
 0x716   : > { %9709 = vrot.lane.b32.xlu1 %v9708_v63, %s13249_s24  ;;  %4250 = vmatprep.mubr.f32.mxu1 %v10940_v36  ;;  %v9616_v42 = vunpack.i.l.bf16 %v9615_v43  ;;  %v9602_v56 = vunpack.i.h.bf16 %v9600_v45  ;;  %v9601_v61 = vunpack.i.l.bf16 %v9600_v45  ;;  %v4331_v11 = vsel %vm764_vm10, %v9596_v60, %v9597_v44 }
 0x717   : > { %v4330_v17 = vsel %vm764_vm10, %v9617_v12, %v9596_v60  ;;  %v3905_v45 = vmax.f32 %v3897_v19, 0.0  ;;  %v3898_v50 = vadd.f32 %v11682_v23, %v11598_v53  ;;  %v3900_v53 = vadd.f32 %v11675_v3, %v11602_v51 }
 0x718   : > { %v9620_v48 = vpop.permute.xlu0 %9619  ;;  %v9605_v0 = vpop.permute.xlu1 %9604  ;;  %v4333_v57 = vsel %vm764_vm10, %v9601_v61, %v9602_v56  ;;  %v4993_v51 = vmul.f32 %v11693_v1, %v11489_v25 }
 0x719   : > { %9724 = vrot.lane.b32.xlu0 %v9723_v47, %s13248_s22  ;;  %8721 = vmatmul.mubr.msk.f32.gmra.mrb[12].mxu1 %vm899_vm8, %v3993_v34  ;;  %v9622_v13 = vunpack.i.h.bf16 %v9620_v48  ;;  %v9621_v58 = vunpack.i.l.bf16 %v9620_v48  ;;  %v9607_v34 = vunpack.i.h.bf16 %v9605_v0  ;;  %v9606_v47 = vunpack.i.l.bf16 %v9605_v0 }
 0x71a   : > { %9719 = vrot.lane.b32.xlu1 %v9718_v55, %s13249_s24  ;;  %4420 = vmatprep.mubr.f32.mxu1 %v10940_v36  ;;  %v3906_v19 = vmax.f32 %v3898_v50, 0.0 }
 0x71b   : > { %v4335_v49 = vsel %vm764_vm10, %v9621_v58, %v9622_v13  ;;  %v4334_v44 = vsel %vm764_vm10, %v9607_v34, %v9621_v58  ;;  %v4332_v60 = vsel %vm764_vm10, %v9606_v47, %v9601_v61  ;;  %v3904_v13 = vmax.f32 %v3896_v16, 0.0 }
 0x71c   : > { %v9625_v63 = vpop.permute.xlu0 %9624  ;;  %v11742_v9 = vpop.permute.xlu1 %9609  ;;  %v8941_v12 = vpack.c.bf16 %v4335_v49, %v4333_v57  ;;  %v8943_v58 = vpack.c.bf16 %v4334_v44, %v4332_v60  ;;  %v3908_v16 = vmax.f32 %v3900_v53, 0.0 }
 0x71d   : > { %v9627_v26 = vunpack.i.h.bf16 %v9625_v63  ;;  %v9626_v46 = vunpack.i.l.bf16 %v9625_v63  ;;  %9729 = vrot.lane.b32.xlu0 %v9728_v2, %s13249_s24  ;;  %v3899_v2 = vadd.f32 %v11682_v23, %v11600_v20  ;;  %v3901_v63 = vadd.f32 %v11675_v3, %v11604_v52  ;;  %v8722_v20 = vld [vmem:[%s13174_s14 + $0x40] sm:$0xff] }
 0x71e   : > { %5515 = vrot.lane.b32.xlu1 %v3903_v21, %s13269_s10  ;;  %v4996_v23 = vmul.f32 %v11693_v1, %v11491_v35  ;;  %v9612_v61 = vunpack.i.h.bf16 %v11742_v9 }
 0x71f   : > { %v4328_v31 = vsel %vm764_vm10, %v9616_v42, %v9626_v46  ;;  %v4329_v43 = vsel %vm764_vm10, %v9626_v46, %v9627_v26  ;;  %v3907_v56 = vmax.f32 %v3899_v2, 0.0  ;;  %v9611_v26 = vunpack.i.l.bf16 %v11742_v9  ;;  %v5876_v2 = vld [vmem:[%s13163_s3] sm:$0x3] }
 0x720   : > { %v11753_v54 = vpop.permute.xlu0 %9629  ;;  %v11755_v48 = vpop.permute.xlu1 %9634  ;;  %v8937_v0 = vpack.c.bf16 %v4331_v11, %v4329_v43  ;;  %v8939_v55 = vpack.c.bf16 %v4330_v17, %v4328_v31  ;;  %v4997_v46 = vmul.f32 %v11698_v8, %v11508_v41  ;;  %v3909_v9 = vmax.f32 %v3901_v63, 0.0  ;;  %v8723_v8 = vld [vmem:[%s13174_s14 + $0x48] sm:$0xff] }
 0x721   : > { %5513 = vrot.lane.b32.xlu0 %v3902_v30, %s13269_s10  ;;  %v4998_v30 = vmul.f32 %v11691_v62, %v11501_v40  ;;  %v9632_v34 = vunpack.i.h.bf16 %v11753_v54  ;;  %v9631_v11 = vunpack.i.l.bf16 %v11753_v54  ;;  %v9738_v31 = vpack.i.bf16 %v4996_v23, %v4993_v51 }
 0x722   : > { %8938 = vmatprep.subr.bf16.mxu1 %v8937_v0  ;;  %5519 = vrot.lane.b32.xlu1 %v3905_v45, %s13269_s10  ;;  %v4517_v49 = vsel %vm13215_vm11, %v9611_v26, %v9612_v61  ;;  %v9637_v45 = vunpack.i.h.bf16 %v11755_v48  ;;  %v9636_v50 = vunpack.i.l.bf16 %v11755_v48  ;;  %v11829_v23 = vrot.slane %v5876_v2, %v10579_v28 }
 0x723   : > { %8940 = vmatpush1.bf16.msra.mxu1 %v8939_v55  ;;  %v9733_v43 = vpack.i.bf16 %v4998_v30, %v4997_v46  ;;  %v4516_v57 = vsel %vm13215_vm11, %v9632_v34, %v9611_v26 }
 0x724   : > { %v9640_v21 = vpop.permute.xlu0 %9639  ;;  %v11766_v42 = vpop.permute.xlu1 %9644  ;;  %8942 = vmatprep.subr.bf16.mxu1 %v8941_v12  ;;  %v4519_v51 = vsel %vm13215_vm11, %v9636_v50, %v9637_v45  ;;  %v11853_v45 = vrot.slane %v5876_v2, %v10581_v29 }
 0x725   : > { %5517 = vrot.lane.b32.xlu0 %v3904_v13, %s13269_s10  ;;  %v9642_v47 = vunpack.i.h.bf16 %v9640_v21  ;;  %v9641_v1 = vunpack.i.l.bf16 %v9640_v21  ;;  %v9647_v44 = vunpack.i.h.bf16 %v11766_v42  ;;  %v9646_v54 = vunpack.i.l.bf16 %v11766_v42 }
 0x726   : > { %5521 = vrot.lane.b32.xlu1 %v3906_v19, %s13269_s10 }
 0x727   : > { %8944 = vmatpush1.bf16.msra.mxu1 %v8943_v58  ;;  %v4521_v60 = vsel %vm13215_vm11, %v9641_v1, %v9642_v47  ;;  %v4518_v61 = vsel %vm13215_vm11, %v9646_v54, %v9636_v50 }
 0x728   : > { %v11781_v52 = vpop.permute.xlu0 %9649  ;;  %v11783_v3 = vpop.permute.xlu1 %9654 }
 0x729   : > { %5523 = vrot.lane.b32.xlu0 %v3907_v56, %s13269_s10  ;;  %v9652_v12 = vunpack.i.h.bf16 %v11781_v52  ;;  %v9651_v48 = vunpack.i.l.bf16 %v11781_v52  ;;  %v9657_v19 = vunpack.i.h.bf16 %v11783_v3  ;;  %v9656_v21 = vunpack.i.l.bf16 %v11783_v3 }
 0x72a   : > { %5525 = vrot.lane.b32.xlu1 %v3908_v16, %s13269_s10  ;;  %8726 = vmatmul.mubr.msk.f32.vlgmr.msra.gmra.mrb[6].mxu1 %vm899_vm8, %v8722_v20  ;;  %v8724_v16 = vld [vmem:[%s13174_s14 + $0x50] sm:$0xff]  ;;  %v4520_v20 = vsel %vm13215_vm11, %v9647_v44, %v9641_v1  ;;  %v8949_v3 = vpack.c.bf16 %v4521_v60, %v4519_v51 }
 0x72b   : > { %4426 = vmatprep.mubr.f32.mxu1 %v10940_v36  ;;  %v4669_v34 = vsel %vm13214_vm12, %v9651_v48, %v9652_v12  ;;  %v4671_v47 = vsel %vm13214_vm12, %v9656_v21, %v9657_v19 }
 0x72c   : > { %v9660_v62 = vpop.permute.xlu0 %9659  ;;  %v11798_v17 = vpop.permute.xlu1 %5319 }
 0x72d   : > { %v9662_v0 = vunpack.i.h.bf16 %v9660_v62  ;;  %v9661_v55 = vunpack.i.l.bf16 %v9660_v62  ;;  %5527 = vrot.lane.b32.xlu0 %v3909_v9, %s13269_s10 }
 0x72e   : > { %9739 = vrot.lane.b32.xlu1 %v9738_v31, %s13249_s24  ;;  %8727 = vmatmul.mubr.msk.f32.gmra.mrb[8].mxu1 %vm899_vm8, %v8723_v8  ;;  %v8951_v8 = vpack.c.bf16 %v4520_v20, %v4518_v61 }
 0x72f   : > { %v4514_v13 = vsel %vm13215_vm11, %v9631_v11, %v9661_v55  ;;  %4432 = vmatprep.mubr.f32.mxu1 %v10940_v36  ;;  %v4515_v53 = vsel %vm13215_vm11, %v9661_v55, %v9662_v0 }
 0x730   : > { %v9665_v42 = vpop.permute.xlu0 %9664  ;;  %v9670_v58 = vpop.permute.xlu1 %9669  ;;  %v8945_v63 = vpack.c.bf16 %v4517_v49, %v4515_v53  ;;  %v8947_v56 = vpack.c.bf16 %v4516_v57, %v4514_v13 }
 0x731   : > { %9734 = vrot.lane.b32.xlu0 %v9733_v43, %s13249_s24  ;;  %v9667_v26 = vunpack.i.h.bf16 %v9665_v42  ;;  %v9666_v52 = vunpack.i.l.bf16 %v9665_v42  ;;  %v9672_v1 = vunpack.i.h.bf16 %v9670_v58  ;;  %v9671_v9 = vunpack.i.l.bf16 %v9670_v58  ;;  %v8732_v42 = vld [vmem:[%s13174_s14 + $0x70] sm:$0xff] }
 0x732   : > { %8946 = vmatprep.subr.bf16.mxu1 %v8945_v63  ;;  %9749 = vrot.lane.b32.xlu1 %v11457_v32, %s13250_s25  ;;  %v8725_v32 = vld [vmem:[%s13174_s14 + $0x58] sm:$0xff]  ;;  %v8953_v43 = vpack.c.bf16 %v4671_v47, %v4669_v34  ;;  %v5330_v58 = vmul.f32 %v11798_v17, %v11476_v4 }
 0x733   : > { %8728 = vmatmul.mubr.msk.f32.gmra.mrb[10].mxu1 %vm899_vm8, %v8724_v16  ;;  %v4668_v11 = vsel %vm13214_vm12, %v9666_v52, %v9651_v48  ;;  %v4670_v62 = vsel %vm13214_vm12, %v9667_v26, %v9656_v21  ;;  %v4673_v54 = vsel %vm13214_vm12, %v9671_v9, %v9672_v1 }
 0x734   : > { %8948 = vmatpush1.bf16.msra.mxu1 %v8947_v56  ;;  %v11833_v46 = vpop.permute.xlu0 %5321  ;;  %v9680_v30 = vpop.permute.xlu1 %9679  ;;  %4438 = vmatprep.mubr.f32.mxu1 %v10940_v36  ;;  %v8955_v44 = vpack.c.bf16 %v4670_v62, %v4668_v11  ;;  %v8738_v56 = vld [vmem:[%s13174_s14 + $0x80] sm:$0xff] }
 0x735   : > { %8950 = vmatprep.subr.bf16.mxu1 %v8949_v3  ;;  %9744 = vrot.lane.b32.xlu0 %v11499_v39, %s13250_s25  ;;  %v9681_v31 = vunpack.i.l.bf16 %v9680_v30  ;;  %v8730_v39 = vld [vmem:[%s13174_s14 + $0x60] sm:$0xff]  ;;  %v5323_v50 = vsel %vm13213_vm0, %v11798_v17, %v11833_v46  ;;  %v9682_v0 = vunpack.i.h.bf16 %v9680_v30  ;;  %v5332_v13 = vmul.f32 %v11833_v46, %v11451_v33  ;;  %vm13278_vm0 = vmmov %vm13275_vm2 }
 0x736   : > { %5886 = vrot.lane.b32.xlu1 %v11829_v23, %s13256_s30  ;;  %v5331_v2 = vmul.f32 %v5323_v50, %v11449_v15  ;;  %v5328_v33 = vmul.f32 %v5323_v50, %v11487_v24  ;;  %v5329_v19 = vmul.f32 %v11833_v46, %v11482_v27  ;;  %v5565_v15 = vld [vmem:[%s13241_s26] sm:$0x3]  ;;  %v5334_v63 = vmul.f32 %v5323_v50, %v11462_v18  ;;  %vm13281_vm11 = vmmov %vm13278_vm0 }
 0x737   : > { %8729 = vmatmul.mubr.msk.f32.gmra.mrb[12].mxu1 %vm899_vm8, %v8725_v32  ;;  %v4672_v60 = vsel %vm13214_vm12, %v9681_v31, %v9671_v9  ;;  %v11893_v27 = vrot.slane %v5565_v15, %v10579_v28  ;;  %v5335_v16 = vmul.f32 %v11833_v46, %v11464_v22  ;;  %v5333_v18 = vmul.f32 %v11798_v17, %v11489_v25 }
 0x738   : > { %8952 = vmatpush1.bf16.msra.mxu1 %v8951_v8  ;;  %v9675_v49 = vpop.permute.xlu0 %9674  ;;  %4606 = vmatprep.mubr.f32.mxu1 %v10940_v36  ;;  %v9778_v21 = vpack.i.bf16 %v5332_v13, %v5331_v2  ;;  %v9773_v24 = vpack.i.bf16 %v5329_v19, %v5328_v33  ;;  %v5336_v22 = vmul.f32 %v11798_v17, %v11491_v35 }
 0x739   : > { %v9677_v55 = vunpack.i.h.bf16 %v9675_v49  ;;  %v9676_v57 = vunpack.i.l.bf16 %v9675_v49  ;;  %8954 = vmatprep.subr.bf16.mxu1 %v8953_v43  ;;  %9754 = vrot.lane.b32.xlu0 %v11480_v38, %s13250_s25  ;;  %v9788_v4 = vpack.i.bf16 %v5335_v16, %v5334_v63  ;;  %v11921_v20 = vrot.slane %v5565_v15, %v10581_v29 }
 0x73a   : > { %9759 = vrot.lane.b32.xlu1 %v11470_v5, %s13250_s25  ;;  %v8731_v5 = vld [vmem:[%s13174_s14 + $0x68] sm:$0xff]  ;;  %v5337_v51 = vmul.f32 %v5323_v50, %v11508_v41  ;;  %v5338_v25 = vmul.f32 %v11833_v46, %v11501_v40  ;;  %v9798_v35 = vpack.i.bf16 %v5336_v22, %v5333_v18  ;;  %v8740_v40 = vld [vmem:[%s13174_s14 + $0x90] sm:$0xff]  ;;  %v8741_v41 = vld [vmem:[%s13174_s14 + $0x98] sm:$0xff] }
 0x73b   : > { %v4674_v12 = vsel %vm13214_vm12, %v9682_v0, %v9676_v57  ;;  %8734 = vmatmul.mubr.msk.f32.vlgmr.msra.gmra.mrb[6].mxu1 %vm899_vm8, %v8730_v39  ;;  %v4675_v48 = vsel %vm13214_vm12, %v9676_v57, %v9677_v55  ;;  %vm13279_vm12 = vmmov %vm13278_vm0 }
 0x73c   : > { %8956 = vmatpush1.bf16.msra.mxu1 %v8955_v44  ;;  %v8957_v53 = vpack.c.bf16 %v4675_v48, %v4673_v54  ;;  %v8959_v38 = vpack.c.bf16 %v4674_v12, %v4672_v60  ;;  %4612 = vmatprep.mubr.f32.mxu1 %v10940_v36  ;;  %v9793_v61 = vpack.i.bf16 %v5338_v25, %v5337_v51  ;;  %v8746_v51 = vld [vmem:[%s13174_s14 + $0xa0] sm:$0xff] }
 0x73d   : > { %5888 = vrot.lane.b32.xlu0 %v11853_v45, %s13256_s30 }
 0x73e   : > { %8958 = vmatprep.subr.bf16.mxu1 %v8957_v53  ;;  %9769 = vrot.lane.b32.xlu1 %v11495_v37, %s13250_s25  ;;  %v5327_v37 = vmul.f32 %v11798_v17, %v11474_v7  ;;  %v8739_v17 = vld [vmem:[%s13174_s14 + $0x88] sm:$0xff] }
 0x73f   : > { %8735 = vmatmul.mubr.msk.f32.gmra.mrb[8].mxu1 %vm899_vm8, %v8731_v5 }
 0x740   : > { %8960 = vmatpush1.bf16.msra.mxu1 %v8959_v38  ;;  %4618 = vmatprep.mubr.f32.mxu1 %v10940_v36  ;;  %v9783_v7 = vpack.i.bf16 %v5330_v58, %v5327_v37 }
 0x741   : > { %9764 = vrot.lane.b32.xlu0 %v11512_v59, %s13250_s25  ;;  %v8733_v59 = vld [vmem:[%s13174_s14 + $0x78] sm:$0xff] }
 0x742   : > { %9779 = vrot.lane.b32.xlu1 %v9778_v21, %s13252_s29 }
 0x743   : > { %8736 = vmatmul.mubr.msk.f32.gmra.mrb[10].mxu1 %vm899_vm8, %v8732_v42 }
 0x744   : > { %4624 = vmatprep.mubr.f32.mxu1 %v10940_v36 }
 0x745   : > { %9774 = vrot.lane.b32.xlu0 %v9773_v24, %s13252_s29 }
 0x746   : > { %6072 = vrot.lane.b32.xlu1 %v11893_v27, %s13257_s20 }
 0x747   : > { %8737 = vmatmul.mubr.msk.f32.gmra.mrb[12].mxu1 %vm899_vm8, %v8733_v59 }
 0x748   : > { %4760 = vmatprep.mubr.f32.mxu1 %v10940_v36 }
 0x749   : > { %9784 = vrot.lane.b32.xlu0 %v9783_v7, %s13252_s29 }
 0x74a   : > { %9789 = vrot.lane.b32.xlu1 %v9788_v4, %s13252_s29 }
 0x74b   : > { %8742 = vmatmul.mubr.msk.f32.vlgmr.msra.gmra.mrb[6].mxu1 %vm899_vm8, %v8738_v56 }
 0x74c   : > { %4766 = vmatprep.mubr.f32.mxu1 %v10940_v36 }
 0x74d   : > { %6074 = vrot.lane.b32.xlu0 %v11921_v20, %s13257_s20 }
 0x74e   : > { %9799 = vrot.lane.b32.xlu1 %v9798_v35, %s13252_s29 }
 0x74f   : > { %8743 = vmatmul.mubr.msk.f32.gmra.mrb[8].mxu1 %vm899_vm8, %v8739_v17 }
 0x750   : > { %4772 = vmatprep.mubr.f32.mxu1 %v10940_v36 }
 0x751   : > { %9794 = vrot.lane.b32.xlu0 %v9793_v61, %s13252_s29 }
 0x752   : > { %6412 = vrot.lane.b32.xlu1 %v11829_v23, %s13260_s19 }
 0x753   : > { %8744 = vmatmul.mubr.msk.f32.gmra.mrb[10].mxu1 %vm899_vm8, %v8740_v40 }
 0x754   : > { %4778 = vmatprep.mubr.f32.mxu1 %v10940_v36 }
 0x755   : > { %6414 = vrot.lane.b32.xlu0 %v11853_v45, %s13260_s19 }
 0x757   : > { %8745 = vmatmul.mubr.msk.f32.gmra.mrb[12].mxu1 %vm899_vm8, %v8741_v41 }
 0x758   : > { %4946 = vmatprep.mubr.f32.mxu1 %v10940_v36 }
 0x76e   : > { %v9690_v52 = vpop.permute.xlu0 %9689 }
 0x76f   : > { %v9685_v26 = vpop.permute.xlu1 %9684  ;;  %v9692_v47 = vunpack.i.h.bf16 %v9690_v52  ;;  %v9691_v49 = vunpack.i.l.bf16 %v9690_v52  ;;  %v8747_v52 = vld [vmem:[%s13174_s14 + $0xa8] sm:$0xff] }
 0x770   : > { %v9687_v1 = vunpack.i.h.bf16 %v9685_v26  ;;  %v9686_v9 = vunpack.i.l.bf16 %v9685_v26 }
 0x772   : > { %v9700_v46 = vpop.permute.xlu0 %9699  ;;  %v4856_v55 = vsel %vm13274_vm4, %v9692_v47, %v9686_v9  ;;  %v4857_v54 = vsel %vm13275_vm2, %v9686_v9, %v9687_v1  ;;  %vm13280_vm4 = vmmov %vm13278_vm0  ;;  %v8748_v47 = vld [vmem:[%s13174_s14 + $0xb0] sm:$0xff] }
 0x773   : > { %v9695_v3 = vpop.permute.xlu1 %9694  ;;  %v9702_v8 = vunpack.i.h.bf16 %v9700_v46  ;;  %v9701_v11 = vunpack.i.l.bf16 %v9700_v46 }
 0x774   : > { %v9697_v62 = vunpack.i.h.bf16 %v9695_v3  ;;  %v9696_v31 = vunpack.i.l.bf16 %v9695_v3 }
 0x775   : > { %v4861_v13 = vsel %vm13279_vm12, %v9701_v11, %v9702_v8  ;;  %vm13283_vm12 = vcmask 1047688  }
 0x776   : > { %v4859_v48 = vsel %vm13278_vm0, %v9696_v31, %v9697_v62  ;;  %vm13282_vm0 = vcmask 785408  }
 0x777   : > { %v9705_v30 = vpop.permute.xlu1 %9704  ;;  %v8965_v37 = vpack.c.bf16 %v4861_v13, %v4859_v48  ;;  %vm13284_vm2 = vmmov %vm13282_vm0 }
 0x778   : > { %v9707_v57 = vunpack.i.h.bf16 %v9705_v30  ;;  %v9706_v44 = vunpack.i.l.bf16 %v9705_v30 }
 0x77a   : > { %v4860_v42 = vsel %vm13280_vm4, %v9707_v57, %v9701_v11  ;;  %v4858_v24 = vsel %vm13281_vm11, %v9706_v44, %v9696_v31  ;;  %vm13286_vm11 = vmmov %vm13282_vm0 }
 0x77b   : > { %v8967_v4 = vpack.c.bf16 %v4860_v42, %v4858_v24  ;;  %vm13288_vm4 = vmmov %vm13283_vm12 }
 0x787   : > { %v9715_v32 = vpop.permute.xlu0 %9714 }
 0x788   : > { %v9710_v34 = vpop.permute.xlu1 %9709  ;;  %v9717_v63 = vunpack.i.h.bf16 %v9715_v32  ;;  %v9716_v16 = vunpack.i.l.bf16 %v9715_v32 }
 0x789   : > { %v9712_v5 = vunpack.i.h.bf16 %v9710_v34  ;;  %v9711_v33 = vunpack.i.l.bf16 %v9710_v34 }
 0x78b   : > { %v9725_v43 = vpop.permute.xlu0 %9724  ;;  %v5043_v18 = vsel %vm13284_vm2, %v9711_v33, %v9712_v5  ;;  %v5042_v25 = vsel %vm13286_vm11, %v9717_v63, %v9711_v33  ;;  %vm13292_vm11 = vmmov %vm13284_vm2 }
 0x78c   : > { %v9727_v39 = vunpack.i.h.bf16 %v9725_v43  ;;  %v9726_v50 = vunpack.i.l.bf16 %v9725_v43  ;;  %v11952_v0 = vpop.permute.xlu1 %9719 }
 0x78d   : > { %v9722_v31 = vunpack.i.h.bf16 %v11952_v0  ;;  %v9721_v43 = vunpack.i.l.bf16 %v11952_v0 }
 0x78e   : > { %v4854_v60 = vsel %vm13276_vm14, %v9691_v49, %v9726_v50  ;;  %v4855_v12 = vsel %vm13277_vm13, %v9726_v50, %v9727_v39  ;;  %vm13285_vm14 = vmmov %vm13282_vm0  ;;  %v8749_v39 = vld [vmem:[%s13174_s14 + $0xb8] sm:$0xff] }
 0x78f   : > { %v9730_v53 = vpop.permute.xlu0 %9729  ;;  %v8961_v38 = vpack.c.bf16 %v4857_v54, %v4855_v12  ;;  %v8963_v2 = vpack.c.bf16 %v4856_v55, %v4854_v60  ;;  %vm13287_vm13 = vmmov %vm13283_vm12  ;;  %v5045_v13 = vsel %vm13284_vm2, %v9721_v43, %v9722_v31 }
 0x790   : > { %v9732_v19 = vunpack.i.h.bf16 %v9730_v53  ;;  %v9731_v15 = vunpack.i.l.bf16 %v9730_v53  ;;  %v5516_v21 = vpop.permute.xlu1 %5515 }
 0x791   : > { %5547 = vst.msk [vmem:[#allocation2 + $0x10] sm:$0xff] %vm646_vm3, %v5516_v21  ;;  %8962 = vmatprep.subr.bf16.mxu1 %v8961_v38 }
 0x792   : > { %8964 = vmatpush1.bf16.msra.mxu1 %v8963_v2  ;;  %v5041_v58 = vsel %vm13282_vm0, %v9731_v15, %v9732_v19  ;;  %v5040_v22 = vsel %vm13285_vm14, %v9716_v16, %v9731_v15  ;;  %vm13289_vm0 = vmmov %vm13288_vm4 }
 0x793   : > { %8966 = vmatprep.subr.bf16.mxu1 %v8965_v37  ;;  %v5514_v59 = vpop.permute.xlu0 %5513  ;;  %v8969_v56 = vpack.c.bf16 %v5043_v18, %v5041_v58  ;;  %v8971_v40 = vpack.c.bf16 %v5042_v25, %v5040_v22  ;;  %vm13291_vm14 = vmmov %vm13284_vm2  ;;  %v8754_v22 = vld [vmem:[%s13174_s14 + $0xc0] sm:$0xff] }
 0x794   : > { %5545 = vst.msk [vmem:[#allocation2] sm:$0xff] %vm13283_vm12, %v5514_v59  ;;  %v5520_v7 = vpop.permute.xlu1 %5519  ;;  %v11973_v17 = vsel %vm646_vm3, %v5514_v59, %v5516_v21  ;;  %vm13290_vm12 = vmmov %vm13284_vm2 }
 0x795   : > { %5550 = vst.msk [vmem:[#allocation2 + $0x28] sm:$0xff] %vm646_vm3, %v5520_v7 }
 0x796   : > { %8968 = vmatpush1.bf16.msra.mxu1 %v8967_v4 }
 0x797   : > { %8970 = vmatprep.subr.bf16.mxu1 %v8969_v56  ;;  %v5518_v35 = vpop.permute.xlu0 %5517 }
 0x798   : > { %5548 = vst.msk [vmem:[#allocation2 + $0x18] sm:$0xff] %vm13287_vm13, %v5518_v35  ;;  %v5522_v61 = vpop.permute.xlu1 %5521  ;;  %v11976_v41 = vld [vmem:[#allocation2 + $0x10] sm:$0xff]  ;;  %v11991_v46 = vsel %vm646_vm3, %v5518_v35, %v5520_v7  ;;  %vm13293_vm13 = vcmask 916480  }
 0x799   : > { %5551 = vst.msk [vmem:[#allocation2 + $0x30] sm:$0xff] %vm13288_vm4, %v5522_v61  ;;  %8750 = vmatmul.mubr.msk.f32.vlgmr.msra.gmra.mrb[6].mxu1 %vm899_vm8, %v8746_v51  ;;  %v11982_v26 = vpack.i.bf16 %v11976_v41, %v11973_v17  ;;  %vm13294_vm4 = vmmov %vm13293_vm13 }
 0x79a   : > { %8972 = vmatpush1.bf16.msra.mxu1 %v8971_v40  ;;  %4952 = vmatprep.mubr.f32.mxu1 %v10940_v36 }
 0x79b   : > { %v5524_v3 = vpop.permute.xlu0 %5523  ;;  %9804 = vrot.lane.b32.xlu0 %v11982_v26, %s13258_s1  ;;  %v12008_v9 = vld [vmem:[#allocation2] sm:$0xff] }
 0x79c   : > { %5553 = vst.msk [vmem:[#allocation2 + $0x40] sm:$0xff] %vm646_vm3, %v5524_v3  ;;  %v5526_v30 = vpop.permute.xlu1 %5525  ;;  %v11994_v32 = vld [vmem:[#allocation2 + $0x28] sm:$0xff]  ;;  %v12027_v50 = vsel %vm646_vm3, %v5522_v61, %v5524_v3 }
 0x79d   : > { %5554 = vst.msk [vmem:[#allocation2 + $0x48] sm:$0xff] %vm13289_vm0, %v5526_v30  ;;  %8751 = vmatmul.mubr.msk.f32.gmra.mrb[8].mxu1 %vm899_vm8, %v8747_v52  ;;  %v12000_v34 = vpack.i.bf16 %v11994_v32, %v11991_v46  ;;  %vm13295_vm0 = vmmov %vm13294_vm4 }
 0x79e   : > { %4958 = vmatprep.mubr.f32.mxu1 %v10940_v36  ;;  %vm13297_vm2 = vmmov %vm13295_vm0 }
 0x79f   : > { %v5528_v1 = vpop.permute.xlu0 %5527  ;;  %9814 = vrot.lane.b32.xlu1 %v12000_v34, %s13258_s1  ;;  %v12010_v8 = vld [vmem:[#allocation2 + $0x18] sm:$0xff] }
 0x7a0   : > { %5556 = vst.msk [vmem:[#allocation2 + $0x58] sm:$0xff] %vm646_vm3, %v5528_v1  ;;  %v9740_v11 = vpop.permute.xlu1 %9739  ;;  %v12015_v62 = vpack.i.bf16 %v12010_v8, %v12008_v9  ;;  %v12046_v19 = vsel %vm646_vm3, %v5526_v30, %v5528_v1  ;;  %v12048_v24 = vld [vmem:[#allocation2 + $0x30] sm:$0xff] }
 0x7a1   : > { %v9741_v49 = vunpack.i.l.bf16 %v9740_v11  ;;  %8752 = vmatmul.mubr.msk.f32.gmra.mrb[10].mxu1 %vm899_vm8, %v8748_v47  ;;  %v9742_v44 = vunpack.i.h.bf16 %v9740_v11  ;;  %v8755_v47 = vld [vmem:[%s13174_s14 + $0xc8] sm:$0xff] }
 0x7a2   : > { %9809 = vrot.lane.b32.xlu0 %v12015_v62, %s13258_s1  ;;  %4964 = vmatprep.mubr.f32.mxu1 %v10940_v36 }
 0x7a3   : > { %v9735_v55 = vpop.permute.xlu0 %9734  ;;  %v12029_v57 = vld [vmem:[#allocation2 + $0x40] sm:$0xff]  ;;  %v5044_v48 = vsel %vm13290_vm12, %v9741_v49, %v9721_v43  ;;  %vm13296_vm12 = vmmov %vm13295_vm0 }
 0x7a4   : > { %v9737_v0 = vunpack.i.h.bf16 %v9735_v55  ;;  %v9736_v54 = vunpack.i.l.bf16 %v9735_v55  ;;  %v9750_v60 = vpop.permute.xlu1 %9749  ;;  %v12033_v12 = vpack.i.bf16 %v12029_v57, %v12027_v50  ;;  %v12038_v53 = vld [vmem:[#allocation2 + $0x48] sm:$0xff] }
 0x7a5   : > { %8753 = vmatmul.mubr.msk.f32.gmra.mrb[12].mxu1 %vm899_vm8, %v8749_v39  ;;  %v9752_v2 = vunpack.i.h.bf16 %v9750_v60  ;;  %v9751_v5 = vunpack.i.l.bf16 %v9750_v60  ;;  %v12056_v59 = vpack.i.bf16 %v12038_v53, %v12048_v24 }
 0x7a6   : > { %v5046_v38 = vsel %vm13291_vm14, %v9742_v44, %v9736_v54  ;;  %9819 = vrot.lane.b32.xlu1 %v12033_v12, %s13258_s1  ;;  %v5047_v33 = vsel %vm13292_vm11, %v9736_v54, %v9737_v0  ;;  %5132 = vmatprep.mubr.f32.mxu1 %v10940_v36  ;;  %vm13298_vm14 = vmmov %vm13295_vm0 }
 0x7a7   : > { %v9745_v15 = vpop.permute.xlu0 %9744  ;;  %v8973_v21 = vpack.c.bf16 %v5047_v33, %v5045_v13  ;;  %v8975_v42 = vpack.c.bf16 %v5046_v38, %v5044_v48  ;;  %v12050_v37 = vld [vmem:[#allocation2 + $0x58] sm:$0xff]  ;;  %v5197_v18 = vsel %vm964_vm15, %v9751_v5, %v9752_v2  ;;  %v8756_v2 = vld [vmem:[%s13174_s14 + $0xd0] sm:$0xff]  ;;  %vm13299_vm11 = vmmov %vm13295_vm0 }
 0x7a8   : > { %v9747_v58 = vunpack.i.h.bf16 %v9745_v15  ;;  %v9746_v63 = vunpack.i.l.bf16 %v9745_v15  ;;  %v12052_v16 = vpop.permute.xlu1 %5886  ;;  %v12060_v7 = vpack.i.bf16 %v12050_v37, %v12046_v19 }
 0x7a9   : > { %8974 = vmatprep.subr.bf16.mxu1 %v8973_v21  ;;  %v5894_v1 = vmul.f32 %v12052_v16, %v12008_v9  ;;  %v5897_v11 = vmul.f32 %v12052_v16, %v12010_v8 }
 0x7aa   : > { %8976 = vmatpush1.bf16.msra.mxu1 %v8975_v42  ;;  %9824 = vrot.lane.b32.xlu1 %v12056_v59, %s13258_s1  ;;  %v5195_v4 = vsel %vm964_vm15, %v9746_v63, %v9747_v58 }
 0x7ab   : > { %9829 = vrot.lane.b32.xlu0 %v12060_v7, %s13258_s1  ;;  %v9755_v56 = vpop.permute.xlu0 %9754  ;;  %v8977_v51 = vpack.c.bf16 %v5197_v18, %v5195_v4  ;;  %v9843_v58 = vpack.i.bf16 %v5897_v11, %v5894_v1  ;;  %v5900_v11 = vmul.f32 %v12052_v16, %v12048_v24 }
 0x7ac   : > { %v9757_v25 = vunpack.i.h.bf16 %v9755_v56  ;;  %v9756_v35 = vunpack.i.l.bf16 %v9755_v56  ;;  %v9760_v61 = vpop.permute.xlu1 %9759 }
 0x7ad   : > { %8978 = vmatprep.subr.bf16.mxu1 %v8977_v51  ;;  %8758 = vmatmul.mubr.msk.f32.vlgmr.msra.gmra.mrb[6].mxu1 %vm899_vm8, %v8754_v22  ;;  %v9762_v31 = vunpack.i.h.bf16 %v9760_v61  ;;  %v9761_v44 = vunpack.i.l.bf16 %v9760_v61 }
 0x7ae   : > { %v5196_v40 = vsel %vm964_vm15, %v9757_v25, %v9751_v5  ;;  %v5194_v52 = vsel %vm964_vm15, %v9756_v35, %v9746_v63  ;;  %5138 = vmatprep.mubr.f32.mxu1 %v10940_v36  ;;  %v8757_v35 = vld [vmem:[%s13174_s14 + $0xd8] sm:$0xff] }
 0x7af   : > { %v5889_v3 = vpop.permute.xlu0 %5888  ;;  %v8979_v30 = vpack.c.bf16 %v5196_v40, %v5194_v52  ;;  %v5199_v63 = vsel %vm964_vm15, %v9761_v44, %v9762_v31  ;;  %v5903_v31 = vmul.f32 %v12052_v16, %v12038_v53 }
 0x7b0   : > { %v5890_v43 = vsel %vm725_vm5, %v12052_v16, %v5889_v3  ;;  %v9770_v49 = vpop.permute.xlu1 %9769  ;;  %v5899_v39 = vmul.f32 %v5889_v3, %v11994_v32  ;;  %v5896_v55 = vmul.f32 %v5889_v3, %v11976_v41  ;;  %v5902_v52 = vmul.f32 %v5889_v3, %v12029_v57 }
 0x7b1   : > { %v9771_v0 = vunpack.i.l.bf16 %v9770_v49  ;;  %8980 = vmatpush1.bf16.msra.mxu1 %v8979_v30  ;;  %v5898_v54 = vmul.f32 %v5890_v43, %v11991_v46  ;;  %v5895_v60 = vmul.f32 %v5890_v43, %v11973_v17  ;;  %v9772_v5 = vunpack.i.h.bf16 %v9770_v49 }
 0x7b2   : > { %8759 = vmatmul.mubr.msk.f32.gmra.mrb[8].mxu1 %vm899_vm8, %v8755_v47  ;;  %v5901_v40 = vmul.f32 %v5890_v43, %v12027_v50  ;;  %v5905_v16 = vmul.f32 %v5889_v3, %v12050_v37 }
 0x7b3   : > { %v9765_v48 = vpop.permute.xlu0 %9764  ;;  %v9838_v13 = vpack.i.bf16 %v5899_v39, %v5898_v54  ;;  %v9833_v38 = vpack.i.bf16 %v5896_v55, %v5895_v60  ;;  %5144 = vmatprep.mubr.f32.mxu1 %v10940_v36  ;;  %v5198_v42 = vsel %vm964_vm15, %v9771_v0, %v9761_v44  ;;  %v5904_v55 = vmul.f32 %v5890_v43, %v12046_v19  ;;  %v8762_v60 = vld [vmem:[%s13174_s14 + $0xe0] sm:$0xff] }
 0x7b4   : > { %v9767_v33 = vunpack.i.h.bf16 %v9765_v48  ;;  %v9766_v15 = vunpack.i.l.bf16 %v9765_v48  ;;  %v9780_v21 = vpop.permute.xlu1 %9779  ;;  %v9848_v0 = vpack.i.bf16 %v5902_v52, %v5901_v40 }
 0x7b5   : > { %9839 = vrot.lane.b32.xlu1 %v9838_v13, %s13261_s5  ;;  %9834 = vrot.lane.b32.xlu0 %v9833_v38, %s13261_s5  ;;  %v9782_v18 = vunpack.i.h.bf16 %v9780_v21  ;;  %v9781_v22 = vunpack.i.l.bf16 %v9780_v21 }
 0x7b6   : > { %v5200_v4 = vsel %vm964_vm15, %v9772_v5, %v9766_v15  ;;  %8760 = vmatmul.mubr.msk.f32.gmra.mrb[10].mxu1 %vm899_vm8, %v8756_v2  ;;  %v5201_v56 = vsel %vm964_vm15, %v9766_v15, %v9767_v33  ;;  %v9858_v33 = vpack.i.bf16 %v5903_v31, %v5900_v11  ;;  %v9853_v15 = vpack.i.bf16 %v5905_v16, %v5904_v55  ;;  %v8764_v55 = vld [vmem:[%s13174_s14 + $0xf0] sm:$0xff] }
 0x7b7   : > { %v9775_v51 = vpop.permute.xlu0 %9774  ;;  %5150 = vmatprep.mubr.f32.mxu1 %v10940_v36  ;;  %v8981_v25 = vpack.c.bf16 %v5201_v56, %v5199_v63  ;;  %v8983_v61 = vpack.c.bf16 %v5200_v4, %v5198_v42  ;;  %v5383_v39 = vsel %vm1012_vm1, %v9781_v22, %v9782_v18 }
 0x7b8   : > { %v9777_v30 = vunpack.i.h.bf16 %v9775_v51  ;;  %v9776_v47 = vunpack.i.l.bf16 %v9775_v51  ;;  %v12106_v1 = vpop.permute.xlu1 %6072 }
 0x7b9   : > { %6598 = vrot.lane.b32.xlu1 %v11893_v27, %s13262_s6  ;;  %9844 = vrot.lane.b32.xlu0 %v9843_v58, %s13261_s5  ;;  %v8763_v58 = vld [vmem:[%s13174_s14 + $0xe8] sm:$0xff]  ;;  %v6080_v56 = vmul.f32 %v12106_v1, %v12008_v9 }
 0x7ba   : > { %8982 = vmatprep.subr.bf16.mxu1 %v8981_v25  ;;  %8761 = vmatmul.mubr.msk.f32.gmra.mrb[12].mxu1 %vm899_vm8, %v8757_v35  ;;  %v5381_v49 = vsel %vm1012_vm1, %v9776_v47, %v9777_v30 }
 0x7bb   : > { %8984 = vmatpush1.bf16.msra.mxu1 %v8983_v61  ;;  %v9785_v44 = vpop.permute.xlu0 %9784  ;;  %5286 = vmatprep.mubr.f32.mxu1 %v10940_v36  ;;  %v8985_v54 = vpack.c.bf16 %v5383_v39, %v5381_v49  ;;  %v6083_v61 = vmul.f32 %v12106_v1, %v12010_v8 }
 0x7bc   : > { %v9787_v48 = vunpack.i.h.bf16 %v9785_v44  ;;  %v9786_v13 = vunpack.i.l.bf16 %v9785_v44  ;;  %v9790_v38 = vpop.permute.xlu1 %9789  ;;  %v5580_v44 = vmul.f32 %v11921_v20, %v11991_v46 }
 0x7bd   : > { %9849 = vrot.lane.b32.xlu1 %v9848_v0, %s13261_s5  ;;  %6600 = vrot.lane.b32.xlu0 %v11921_v20, %s13262_s6  ;;  %v9792_v51 = vunpack.i.h.bf16 %v9790_v38  ;;  %v9791_v25 = vunpack.i.l.bf16 %v9790_v38  ;;  %v6086_v0 = vmul.f32 %v12106_v1, %v12048_v24 }
 0x7be   : > { %v5382_v43 = vsel %vm1012_vm1, %v9787_v48, %v9781_v22  ;;  %v5380_v2 = vsel %vm1012_vm1, %v9786_v13, %v9776_v47  ;;  %8986 = vmatprep.subr.bf16.mxu1 %v8985_v54  ;;  %8766 = vmatmul.mubr.msk.f32.vlgmr.msra.gmra.mrb[6].mxu1 %vm899_vm8, %v8762_v60  ;;  %v6089_v48 = vmul.f32 %v12106_v1, %v12038_v53 }
 0x7bf   : > { %v6075_v5 = vpop.permute.xlu0 %6074  ;;  %5292 = vmatprep.mubr.f32.mxu1 %v10940_v36  ;;  %v8987_v3 = vpack.c.bf16 %v5382_v43, %v5380_v2  ;;  %v5385_v60 = vsel %vm1012_vm1, %v9791_v25, %v9792_v51  ;;  %v9873_v43 = vpack.i.bf16 %v6083_v61, %v6080_v56  ;;  %v5582_v56 = vmul.f32 %v11921_v20, %v12027_v50 }
 0x7c0   : > { %v6076_v21 = vsel %vm775_vm6, %v12106_v1, %v6075_v5  ;;  %v9800_v42 = vpop.permute.xlu1 %9799  ;;  %v6085_v63 = vmul.f32 %v6075_v5, %v11994_v32  ;;  %v6082_v4 = vmul.f32 %v6075_v5, %v11976_v41  ;;  %v6088_v35 = vmul.f32 %v6075_v5, %v12029_v57 }
 0x7c1   : > { %9859 = vrot.lane.b32.xlu1 %v9858_v33, %s13261_s5  ;;  %9854 = vrot.lane.b32.xlu0 %v9853_v15, %s13261_s5  ;;  %v6084_v18 = vmul.f32 %v6076_v21, %v11991_v46  ;;  %v6081_v22 = vmul.f32 %v6076_v21, %v11973_v17  ;;  %v9801_v40 = vunpack.i.l.bf16 %v9800_v42  ;;  %v6087_v11 = vmul.f32 %v6076_v21, %v12027_v50  ;;  %v8765_v33 = vld [vmem:[%s13174_s14 + $0xf8] sm:$0xff] }
 0x7c2   : > { %8988 = vmatpush1.bf16.msra.mxu1 %v8987_v3  ;;  %v9802_v31 = vunpack.i.h.bf16 %v9800_v42  ;;  %v6090_v3 = vmul.f32 %v6076_v21, %v12046_v19  ;;  %v6091_v42 = vmul.f32 %v6075_v5, %v12050_v37  ;;  %v5578_v1 = vmul.f32 %v11921_v20, %v11973_v17 }
 0x7c3   : > { %8767 = vmatmul.mubr.msk.f32.gmra.mrb[8].mxu1 %vm899_vm8, %v8763_v58  ;;  %v9795_v52 = vpop.permute.xlu0 %9794  ;;  %v9868_v30 = vpack.i.bf16 %v6085_v63, %v6084_v18  ;;  %v9863_v47 = vpack.i.bf16 %v6082_v4, %v6081_v22  ;;  %v5384_v13 = vsel %vm1012_vm1, %v9801_v40, %v9791_v25  ;;  %v9878_v38 = vpack.i.bf16 %v6088_v35, %v6087_v11  ;;  %v8770_v18 = vld [vmem:[%s13174_s14 + $0x100] sm:$0xff]  ;;  %v8771_v40 = vld [vmem:[%s13174_s14 + $0x108] sm:$0xff]  ;;  %v8773_v11 = vld [vmem:[%s13174_s14 + $0x118] sm:$0xff] }
 0x7c4   : > { %v9797_v49 = vunpack.i.h.bf16 %v9795_v52  ;;  %v9796_v39 = vunpack.i.l.bf16 %v9795_v52  ;;  %5298 = vmatprep.mubr.f32.mxu1 %v10940_v36  ;;  %v5579_v58 = vmul.f32 %v12010_v8, %v11893_v27  ;;  %v8993_v63 = vpack.c.bf16 %v5580_v44, %v5578_v1 }
 0x7c5   : > { %9869 = vrot.lane.b32.xlu1 %v9868_v30, %s13246_s0  ;;  %9864 = vrot.lane.b32.xlu0 %v9863_v47, %s13246_s0  ;;  %v9883_v4 = vpack.i.bf16 %v6089_v48, %v6086_v0  ;;  %v5584_v21 = vmul.f32 %v11921_v20, %v12046_v19  ;;  %v9888_v5 = vpack.i.bf16 %v6091_v42, %v6090_v3  ;;  %v6413_v30 = vpop.permute.xlu1 %6412  ;;  %v5586_v48 = vld [vmem:[%s13175_s15 + $0x8] sm:$0xff]  ;;  %v5587_v3 = vld [vmem:[%s13175_s15 + $0x10] sm:$0xff] }
 0x7c6   : > { %v5386_v54 = vsel %vm1012_vm1, %v9802_v31, %v9796_v39  ;;  %v5387_v16 = vsel %vm1012_vm1, %v9796_v39, %v9797_v49  ;;  %v5577_v22 = vmul.f32 %v12008_v9, %v11893_v27  ;;  %v5583_v25 = vmul.f32 %v12038_v53, %v11893_v27 }
 0x7c7   : > { %8768 = vmatmul.mubr.msk.f32.gmra.mrb[10].mxu1 %vm899_vm8, %v8764_v55  ;;  %v8989_v2 = vpack.c.bf16 %v5387_v16, %v5385_v60  ;;  %v8991_v15 = vpack.c.bf16 %v5386_v54, %v5384_v13  ;;  %v8997_v35 = vpack.c.bf16 %v5584_v21, %v5582_v56  ;;  %v5581_v61 = vmul.f32 %v12048_v24, %v11893_v27  ;;  %v8772_v27 = vld [vmem:[%s13174_s14 + $0x110] sm:$0xff]  ;;  %v6415_v52 = vpop.permute.xlu0 %6414  ;;  %v5585_v55 = vld [vmem:[%s13175_s15] sm:$0xff] }
 0x7c8   : > { %5304 = vmatprep.mubr.f32.mxu1 %v10940_v36  ;;  %v8995_v51 = vpack.c.bf16 %v5579_v58, %v5577_v22  ;;  %v6416_v47 = vsel %vm850_vm7, %v6413_v30, %v6415_v52  ;;  %v6425_v31 = vmul.f32 %v6415_v52, %v11994_v32  ;;  %v6422_v39 = vmul.f32 %v6415_v52, %v11976_v41  ;;  %v5588_v58 = vld [vmem:[%s13175_s15 + $0x18] sm:$0xff] }
 0x7c9   : > { %9879 = vrot.lane.b32.xlu1 %v9878_v38, %s13246_s0  ;;  %9874 = vrot.lane.b32.xlu0 %v9873_v43, %s13246_s0  ;;  %v8999_v20 = vpack.c.bf16 %v5583_v25, %v5581_v61  ;;  %v6421_v49 = vmul.f32 %v6416_v47, %v11973_v17  ;;  %v6427_v44 = vmul.f32 %v6416_v47, %v12027_v50 }
 0x7ca   : > { %8990 = vmatprep.subr.bf16.mxu1 %v8989_v2  ;;  %v6428_v0 = vmul.f32 %v6415_v52, %v12029_v57  ;;  %v6420_v60 = vmul.f32 %v6413_v30, %v12008_v9  ;;  %v6423_v16 = vmul.f32 %v6413_v30, %v12010_v8  ;;  %v6426_v38 = vmul.f32 %v6413_v30, %v12048_v24 }
 0x7cb   : > { %8769 = vmatmul.mubr.msk.f32.gmra.mrb[12].mxu1 %vm899_vm8, %v8765_v33  ;;  %v9923_v54 = vpack.i.bf16 %v6422_v39, %v6421_v49  ;;  %v6429_v43 = vmul.f32 %v6413_v30, %v12038_v53  ;;  %v6430_v33 = vmul.f32 %v6416_v47, %v12046_v19 }
 0x7cc   : > { %8992 = vmatpush1.bf16.msra.mxu1 %v8991_v15  ;;  %5472 = vmatprep.mubr.f32.mxu1 %v10940_v36  ;;  %v9938_v13 = vpack.i.bf16 %v6428_v0, %v6427_v44  ;;  %v9933_v2 = vpack.i.bf16 %v6423_v16, %v6420_v60  ;;  %v6431_v15 = vmul.f32 %v6415_v52, %v12050_v37 }
 0x7cd   : > { %8994 = vmatprep.subr.bf16.mxu1 %v8993_v63  ;;  %9884 = vrot.lane.b32.xlu1 %v9883_v4, %s13246_s0  ;;  %v9948_v42 = vpack.i.bf16 %v6429_v43, %v6426_v38 }
 0x7ce   : > { %9889 = vrot.lane.b32.xlu0 %v9888_v5, %s13246_s0  ;;  %v9943_v1 = vpack.i.bf16 %v6431_v15, %v6430_v33 }
 0x7cf   : > { %8774 = vmatmul.mubr.msk.f32.vlgmr.msra.gmra.mrb[6].mxu1 %vm899_vm8, %v8770_v18 }
 0x7d0   : > { %8996 = vmatpush1.bf16.msra.mxu1 %v8995_v51  ;;  %5478 = vmatprep.mubr.f32.mxu1 %v10940_v36 }
 0x7d1   : > { %8998 = vmatprep.subr.bf16.mxu1 %v8997_v35  ;;  %9899 = vrot.lane.b32.xlu1 %v12000_v34, %s13247_s2 }
 0x7d2   : > { %9894 = vrot.lane.b32.xlu0 %v11982_v26, %s13247_s2 }
 0x7d3   : > { %8775 = vmatmul.mubr.msk.f32.gmra.mrb[8].mxu1 %vm899_vm8, %v8771_v40 }
 0x7d4   : > { %9000 = vmatpush1.bf16.msra.mxu1 %v8999_v20  ;;  %5484 = vmatprep.mubr.f32.mxu1 %v10940_v36 }
 0x7d5   : > { %6938 = vrot.lane.b32.xlu1 %v11829_v23, %s13255_s21  ;;  %v6424_v23 = vmul.f32 %v6416_v47, %v11991_v46 }
 0x7d6   : > { %9904 = vrot.lane.b32.xlu0 %v12015_v62, %s13247_s2 }
 0x7d7   : > { %8776 = vmatmul.mubr.msk.f32.gmra.mrb[10].mxu1 %vm899_vm8, %v8772_v27 }
 0x7d8   : > { %5490 = vmatprep.mubr.f32.mxu1 %v10940_v36 }
 0x7d9   : > { %9909 = vrot.lane.b32.xlu1 %v12033_v12, %s13247_s2 }
 0x7da   : > { %6940 = vrot.lane.b32.xlu0 %v11853_v45, %s13255_s21  ;;  %v9928_v45 = vpack.i.bf16 %v6425_v31, %v6424_v23 }
 0x7db   : > { %8777 = vmatmul.mubr.msk.f32.gmra.mrb[12].mxu1 %vm899_vm8, %v8773_v11 }
 0x7dc   : > { %5665 = vmatprep.mubr.f32.mxu1 %v10940_v36 }
 0x7dd   : > { %9919 = vrot.lane.b32.xlu1 %v12056_v59, %s13247_s2 }
 0x7de   : > { %9914 = vrot.lane.b32.xlu0 %v12060_v7, %s13247_s2 }
 0x7df   : > { %8778 = vmatmul.mubr.msk.f32.vlgmr.msra.gmra.mrb[6].mxu1 %vm899_vm8, %v5585_v55 }
 0x7e0   : > { %5671 = vmatprep.mubr.f32.mxu1 %v10940_v36 }
 0x7e1   : > { %9929 = vrot.lane.b32.xlu1 %v9928_v45, %s13248_s22 }
 0x7e2   : > { %9924 = vrot.lane.b32.xlu0 %v9923_v54, %s13248_s22 }
 0x7e3   : > { %8779 = vmatmul.mubr.msk.f32.gmra.mrb[8].mxu1 %vm899_vm8, %v5586_v48 }
 0x7e4   : > { %5677 = vmatprep.mubr.f32.mxu1 %v10940_v36 }
 0x7e5   : > { %9939 = vrot.lane.b32.xlu1 %v9938_v13, %s13248_s22  ;;  %v8782_v13 = vld [vmem:[%s13175_s15 + $0x20] sm:$0xff] }
 0x7e6   : > { %9934 = vrot.lane.b32.xlu0 %v9933_v2, %s13248_s22 }
 0x7e7   : > { %8780 = vmatmul.mubr.msk.f32.gmra.mrb[10].mxu1 %vm899_vm8, %v5587_v3 }
 0x7e8   : > { %5683 = vmatprep.mubr.f32.mxu1 %v10940_v36 }
 0x7e9   : > { %9949 = vrot.lane.b32.xlu1 %v9948_v42, %s13248_s22  ;;  %v8783_v42 = vld [vmem:[%s13175_s15 + $0x28] sm:$0xff] }
 0x7ea   : > { %9944 = vrot.lane.b32.xlu0 %v9943_v1, %s13248_s22 }
 0x7eb   : > { %8781 = vmatmul.mubr.msk.f32.gmra.mrb[12].mxu1 %vm899_vm8, %v5588_v58 }
 0x7ec   : > { %5843 = vmatprep.mubr.f32.mxu1 %v10940_v36 }
 0x80d   : > { %v9805_v63 = vpop.permute.xlu0 %9804 }
 0x80e   : > { %v9807_v4 = vunpack.i.h.bf16 %v9805_v63  ;;  %v9806_v21 = vunpack.i.l.bf16 %v9805_v63 }
 0x810   : > { %v5752_v51 = vsel %vm713_vm9, %v9806_v21, %v9807_v4 }
 0x811   : > { %v9815_v5 = vpop.permute.xlu1 %9814 }
 0x812   : > { %v9817_v18 = vunpack.i.h.bf16 %v9815_v5  ;;  %v9816_v22 = vunpack.i.l.bf16 %v9815_v5 }
 0x814   : > { %v9810_v56 = vpop.permute.xlu0 %9809  ;;  %v5754_v25 = vsel %vm713_vm9, %v9816_v22, %v9817_v18 }
 0x815   : > { %v9812_v35 = vunpack.i.h.bf16 %v9810_v56  ;;  %v9811_v61 = vunpack.i.l.bf16 %v9810_v56  ;;  %v9001_v40 = vpack.c.bf16 %v5754_v25, %v5752_v51 }
 0x817   : > { %v5753_v20 = vsel %vm713_vm9, %v9812_v35, %v9816_v22  ;;  %v5751_v27 = vsel %vm713_vm9, %v9811_v61, %v9806_v21  ;;  %9002 = vmatprep.subr.bf16.mxu1 %v9001_v40  ;;  %v8784_v22 = vld [vmem:[%s13175_s15 + $0x30] sm:$0xff] }
 0x818   : > { %v9820_v52 = vpop.permute.xlu1 %9819  ;;  %v9003_v30 = vpack.c.bf16 %v5753_v20, %v5751_v27 }
 0x819   : > { %v9822_v47 = vunpack.i.h.bf16 %v9820_v52  ;;  %v9821_v11 = vunpack.i.l.bf16 %v9820_v52 }
 0x81a   : > { %9004 = vmatpush1.bf16.msra.mxu1 %v9003_v30 }
 0x81b   : > { %v5756_v54 = vsel %vm713_vm9, %v9821_v11, %v9822_v47  ;;  %v8785_v47 = vld [vmem:[%s13175_s15 + $0x38] sm:$0xff] }
 0x81c   : > { %v9825_v23 = vpop.permute.xlu1 %9824 }
 0x81d   : > { %v9827_v31 = vunpack.i.h.bf16 %v9825_v23  ;;  %v9826_v49 = vunpack.i.l.bf16 %v9825_v23  ;;  %v9830_v39 = vpop.permute.xlu0 %9829 }
 0x81e   : > { %v9832_v55 = vunpack.i.h.bf16 %v9830_v39  ;;  %v9831_v45 = vunpack.i.l.bf16 %v9830_v39 }
 0x81f   : > { %v5755_v44 = vsel %vm713_vm9, %v9826_v49, %v9821_v11 }
 0x820   : > { %v5757_v0 = vsel %vm713_vm9, %v9827_v31, %v9831_v45  ;;  %v5758_v60 = vsel %vm713_vm9, %v9831_v45, %v9832_v55 }
 0x821   : > { %v9005_v16 = vpack.c.bf16 %v5758_v60, %v5756_v54  ;;  %v9007_v48 = vpack.c.bf16 %v5757_v0, %v5755_v44 }
 0x823   : > { %9006 = vmatprep.subr.bf16.mxu1 %v9005_v16 }
 0x824   : > { %9008 = vmatpush1.bf16.msra.mxu1 %v9007_v48 }
 0x827   : > { %v9840_v38 = vpop.permute.xlu1 %9839  ;;  %v9835_v43 = vpop.permute.xlu0 %9834  ;;  %8786 = vmatmul.mubr.msk.f32.vlgmr.msra.gmra.mrb[6].mxu1 %vm899_vm8, %v8782_v13 }
 0x828   : > { %v9842_v2 = vunpack.i.h.bf16 %v9840_v38  ;;  %v9841_v33 = vunpack.i.l.bf16 %v9840_v38  ;;  %v9837_v15 = vunpack.i.h.bf16 %v9835_v43  ;;  %v9836_v3 = vunpack.i.l.bf16 %v9835_v43  ;;  %5849 = vmatprep.mubr.f32.mxu1 %v10940_v36 }
 0x82a   : > { %v5948_v1 = vsel %vm764_vm10, %v9836_v3, %v9837_v15  ;;  %v5950_v58 = vsel %vm764_vm10, %v9841_v33, %v9842_v2 }
 0x82b   : > { %v6599_v63 = vpop.permute.xlu1 %6598  ;;  %v9845_v4 = vpop.permute.xlu0 %9844  ;;  %v9009_v21 = vpack.c.bf16 %v5950_v58, %v5948_v1  ;;  %8787 = vmatmul.mubr.msk.f32.gmra.mrb[8].mxu1 %vm899_vm8, %v8783_v42 }
 0x82c   : > { %v9847_v5 = vunpack.i.h.bf16 %v9845_v4  ;;  %v9846_v18 = vunpack.i.l.bf16 %v9845_v4  ;;  %5855 = vmatprep.mubr.f32.mxu1 %v10940_v36  ;;  %v6606_v40 = vmul.f32 %v6599_v63, %v12008_v9  ;;  %v6609_v30 = vmul.f32 %v6599_v63, %v12010_v8 }
 0x82d   : > { %9010 = vmatprep.subr.bf16.mxu1 %v9009_v21  ;;  %v6612_v39 = vmul.f32 %v6599_v63, %v12048_v24 }
 0x82e   : > { %v5949_v56 = vsel %vm764_vm10, %v9847_v5, %v9841_v33  ;;  %v5947_v51 = vsel %vm764_vm10, %v9846_v18, %v9836_v3  ;;  %v9963_v43 = vpack.i.bf16 %v6609_v30, %v6606_v40  ;;  %v6615_v33 = vmul.f32 %v6599_v63, %v12038_v53 }
 0x82f   : > { %v9850_v25 = vpop.permute.xlu1 %9849  ;;  %v6601_v35 = vpop.permute.xlu0 %6600  ;;  %v9011_v61 = vpack.c.bf16 %v5949_v56, %v5947_v51  ;;  %8788 = vmatmul.mubr.msk.f32.gmra.mrb[10].mxu1 %vm899_vm8, %v8784_v22 }
 0x830   : > { %v9852_v20 = vunpack.i.h.bf16 %v9850_v25  ;;  %v6602_v27 = vsel %vm899_vm8, %v6599_v63, %v6601_v35  ;;  %v6611_v52 = vmul.f32 %v6601_v35, %v11994_v32  ;;  %5861 = vmatprep.mubr.f32.mxu1 %v10940_v36  ;;  %v9851_v11 = vunpack.i.l.bf16 %v9850_v25 }
 0x831   : > { %9012 = vmatpush1.bf16.msra.mxu1 %v9011_v61  ;;  %v6610_v23 = vmul.f32 %v6602_v27, %v11991_v46  ;;  %v6607_v31 = vmul.f32 %v6602_v27, %v11973_v17  ;;  %v6608_v49 = vmul.f32 %v6601_v35, %v11976_v41  ;;  %v6613_v54 = vmul.f32 %v6602_v27, %v12027_v50 }
 0x832   : > { %v6614_v60 = vmul.f32 %v6601_v35, %v12029_v57  ;;  %v5952_v2 = vsel %vm764_vm10, %v9851_v11, %v9852_v20  ;;  %v6616_v1 = vmul.f32 %v6602_v27, %v12046_v19  ;;  %v6617_v22 = vmul.f32 %v6601_v35, %v12050_v37  ;;  %v8790_v35 = vld [vmem:[%s13175_s15 + $0x40] sm:$0xff] }
 0x833   : > { %v9860_v55 = vpop.permute.xlu1 %9859  ;;  %v9855_v45 = vpop.permute.xlu0 %9854  ;;  %v9958_v44 = vpack.i.bf16 %v6611_v52, %v6610_v23  ;;  %v9953_v0 = vpack.i.bf16 %v6608_v49, %v6607_v31  ;;  %8789 = vmatmul.mubr.msk.f32.gmra.mrb[12].mxu1 %vm899_vm8, %v8785_v47  ;;  %v9978_v52 = vpack.i.bf16 %v6615_v33, %v6612_v39  ;;  %v8792_v33 = vld [vmem:[%s13175_s15 + $0x50] sm:$0xff] }
 0x834   : > { %v9862_v16 = vunpack.i.h.bf16 %v9860_v55  ;;  %v9861_v48 = vunpack.i.l.bf16 %v9860_v55  ;;  %v9857_v13 = vunpack.i.h.bf16 %v9855_v45  ;;  %v9856_v38 = vunpack.i.l.bf16 %v9855_v45  ;;  %6039 = vmatprep.mubr.f32.mxu1 %v10940_v36 }
 0x835   : > { %9959 = vrot.lane.b32.xlu1 %v9958_v44, %s13249_s24  ;;  %9954 = vrot.lane.b32.xlu0 %v9953_v0, %s13249_s24  ;;  %v9968_v21 = vpack.i.bf16 %v6614_v60, %v6613_v54  ;;  %v9973_v30 = vpack.i.bf16 %v6617_v22, %v6616_v1  ;;  %v8791_v44 = vld [vmem:[%s13175_s15 + $0x48] sm:$0xff]  ;;  %v8793_v22 = vld [vmem:[%s13175_s15 + $0x58] sm:$0xff] }
 0x836   : > { %v5951_v15 = vsel %vm764_vm10, %v9861_v48, %v9851_v11  ;;  %v5953_v3 = vsel %vm764_vm10, %v9862_v16, %v9856_v38  ;;  %v5954_v42 = vsel %vm764_vm10, %v9856_v38, %v9857_v13 }
 0x837   : > { %v9870_v58 = vpop.permute.xlu1 %9869  ;;  %v9865_v4 = vpop.permute.xlu0 %9864  ;;  %v9013_v5 = vpack.c.bf16 %v5954_v42, %v5952_v2  ;;  %v9015_v18 = vpack.c.bf16 %v5953_v3, %v5951_v15 }
 0x838   : > { %v9872_v56 = vunpack.i.h.bf16 %v9870_v58  ;;  %v9871_v51 = vunpack.i.l.bf16 %v9870_v58  ;;  %v9867_v25 = vunpack.i.h.bf16 %v9865_v4  ;;  %v9866_v61 = vunpack.i.l.bf16 %v9865_v4 }
 0x839   : > { %9969 = vrot.lane.b32.xlu1 %v9968_v21, %s13249_s24  ;;  %9964 = vrot.lane.b32.xlu0 %v9963_v43, %s13249_s24 }
 0x83a   : > { %9014 = vmatprep.subr.bf16.mxu1 %v9013_v5  ;;  %v6134_v63 = vsel %vm13293_vm13, %v9866_v61, %v9867_v25  ;;  %v6136_v40 = vsel %vm13294_vm4, %v9871_v51, %v9872_v56  ;;  %vm13300_vm13 = vmmov %vm13295_vm0  ;;  %vm13301_vm4 = vcmask 908288  }
 0x83b   : > { %9016 = vmatpush1.bf16.msra.mxu1 %v9015_v18  ;;  %v9880_v20 = vpop.permute.xlu1 %9879  ;;  %v9875_v27 = vpop.permute.xlu0 %9874  ;;  %v9017_v47 = vpack.c.bf16 %v6136_v40, %v6134_v63 }
 0x83c   : > { %v9877_v11 = vunpack.i.h.bf16 %v9875_v27  ;;  %v9876_v23 = vunpack.i.l.bf16 %v9875_v27  ;;  %v9882_v39 = vunpack.i.h.bf16 %v9880_v20  ;;  %v9881_v55 = vunpack.i.l.bf16 %v9880_v20  ;;  %v8798_v20 = vld [vmem:[%s13175_s15 + $0x60] sm:$0xff] }
 0x83d   : > { %9979 = vrot.lane.b32.xlu1 %v9978_v52, %s13249_s24  ;;  %9974 = vrot.lane.b32.xlu0 %v9973_v30, %s13249_s24 }
 0x83e   : > { %v6135_v31 = vsel %vm13295_vm0, %v9877_v11, %v9871_v51  ;;  %v6133_v49 = vsel %vm13296_vm12, %v9876_v23, %v9866_v61  ;;  %8794 = vmatmul.mubr.msk.f32.vlgmr.msra.gmra.mrb[6].mxu1 %vm899_vm8, %v8790_v35  ;;  %9018 = vmatprep.subr.bf16.mxu1 %v9017_v47  ;;  %v6138_v15 = vsel %vm13299_vm11, %v9881_v55, %v9882_v39  ;;  %vm13302_vm0 = vmmov %vm13301_vm4 }
 0x83f   : > { %v9885_v45 = vpop.permute.xlu1 %9884  ;;  %6045 = vmatprep.mubr.f32.mxu1 %v10940_v36  ;;  %v9019_v0 = vpack.c.bf16 %v6135_v31, %v6133_v49  ;;  %vm13303_vm12 = vmmov %vm13302_vm0 }
 0x840   : > { %v9887_v54 = vunpack.i.h.bf16 %v9885_v45  ;;  %v9886_v60 = vunpack.i.l.bf16 %v9885_v45  ;;  %v9890_v16 = vpop.permute.xlu0 %9889  ;;  %vm13306_vm11 = vmmov %vm13302_vm0 }
 0x841   : > { %v9892_v48 = vunpack.i.h.bf16 %v9890_v16  ;;  %v9891_v13 = vunpack.i.l.bf16 %v9890_v16  ;;  %9989 = vrot.lane.b32.xlu1 %v12000_v34, %s13250_s25  ;;  %9984 = vrot.lane.b32.xlu0 %v11982_v26, %s13250_s25 }
 0x842   : > { %v6137_v38 = vsel %vm13297_vm2, %v9886_v60, %v9881_v55  ;;  %8795 = vmatmul.mubr.msk.f32.gmra.mrb[8].mxu1 %vm899_vm8, %v8791_v44  ;;  %vm13304_vm2 = vmmov %vm13302_vm0 }
 0x843   : > { %v6139_v43 = vsel %vm13298_vm14, %v9887_v54, %v9891_v13  ;;  %9020 = vmatpush1.bf16.msra.mxu1 %v9019_v0  ;;  %v9900_v2 = vpop.permute.xlu1 %9899  ;;  %6051 = vmatprep.mubr.f32.mxu1 %v10940_v36  ;;  %v6140_v34 = vsel %vm13300_vm13, %v9891_v13, %v9892_v48  ;;  %vm13305_vm14 = vcmask 277504   ;;  %vm13307_vm13 = vmmov %vm13302_vm0 }
 0x844   : > { %v9902_v3 = vunpack.i.h.bf16 %v9900_v2  ;;  %v9901_v26 = vunpack.i.l.bf16 %v9900_v2  ;;  %v9895_v42 = vpop.permute.xlu0 %9894  ;;  %v9021_v1 = vpack.c.bf16 %v6140_v34, %v6138_v15  ;;  %v9023_v58 = vpack.c.bf16 %v6139_v43, %v6137_v38  ;;  %v8800_v34 = vld [vmem:[%s13175_s15 + $0x70] sm:$0xff] }
 0x845   : > { %v9897_v4 = vunpack.i.h.bf16 %v9895_v42  ;;  %v9896_v21 = vunpack.i.l.bf16 %v9895_v42  ;;  %9999 = vrot.lane.b32.xlu1 %v12033_v12, %s13250_s25  ;;  %9994 = vrot.lane.b32.xlu0 %v12015_v62, %s13250_s25 }
 0x846   : > { %8796 = vmatmul.mubr.msk.f32.gmra.mrb[10].mxu1 %vm899_vm8, %v8792_v33  ;;  %9022 = vmatprep.subr.bf16.mxu1 %v9021_v1  ;;  %v6290_v5 = vsel %vm13301_vm4, %v9901_v26, %v9902_v3  ;;  %vm13308_vm4 = vmmov %vm13302_vm0 }
 0x847   : > { %9024 = vmatpush1.bf16.msra.mxu1 %v9023_v58  ;;  %v6939_v18 = vpop.permute.xlu1 %6938  ;;  %6057 = vmatprep.mubr.f32.mxu1 %v10940_v36  ;;  %v6288_v56 = vsel %vm13302_vm0, %v9896_v21, %v9897_v4 }
 0x848   : > { %v9905_v51 = vpop.permute.xlu0 %9904  ;;  %v9025_v12 = vpack.c.bf16 %v6290_v5, %v6288_v56  ;;  %v6949_v47 = vmul.f32 %v6939_v18, %v12010_v8  ;;  %v6955_v60 = vmul.f32 %v6939_v18, %v12038_v53 }
 0x849   : > { %v9907_v25 = vunpack.i.h.bf16 %v9905_v51  ;;  %v9906_v61 = vunpack.i.l.bf16 %v9905_v51  ;;  %10009 = vrot.lane.b32.xlu1 %v12056_v59, %s13250_s25  ;;  %10004 = vrot.lane.b32.xlu0 %v12060_v7, %s13250_s25  ;;  %v6946_v59 = vmul.f32 %v6939_v18, %v12008_v9 }
 0x84a   : > { %8797 = vmatmul.mubr.msk.f32.gmra.mrb[12].mxu1 %vm899_vm8, %v8793_v22  ;;  %9026 = vmatprep.subr.bf16.mxu1 %v9025_v12 }
 0x84b   : > { %v6289_v62 = vsel %vm13303_vm12, %v9907_v25, %v9901_v26  ;;  %v6287_v63 = vsel %vm13304_vm2, %v9906_v61, %v9896_v21  ;;  %v9910_v40 = vpop.permute.xlu1 %9909  ;;  %6225 = vmatprep.mubr.f32.mxu1 %v10940_v36  ;;  %vm13309_vm12 = vcmask 900096  }
 0x84c   : > { %v6941_v27 = vpop.permute.xlu0 %6940  ;;  %v9027_v52 = vpack.c.bf16 %v6289_v62, %v6287_v63  ;;  %v9912_v11 = vunpack.i.h.bf16 %v9910_v40  ;;  %v9911_v23 = vunpack.i.l.bf16 %v9910_v40  ;;  %vm13310_vm2 = vmmov %vm13309_vm12  ;;  %v7125_v40 = vld [vmem:[%s13176_s16 + $0x8] sm:$0xff] }
 0x84d   : > { %v6942_v7 = vsel %vm13305_vm14, %v6939_v18, %v6941_v27  ;;  %v6948_v30 = vmul.f32 %v6941_v27, %v11976_v41  ;;  %v6951_v35 = vmul.f32 %v6941_v27, %v11994_v32  ;;  %v6954_v39 = vmul.f32 %v6941_v27, %v12029_v57  ;;  %vm13311_vm14 = vmmov %vm13310_vm2 }
 0x84e   : > { %8802 = vmatmul.mubr.msk.f32.vlgmr.msra.gmra.mrb[6].mxu1 %vm899_vm8, %v8798_v20  ;;  %v6950_v31 = vmul.f32 %v6942_v7, %v11991_v46  ;;  %v6947_v49 = vmul.f32 %v6942_v7, %v11973_v17  ;;  %v6953_v41 = vmul.f32 %v6942_v7, %v12027_v50  ;;  %v6952_v32 = vmul.f32 %v6939_v18, %v12048_v24  ;;  %v8799_v46 = vld [vmem:[%s13175_s15 + $0x68] sm:$0xff]  ;;  %v8801_v18 = vld [vmem:[%s13175_s15 + $0x78] sm:$0xff]  ;;  %v7124_v20 = vld [vmem:[%s13176_s16] sm:$0xff] }
 0x84f   : > { %9028 = vmatpush1.bf16.msra.mxu1 %v9027_v52  ;;  %v9920_v9 = vpop.permute.xlu1 %9919  ;;  %6231 = vmatprep.mubr.f32.mxu1 %v10940_v36  ;;  %v10023_v57 = vpack.i.bf16 %v6949_v47, %v6946_v59  ;;  %v6957_v16 = vmul.f32 %v6941_v27, %v12050_v37  ;;  %v6292_v24 = vsel %vm13307_vm13, %v9911_v23, %v9912_v11  ;;  %vm13313_vm13 = vmmov %vm13310_vm2 }
 0x850   : > { %v9922_v55 = vunpack.i.h.bf16 %v9920_v9  ;;  %v9921_v8 = vunpack.i.l.bf16 %v9920_v9  ;;  %v9915_v45 = vpop.permute.xlu0 %9914  ;;  %v10018_v44 = vpack.i.bf16 %v6951_v35, %v6950_v31  ;;  %v10013_v0 = vpack.i.bf16 %v6948_v30, %v6947_v49  ;;  %v8806_v30 = vld [vmem:[%s13175_s15 + $0x80] sm:$0xff]  ;;  %v7127_v31 = vld [vmem:[%s13176_s16 + $0x18] sm:$0xff]  ;;  %v7126_v49 = vld [vmem:[%s13176_s16 + $0x10] sm:$0xff] }
 0x851   : > { %v9917_v17 = vunpack.i.h.bf16 %v9915_v45  ;;  %v9916_v54 = vunpack.i.l.bf16 %v9915_v45  ;;  %v10028_v38 = vpack.i.bf16 %v6954_v39, %v6953_v41  ;;  %v6956_v53 = vmul.f32 %v6942_v7, %v12046_v19  ;;  %v8809_v45 = vld [vmem:[%s13175_s15 + $0x98] sm:$0xff] }
 0x852   : > { %v6291_v50 = vsel %vm13306_vm11, %v9921_v8, %v9911_v23  ;;  %10019 = vrot.lane.b32.xlu1 %v10018_v44, %s13252_s29  ;;  %10014 = vrot.lane.b32.xlu0 %v10013_v0, %s13252_s29  ;;  %v10038_v21 = vpack.i.bf16 %v6955_v60, %v6952_v32  ;;  %vm13312_vm11 = vmmov %vm13310_vm2  ;;  %v8808_v8 = vld [vmem:[%s13175_s15 + $0x90] sm:$0xff]  ;;  %v8814_v44 = vld [vmem:[%s13175_s15 + $0xa0] sm:$0xff] }
 0x853   : > { %v6293_v48 = vsel %vm13308_vm4, %v9922_v55, %v9916_v54  ;;  %8803 = vmatmul.mubr.msk.f32.gmra.mrb[8].mxu1 %vm899_vm8, %v8799_v46  ;;  %v9930_v13 = vpop.permute.xlu1 %9929  ;;  %v6294_v43 = vsel %vm13302_vm0, %v9916_v54, %v9917_v17  ;;  %v10033_v5 = vpack.i.bf16 %v6957_v16, %v6956_v53  ;;  %vm13314_vm4 = vmmov %vm13310_vm2  ;;  %v8807_v55 = vld [vmem:[%s13175_s15 + $0x88] sm:$0xff]  ;;  %v8816_v46 = vld [vmem:[%s13175_s15 + $0xb0] sm:$0xff] }
 0x854   : > { %v9031_v2 = vpack.c.bf16 %v6293_v48, %v6291_v50  ;;  %v9932_v37 = vunpack.i.h.bf16 %v9930_v13  ;;  %v9931_v33 = vunpack.i.l.bf16 %v9930_v13  ;;  %v9925_v15 = vpop.permute.xlu0 %9924  ;;  %6237 = vmatprep.mubr.f32.mxu1 %v10940_v36  ;;  %v9029_v3 = vpack.c.bf16 %v6294_v43, %v6292_v24  ;;  %vm13315_vm0 = vmmov %vm13310_vm2  ;;  %v8815_v0 = vld [vmem:[%s13175_s15 + $0xa8] sm:$0xff]  ;;  %v8817_v17 = vld [vmem:[%s13175_s15 + $0xb8] sm:$0xff] }
 0x855   : > { %v9927_v26 = vunpack.i.h.bf16 %v9925_v15  ;;  %v9926_v42 = vunpack.i.l.bf16 %v9925_v15 }
 0x856   : > { %10029 = vrot.lane.b32.xlu1 %v10028_v38, %s13252_s29  ;;  %10024 = vrot.lane.b32.xlu0 %v10023_v57, %s13252_s29  ;;  %v6476_v1 = vsel %vm13309_vm12, %v9931_v33, %v9932_v37  ;;  %vm13316_vm12 = vmmov %vm13315_vm0 }
 0x857   : > { %8804 = vmatmul.mubr.msk.f32.gmra.mrb[10].mxu1 %vm899_vm8, %v8800_v34  ;;  %9030 = vmatprep.subr.bf16.mxu1 %v9029_v3  ;;  %v9940_v19 = vpop.permute.xlu1 %9939  ;;  %v6474_v58 = vsel %vm13310_vm2, %v9926_v42, %v9927_v26  ;;  %vm13317_vm2 = vcmask 785408  }
 0x858   : > { %9032 = vmatpush1.bf16.msra.mxu1 %v9031_v2  ;;  %v9935_v4 = vpop.permute.xlu0 %9934  ;;  %6243 = vmatprep.mubr.f32.mxu1 %v10940_v36  ;;  %v9033_v22 = vpack.c.bf16 %v6476_v1, %v6474_v58  ;;  %v9942_v12 = vunpack.i.h.bf16 %v9940_v19  ;;  %v9941_v25 = vunpack.i.l.bf16 %v9940_v19 }
 0x859   : > { %v9937_v56 = vunpack.i.h.bf16 %v9935_v4  ;;  %v9936_v51 = vunpack.i.l.bf16 %v9935_v4 }
 0x85a   : > { %10039 = vrot.lane.b32.xlu1 %v10038_v21, %s13252_s29  ;;  %10034 = vrot.lane.b32.xlu0 %v10033_v5, %s13252_s29  ;;  %v6478_v39 = vsel %vm13315_vm0, %v9941_v25, %v9942_v12  ;;  %vm13322_vm0 = vmmov %vm13317_vm2 }
 0x85b   : > { %v6475_v61 = vsel %vm13311_vm14, %v9937_v56, %v9931_v33  ;;  %v6473_v62 = vsel %vm13312_vm11, %v9936_v51, %v9926_v42  ;;  %8805 = vmatmul.mubr.msk.f32.gmra.mrb[12].mxu1 %vm899_vm8, %v8801_v18  ;;  %9034 = vmatprep.subr.bf16.mxu1 %v9033_v22  ;;  %v9950_v63 = vpop.permute.xlu1 %9949  ;;  %vm13318_vm14 = vmmov %vm13317_vm2 }
 0x85c   : > { %v9035_v27 = vpack.c.bf16 %v6475_v61, %v6473_v62  ;;  %v9952_v52 = vunpack.i.h.bf16 %v9950_v63  ;;  %v9951_v59 = vunpack.i.l.bf16 %v9950_v63  ;;  %v9945_v7 = vpop.permute.xlu0 %9944  ;;  %6379 = vmatprep.mubr.f32.mxu1 %v10940_v36  ;;  %vm13319_vm11 = vmmov %vm13317_vm2 }
 0x85d   : > { %v9947_v35 = vunpack.i.h.bf16 %v9945_v7  ;;  %v9946_v47 = vunpack.i.l.bf16 %v9945_v7 }
 0x85e   : > { %v6477_v11 = vsel %vm13313_vm13, %v9951_v59, %v9941_v25  ;;  %7135 = vperm.xlu1 %9442, %v7125_v40   ;;  %7130 = vperm.xlu0 %9441, %v7124_v20   ;;  %vm13320_vm13 = vmmov %vm13317_vm2 }
 0x85f   : > { %v6479_v23 = vsel %vm13314_vm4, %v9952_v52, %v9946_v47  ;;  %8810 = vmatmul.mubr.msk.f32.vlgmr.msra.gmra.mrb[6].mxu1 %vm899_vm8, %v8806_v30  ;;  %v6480_v9 = vsel %vm13316_vm12, %v9946_v47, %v9947_v35  ;;  %vm13321_vm4 = vmmov %vm13317_vm2 }
 0x860   : > { %v9039_v41 = vpack.c.bf16 %v6479_v23, %v6477_v11  ;;  %9036 = vmatpush1.bf16.msra.mxu1 %v9035_v27  ;;  %v9037_v32 = vpack.c.bf16 %v6480_v9, %v6478_v39  ;;  %6385 = vmatprep.mubr.f32.mxu1 %v10940_v36  ;;  %vm13323_vm12 = vmmov %vm13322_vm0  ;;  %v8822_v27 = vld [vmem:[%s13175_s15 + $0xc0] sm:$0xff]  ;;  %v8823_v9 = vld [vmem:[%s13175_s15 + $0xc8] sm:$0xff] }
 0x862   : > { %7145 = vperm.xlu1 %9442, %v7127_v31   ;;  %7140 = vperm.xlu0 %9441, %v7126_v49  }
 0x863   : > { %9038 = vmatprep.subr.bf16.mxu1 %v9037_v32  ;;  %8811 = vmatmul.mubr.msk.f32.gmra.mrb[8].mxu1 %vm899_vm8, %v8807_v55 }
 0x864   : > { %9040 = vmatpush1.bf16.msra.mxu1 %v9039_v41  ;;  %6391 = vmatprep.mubr.f32.mxu1 %v10940_v36 }
 0x867   : > { %8812 = vmatmul.mubr.msk.f32.gmra.mrb[10].mxu1 %vm899_vm8, %v8808_v8 }
 0x868   : > { %6397 = vmatprep.mubr.f32.mxu1 %v10940_v36 }
 0x86b   : > { %8813 = vmatmul.mubr.msk.f32.gmra.mrb[12].mxu1 %vm899_vm8, %v8809_v45 }
 0x86c   : > { %6565 = vmatprep.mubr.f32.mxu1 %v10940_v36 }
 0x86f   : > { %8818 = vmatmul.mubr.msk.f32.vlgmr.msra.gmra.mrb[6].mxu1 %vm899_vm8, %v8814_v44 }
 0x870   : > { %6571 = vmatprep.mubr.f32.mxu1 %v10940_v36 }
 0x873   : > { %8819 = vmatmul.mubr.msk.f32.gmra.mrb[8].mxu1 %vm899_vm8, %v8815_v0 }
 0x874   : > { %6577 = vmatprep.mubr.f32.mxu1 %v10940_v36 }
 0x877   : > { %8820 = vmatmul.mubr.msk.f32.gmra.mrb[10].mxu1 %vm899_vm8, %v8816_v46 }
 0x878   : > { %6583 = vmatprep.mubr.f32.mxu1 %v10940_v36 }
 0x87b   : > { %8821 = vmatmul.mubr.msk.f32.gmra.mrb[12].mxu1 %vm899_vm8, %v8817_v17 }
 0x87c   : > { %6751 = vmatprep.mubr.f32.mxu1 %v10940_v36 }
 0x8a7   : > { %v9960_v54 = vpop.permute.xlu1 %9959  ;;  %v9955_v57 = vpop.permute.xlu0 %9954 }
 0x8a8   : > { %v9962_v60 = vunpack.i.h.bf16 %v9960_v54  ;;  %v9961_v16 = vunpack.i.l.bf16 %v9960_v54  ;;  %v9957_v50 = vunpack.i.h.bf16 %v9955_v57  ;;  %v9956_v24 = vunpack.i.l.bf16 %v9955_v57  ;;  %v8824_v57 = vld [vmem:[%s13175_s15 + $0xd0] sm:$0xff] }
 0x8aa   : > { %v6660_v48 = vsel %vm13317_vm2, %v9956_v24, %v9957_v50  ;;  %v6662_v13 = vsel %vm13318_vm14, %v9961_v16, %v9962_v60  ;;  %vm13324_vm2 = vmmov %vm13322_vm0  ;;  %vm13325_vm14 = vcmask 1047688  }
 0x8ab   : > { %v9970_v38 = vpop.permute.xlu1 %9969  ;;  %v9965_v43 = vpop.permute.xlu0 %9964  ;;  %v9041_v53 = vpack.c.bf16 %v6662_v13, %v6660_v48 }
 0x8ac   : > { %v9967_v2 = vunpack.i.h.bf16 %v9965_v43  ;;  %v9966_v37 = vunpack.i.l.bf16 %v9965_v43  ;;  %v9972_v33 = vunpack.i.h.bf16 %v9970_v38  ;;  %v9971_v15 = vunpack.i.l.bf16 %v9970_v38 }
 0x8ad   : > { %9042 = vmatprep.subr.bf16.mxu1 %v9041_v53 }
 0x8ae   : > { %v6661_v34 = vsel %vm13319_vm11, %v9967_v2, %v9961_v16  ;;  %v6659_v3 = vsel %vm13320_vm13, %v9966_v37, %v9956_v24  ;;  %v6664_v22 = vsel %vm13323_vm12, %v9971_v15, %v9972_v33  ;;  %v8825_v24 = vld [vmem:[%s13175_s15 + $0xd8] sm:$0xff]  ;;  %v8830_v37 = vld [vmem:[%s13175_s15 + $0xe0] sm:$0xff]  ;;  %vm13326_vm11 = vmmov %vm13325_vm14 }
 0x8af   : > { %v9043_v26 = vpack.c.bf16 %v6661_v34, %v6659_v3  ;;  %v9980_v42 = vpop.permute.xlu1 %9979  ;;  %v9975_v1 = vpop.permute.xlu0 %9974  ;;  %vm13327_vm13 = vmmov %vm13326_vm11 }
 0x8b0   : > { %v9982_v19 = vunpack.i.h.bf16 %v9980_v42  ;;  %v9981_v58 = vunpack.i.l.bf16 %v9980_v42  ;;  %v9977_v4 = vunpack.i.h.bf16 %v9975_v1  ;;  %v9976_v21 = vunpack.i.l.bf16 %v9975_v1 }
 0x8b1   : > { %9044 = vmatpush1.bf16.msra.mxu1 %v9043_v26 }
 0x8b2   : > { %v6663_v5 = vsel %vm13321_vm4, %v9981_v58, %v9971_v15  ;;  %v6665_v18 = vsel %vm13322_vm0, %v9982_v19, %v9976_v21  ;;  %v6666_v56 = vsel %vm13324_vm2, %v9976_v21, %v9977_v4  ;;  %v8831_v19 = vld [vmem:[%s13175_s15 + $0xe8] sm:$0xff]  ;;  %vm13328_vm4 = vmmov %vm13326_vm11 }
 0x8b3   : > { %v9047_v51 = vpack.c.bf16 %v6665_v18, %v6663_v5  ;;  %v9990_v12 = vpop.permute.xlu1 %9989  ;;  %v9985_v25 = vpop.permute.xlu0 %9984  ;;  %v9045_v61 = vpack.c.bf16 %v6666_v56, %v6664_v22 }
 0x8b4   : > { %v9992_v62 = vunpack.i.h.bf16 %v9990_v12  ;;  %v9991_v63 = vunpack.i.l.bf16 %v9990_v12  ;;  %v9987_v40 = vunpack.i.h.bf16 %v9985_v25  ;;  %v9986_v20 = vunpack.i.l.bf16 %v9985_v25 }
 0x8b5   : > { %9046 = vmatprep.subr.bf16.mxu1 %v9045_v61 }
 0x8b6   : > { %9048 = vmatpush1.bf16.msra.mxu1 %v9047_v51  ;;  %v6814_v52 = vsel %vm964_vm15, %v9986_v20, %v9987_v40  ;;  %v6816_v59 = vsel %vm964_vm15, %v9991_v63, %v9992_v62  ;;  %v8832_v62 = vld [vmem:[%s13175_s15 + $0xf0] sm:$0xff] }
 0x8b7   : > { %v10000_v7 = vpop.permute.xlu1 %9999  ;;  %v9995_v30 = vpop.permute.xlu0 %9994  ;;  %v9049_v35 = vpack.c.bf16 %v6816_v59, %v6814_v52 }
 0x8b8   : > { %v9997_v47 = vunpack.i.h.bf16 %v9995_v30  ;;  %v9996_v11 = vunpack.i.l.bf16 %v9995_v30  ;;  %v10002_v23 = vunpack.i.h.bf16 %v10000_v7  ;;  %v10001_v31 = vunpack.i.l.bf16 %v10000_v7  ;;  %v8833_v7 = vld [vmem:[%s13175_s15 + $0xf8] sm:$0xff]  ;;  %v8838_v30 = vld [vmem:[%s13175_s15 + $0x100] sm:$0xff] }
 0x8b9   : > { %8826 = vmatmul.mubr.msk.f32.vlgmr.msra.gmra.mrb[6].mxu1 %vm899_vm8, %v8822_v27  ;;  %9050 = vmatprep.subr.bf16.mxu1 %v9049_v35  ;;  %v8839_v35 = vld [vmem:[%s13175_s15 + $0x108] sm:$0xff] }
 0x8ba   : > { %v6815_v49 = vsel %vm964_vm15, %v9997_v47, %v9991_v63  ;;  %v6813_v39 = vsel %vm964_vm15, %v9996_v11, %v9986_v20  ;;  %6757 = vmatprep.mubr.f32.mxu1 %v10940_v36  ;;  %v6818_v46 = vsel %vm964_vm15, %v10001_v31, %v10002_v23  ;;  %v8840_v47 = vld [vmem:[%s13175_s15 + $0x110] sm:$0xff]  ;;  %v8841_v11 = vld [vmem:[%s13175_s15 + $0x118] sm:$0xff] }
 0x8bb   : > { %v9051_v41 = vpack.c.bf16 %v6815_v49, %v6813_v39  ;;  %v10010_v32 = vpop.permute.xlu1 %10009  ;;  %v10005_v55 = vpop.permute.xlu0 %10004 }
 0x8bc   : > { %v10012_v8 = vunpack.i.h.bf16 %v10010_v32  ;;  %v10011_v45 = vunpack.i.l.bf16 %v10010_v32  ;;  %v10007_v44 = vunpack.i.h.bf16 %v10005_v55  ;;  %v10006_v0 = vunpack.i.l.bf16 %v10005_v55 }
 0x8bd   : > { %8827 = vmatmul.mubr.msk.f32.gmra.mrb[8].mxu1 %vm899_vm8, %v8823_v9 }
 0x8be   : > { %v6817_v17 = vsel %vm964_vm15, %v10011_v45, %v10001_v31  ;;  %v6819_v54 = vsel %vm964_vm15, %v10012_v8, %v10006_v0  ;;  %9052 = vmatpush1.bf16.msra.mxu1 %v9051_v41  ;;  %6763 = vmatprep.mubr.f32.mxu1 %v10940_v36  ;;  %v6820_v60 = vsel %vm964_vm15, %v10006_v0, %v10007_v44 }
 0x8bf   : > { %v9055_v16 = vpack.c.bf16 %v6819_v54, %v6817_v17  ;;  %v9053_v50 = vpack.c.bf16 %v6820_v60, %v6818_v46 }
 0x8c1   : > { %8828 = vmatmul.mubr.msk.f32.gmra.mrb[10].mxu1 %vm899_vm8, %v8824_v57  ;;  %9054 = vmatprep.subr.bf16.mxu1 %v9053_v50 }
 0x8c2   : > { %9056 = vmatpush1.bf16.msra.mxu1 %v9055_v16  ;;  %6769 = vmatprep.mubr.f32.mxu1 %v10940_v36 }
 0x8c4   : > { %v10020_v48 = vpop.permute.xlu1 %10019  ;;  %v10015_v13 = vpop.permute.xlu0 %10014 }
 0x8c5   : > { %v10022_v38 = vunpack.i.h.bf16 %v10020_v48  ;;  %v10021_v43 = vunpack.i.l.bf16 %v10020_v48  ;;  %v10017_v53 = vunpack.i.h.bf16 %v10015_v13  ;;  %v10016_v2 = vunpack.i.l.bf16 %v10015_v13  ;;  %8829 = vmatmul.mubr.msk.f32.gmra.mrb[12].mxu1 %vm899_vm8, %v8825_v24 }
 0x8c6   : > { %6905 = vmatprep.mubr.f32.mxu1 %v10940_v36 }
 0x8c7   : > { %v7000_v33 = vsel %vm1012_vm1, %v10016_v2, %v10017_v53  ;;  %v7002_v15 = vsel %vm1012_vm1, %v10021_v43, %v10022_v38 }
 0x8c8   : > { %v10030_v34 = vpop.permute.xlu1 %10029  ;;  %v10025_v3 = vpop.permute.xlu0 %10024  ;;  %v9057_v26 = vpack.c.bf16 %v7002_v15, %v7000_v33 }
 0x8c9   : > { %v10027_v42 = vunpack.i.h.bf16 %v10025_v3  ;;  %v10026_v1 = vunpack.i.l.bf16 %v10025_v3  ;;  %8834 = vmatmul.mubr.msk.f32.vlgmr.msra.gmra.mrb[6].mxu1 %vm899_vm8, %v8830_v37  ;;  %v10032_v58 = vunpack.i.h.bf16 %v10030_v34  ;;  %v10031_v4 = vunpack.i.l.bf16 %v10030_v34  ;;  %v7451_v37 = vld [vmem:[%s13163_s3] sm:$0x3] }
 0x8ca   : > { %9058 = vmatprep.subr.bf16.mxu1 %v9057_v26  ;;  %6911 = vmatprep.mubr.f32.mxu1 %v10940_v36  ;;  %v7456_v34 = vrot.slane %v7451_v37, %v10579_v28  ;;  %v7460_v3 = vrot.slane %v7451_v37, %v10581_v29  ;;  %v7224_v26 = vld [vmem:[%s13241_s26] sm:$0x3] }
 0x8cb   : > { %v7001_v21 = vsel %vm1012_vm1, %v10027_v42, %v10021_v43  ;;  %v6999_v5 = vsel %vm1012_vm1, %v10026_v1, %v10016_v2  ;;  %v7004_v20 = vsel %vm1012_vm1, %v10031_v4, %v10032_v58  ;;  %v12570_v42 = vrot.slane %v7224_v26, %v10579_v28 }
 0x8cc   : > { %v9059_v18 = vpack.c.bf16 %v7001_v21, %v6999_v5  ;;  %v10040_v22 = vpop.permute.xlu1 %10039  ;;  %v10035_v56 = vpop.permute.xlu0 %10034  ;;  %v7233_v1 = vrot.slane %v7224_v26, %v10581_v29 }
 0x8cd   : > { %v10042_v51 = vunpack.i.h.bf16 %v10040_v22  ;;  %v10041_v12 = vunpack.i.l.bf16 %v10040_v22  ;;  %v10037_v25 = vunpack.i.h.bf16 %v10035_v56  ;;  %v10036_v61 = vunpack.i.l.bf16 %v10035_v56  ;;  %8835 = vmatmul.mubr.msk.f32.gmra.mrb[8].mxu1 %vm899_vm8, %v8831_v19 }
 0x8ce   : > { %9060 = vmatpush1.bf16.msra.mxu1 %v9059_v18  ;;  %6917 = vmatprep.mubr.f32.mxu1 %v10940_v36 }
 0x8cf   : > { %v7003_v63 = vsel %vm1012_vm1, %v10041_v12, %v10031_v4  ;;  %v7005_v40 = vsel %vm1012_vm1, %v10042_v51, %v10036_v61  ;;  %v7006_v27 = vsel %vm1012_vm1, %v10036_v61, %v10037_v25 }
 0x8d0   : > { %v9063_v52 = vpack.c.bf16 %v7005_v40, %v7003_v63  ;;  %v9061_v59 = vpack.c.bf16 %v7006_v27, %v7004_v20 }
 0x8d1   : > { %8836 = vmatmul.mubr.msk.f32.gmra.mrb[10].mxu1 %vm899_vm8, %v8832_v62 }
 0x8d2   : > { %9062 = vmatprep.subr.bf16.mxu1 %v9061_v59  ;;  %6923 = vmatprep.mubr.f32.mxu1 %v10940_v36 }
 0x8d3   : > { %9064 = vmatpush1.bf16.msra.mxu1 %v9063_v52 }
 0x8d5   : > { %8837 = vmatmul.mubr.msk.f32.gmra.mrb[12].mxu1 %vm899_vm8, %v8833_v7 }
 0x8d6   : > { %7091 = vmatprep.mubr.f32.mxu1 %v10940_v36 }
 0x8d9   : > { %8842 = vmatmul.mubr.msk.f32.vlgmr.msra.gmra.mrb[6].mxu1 %vm899_vm8, %v8838_v30 }
 0x8da   : > { %7097 = vmatprep.mubr.f32.mxu1 %v10940_v36 }
 0x8dd   : > { %8843 = vmatmul.mubr.msk.f32.gmra.mrb[8].mxu1 %vm899_vm8, %v8839_v35  ;;  %v7131_v23 = vpop.permute.xlu0 %7130  ;;  %v7136_v32 = vpop.permute.xlu1 %7135 }
 0x8de   : > { %7103 = vmatprep.mubr.f32.mxu1 %v10940_v36 }
 0x8e1   : > { %8844 = vmatmul.mubr.msk.f32.gmra.mrb[10].mxu1 %vm899_vm8, %v8840_v47  ;;  %v7141_v17 = vpop.permute.xlu0 %7140  ;;  %v7146_v48 = vpop.permute.xlu1 %7145 }
 0x8e2   : > { %7109 = vmatprep.mubr.f32.mxu1 %v10940_v36 }
 0x8e5   : > { %8845 = vmatmul.mubr.msk.f32.gmra.mrb[12].mxu1 %vm899_vm8, %v8841_v11 }
 0x9ac   : > { %v7093_v31 = vpop.f32.mrb[6].mxu1 }
 0x9ad   : > { %v7148_v49 = vadd.f32 %v7131_v23, %v7093_v31  ;;  %v7095_v39 = vpop.f32.mrb[7].mxu1 }
 0x9ae   : > { %v7149_v9 = vadd.f32 %v7131_v23, %v7095_v39 }
 0x9af   : > { %v7156_v41 = vmax.f32 %v7148_v49, 0.0 }
 0x9b0   : > { %v7157_v55 = vmax.f32 %v7149_v9, 0.0  ;;  %v7099_v8 = vpop.f32.mrb[8].mxu1 }
 0x9b1   : > { %v7150_v45 = vadd.f32 %v7136_v32, %v7099_v8  ;;  %7172 = vrot.lane.b32.xlu0 %v7156_v41, %s13269_s10  ;;  %v7101_v44 = vpop.f32.mrb[9].mxu1 }
 0x9b2   : > { %v7151_v0 = vadd.f32 %v7136_v32, %v7101_v44  ;;  %7174 = vrot.lane.b32.xlu1 %v7157_v55, %s13269_s10 }
 0x9b3   : > { %v7158_v46 = vmax.f32 %v7150_v45, 0.0 }
 0x9b4   : > { %v7159_v54 = vmax.f32 %v7151_v0, 0.0  ;;  %v7105_v57 = vpop.f32.mrb[10].mxu1 }
 0x9b5   : > { %v7152_v60 = vadd.f32 %v7141_v17, %v7105_v57  ;;  %7176 = vrot.lane.b32.xlu0 %v7158_v46, %s13269_s10  ;;  %v7107_v16 = vpop.f32.mrb[11].mxu1 }
 0x9b6   : > { %v7153_v50 = vadd.f32 %v7141_v17, %v7107_v16  ;;  %7178 = vrot.lane.b32.xlu1 %v7159_v54, %s13269_s10 }
 0x9b7   : > { %v7160_v24 = vmax.f32 %v7152_v60, 0.0 }
 0x9b8   : > { %v7161_v13 = vmax.f32 %v7153_v50, 0.0  ;;  %v7111_v38 = vpop.f32.mrb[12].mxu1 }
 0x9b9   : > { %v7154_v43 = vadd.f32 %v7146_v48, %v7111_v38  ;;  %7180 = vrot.lane.b32.xlu0 %v7160_v24, %s13269_s10  ;;  %v7113_v53 = vpop.f32.mrb[13].mxu1 }
 0x9ba   : > { %v7155_v2 = vadd.f32 %v7146_v48, %v7113_v53  ;;  %7182 = vrot.lane.b32.xlu1 %v7161_v13, %s13269_s10 }
 0x9bb   : > { %v7162_v33 = vmax.f32 %v7154_v43, 0.0 }
 0x9bc   : > { %v7163_v15 = vmax.f32 %v7155_v2, 0.0 }
 0x9bd   : > { %7184 = vrot.lane.b32.xlu0 %v7162_v33, %s13269_s10 }
 0x9be   : > { %7186 = vrot.lane.b32.xlu1 %v7163_v15, %s13269_s10 }
 0x9c1   : > { %7461 = vrot.lane.b32.xlu0 %v7456_v34, %s13256_s30 }
 0x9c2   : > { %7463 = vrot.lane.b32.xlu1 %v7460_v3, %s13256_s30 }
 0x9c5   : > { %7611 = vrot.lane.b32.xlu0 %v12570_v42, %s13257_s20 }
 0x9c6   : > { %7613 = vrot.lane.b32.xlu1 %v7233_v1, %s13257_s20 }
 0x9c9   : > { %7879 = vrot.lane.b32.xlu0 %v7456_v34, %s13260_s19 }
 0x9ca   : > { %7881 = vrot.lane.b32.xlu1 %v7460_v3, %s13260_s19 }
 0x9cd   : > { %8029 = vrot.lane.b32.xlu0 %v12570_v42, %s13262_s6 }
 0x9ce   : > { %8031 = vrot.lane.b32.xlu1 %v7233_v1, %s13262_s6 }
 0x9d1   : > { %8299 = vrot.lane.b32.xlu0 %v7460_v3, %s13255_s21 }
 0x9d2   : > { %8297 = vrot.lane.b32.xlu1 %v7456_v34, %s13255_s21 }
 0xa23   : > { %v7173_v19 = vpop.permute.xlu0 %7172 }
 0xa24   : > { %7204 = vst.msk [vmem:[#allocation2] sm:$0xff] %vm13325_vm14, %v7173_v19  ;;  %v7175_v58 = vpop.permute.xlu1 %7174  ;;  %vm13347_vm14 = vcmask 908288  }
 0xa25   : > { %v12586_v4 = vsel %vm646_vm3, %v7173_v19, %v7175_v58  ;;  %7206 = vst.msk [vmem:[#allocation2 + $0x10] sm:$0xff] %vm646_vm3, %v7175_v58 }
 0xa26   : > { %7205 = vst [vmem:[#allocation2 + $0x8] sm:$0xff] %v12586_v4  ;;  %v12597_v22 = vmul.f32 %v7233_v1, %v12586_v4 }
 0xa27   : > { %v7177_v21 = vpop.permute.xlu0 %7176 }
 0xa28   : > { %7207 = vst.msk [vmem:[#allocation2 + $0x18] sm:$0xff] %vm13326_vm11, %v7177_v21  ;;  %v7179_v5 = vpop.permute.xlu1 %7178  ;;  %vm13348_vm11 = vmmov %vm13347_vm14 }
 0xa29   : > { %v12592_v18 = vsel %vm646_vm3, %v7177_v21, %v7179_v5  ;;  %7209 = vst.msk [vmem:[#allocation2 + $0x28] sm:$0xff] %vm646_vm3, %v7179_v5 }
 0xa2a   : > { %7208 = vst [vmem:[#allocation2 + $0x20] sm:$0xff] %v12592_v18  ;;  %v12600_v56 = vmul.f32 %v7233_v1, %v12592_v18 }
 0xa2b   : > { %v7181_v51 = vpop.permute.xlu0 %7180  ;;  %v12615_v40 = vld [vmem:[#allocation2] sm:$0xff] }
 0xa2c   : > { %7210 = vst.msk [vmem:[#allocation2 + $0x30] sm:$0xff] %vm13327_vm13, %v7181_v51  ;;  %v7183_v12 = vpop.permute.xlu1 %7182  ;;  %v12603_v25 = vld [vmem:[#allocation2 + $0x10] sm:$0xff]  ;;  %v12630_v30 = vmul.f32 %v12570_v42, %v12615_v40  ;;  %vm13349_vm13 = vmmov %vm13348_vm11 }
 0xa2d   : > { %v12608_v62 = vsel %vm646_vm3, %v7181_v51, %v7183_v12  ;;  %7212 = vst.msk [vmem:[#allocation2 + $0x40] sm:$0xff] %vm646_vm3, %v7183_v12  ;;  %v12613_v63 = vpack.i.bf16 %v12603_v25, %v12586_v4 }
 0xa2e   : > { %v12647_v31 = vmul.f32 %v7233_v1, %v12608_v62 }
 0xa2f   : > { %v7185_v20 = vpop.permute.xlu0 %7184  ;;  %10044 = vrot.lane.b32.xlu0 %v12613_v63, %s13258_s1  ;;  %v12619_v27 = vld [vmem:[#allocation2 + $0x18] sm:$0xff] }
 0xa30   : > { %7213 = vst.msk [vmem:[#allocation2 + $0x48] sm:$0xff] %vm13328_vm4, %v7185_v20  ;;  %v7187_v52 = vpop.permute.xlu1 %7186  ;;  %v12622_v59 = vld [vmem:[#allocation2 + $0x28] sm:$0xff]  ;;  %v12626_v7 = vpack.i.bf16 %v12619_v27, %v12615_v40  ;;  %v12634_v35 = vmul.f32 %v12570_v42, %v12619_v27  ;;  %vm13350_vm4 = vmmov %vm13348_vm11 }
 0xa31   : > { %v12637_v47 = vsel %vm646_vm3, %v7185_v20, %v7187_v52  ;;  %7215 = vst.msk [vmem:[#allocation2 + $0x58] sm:$0xff] %vm646_vm3, %v7187_v52  ;;  %v12642_v11 = vpack.i.bf16 %v12622_v59, %v12592_v18  ;;  %vm13329_vm3 = vcmask 277504  }
 0xa32   : > { %v12650_v49 = vmul.f32 %v7233_v1, %v12637_v47 }
 0xa33   : > { %v12652_v39 = vpop.permute.xlu0 %7461  ;;  %10049 = vrot.lane.b32.xlu0 %v12613_v63, %s13247_s2  ;;  %10069 = vrot.lane.b32.xlu1 %v12642_v11, %s13258_s1  ;;  %v12726_v21 = vld [vmem:[#allocation2 + $0x30] sm:$0xff] }
 0xa34   : > { %v12658_v9 = vpop.permute.xlu1 %7463  ;;  %v7469_v53 = vmul.f32 %v12652_v39, %v12615_v40  ;;  %v7472_v2 = vmul.f32 %v12652_v39, %v12619_v27  ;;  %v12706_v37 = vld [vmem:[#allocation2 + $0x40] sm:$0xff] }
 0xa35   : > { %v12665_v32 = vsel %vm725_vm5, %v12652_v39, %v12658_v9  ;;  %v7474_v55 = vmul.f32 %v12658_v9, %v12622_v59  ;;  %v7471_v45 = vmul.f32 %v12658_v9, %v12603_v25  ;;  %v12716_v34 = vpack.i.bf16 %v12706_v37, %v12608_v62 }
 0xa36   : > { %v7473_v8 = vmul.f32 %v12665_v32, %v12592_v18  ;;  %v7470_v0 = vmul.f32 %v12665_v32, %v12586_v4  ;;  %v10073_v19 = vpack.i.bf16 %v7472_v2, %v7469_v53  ;;  %v7477_v51 = vmul.f32 %v12658_v9, %v12706_v37 }
 0xa37   : > { %v12673_v44 = vpop.permute.xlu0 %7611  ;;  %10054 = vrot.lane.b32.xlu0 %v12626_v7, %s13258_s1  ;;  %10084 = vrot.lane.b32.xlu1 %v12642_v11, %s13247_s2  ;;  %v12718_v3 = vld [vmem:[#allocation2 + $0x48] sm:$0xff]  ;;  %v7476_v20 = vmul.f32 %v12665_v32, %v12608_v62  ;;  %vm13339_vm5 = vcmask 916480  }
 0xa38   : > { %v12681_v46 = vpop.permute.xlu1 %7613  ;;  %v10088_v60 = vpack.i.bf16 %v7474_v55, %v7473_v8  ;;  %v10058_v50 = vpack.i.bf16 %v7471_v45, %v7470_v0  ;;  %v7619_v26 = vmul.f32 %v12673_v44, %v12615_v40  ;;  %v7622_v1 = vmul.f32 %v12673_v44, %v12619_v27  ;;  %v12739_v52 = vld [vmem:[#allocation2 + $0x58] sm:$0xff]  ;;  %vm13344_vm0 = vmmov %vm13339_vm5 }
 0xa39   : > { %v12686_v17 = vsel %vm775_vm6, %v12673_v44, %v12681_v46  ;;  %v7621_v54 = vmul.f32 %v12681_v46, %v12603_v25  ;;  %v7624_v57 = vmul.f32 %v12681_v46, %v12622_v59  ;;  %v12735_v12 = vpack.i.bf16 %v12718_v3, %v12726_v21  ;;  %vm13340_vm6 = vmmov %vm13339_vm5 }
 0xa3a   : > { %v7623_v24 = vmul.f32 %v12686_v17, %v12592_v18  ;;  %v7620_v48 = vmul.f32 %v12686_v17, %v12586_v4  ;;  %v10078_v45 = vpack.i.bf16 %v7622_v1, %v7619_v26  ;;  %v7626_v53 = vmul.f32 %v12686_v17, %v12608_v62  ;;  %vm13345_vm12 = vmmov %vm13344_vm0 }
 0xa3b   : > { %v12692_v16 = vpop.permute.xlu0 %7879  ;;  %10089 = vrot.lane.b32.xlu1 %v10088_v60, %s13261_s5  ;;  %10059 = vrot.lane.b32.xlu0 %v10058_v50, %s13261_s5  ;;  %v7627_v60 = vmul.f32 %v12681_v46, %v12706_v37  ;;  %v7630_v10 = vmul.f32 %v12681_v46, %v12739_v52  ;;  %vm13346_vm2 = vmmov %vm13344_vm0 }
 0xa3c   : > { %v12699_v13 = vpop.permute.xlu1 %7881  ;;  %v10093_v38 = vpack.i.bf16 %v7624_v57, %v7623_v24  ;;  %v10063_v43 = vpack.i.bf16 %v7621_v54, %v7620_v48  ;;  %v12769_v24 = vmul.f32 %v12570_v42, %v12726_v21  ;;  %v7890_v61 = vmul.f32 %v12692_v16, %v12619_v27 }
 0xa3d   : > { %v12764_v50 = vsel %vm850_vm7, %v12692_v16, %v12699_v13  ;;  %v10113_v23 = vpack.i.bf16 %v7627_v60, %v7626_v53  ;;  %v7892_v60 = vmul.f32 %v12699_v13, %v12622_v59  ;;  %vm13341_vm7 = vmmov %vm13339_vm5 }
 0xa3e   : > { %v7891_v53 = vmul.f32 %v12764_v50, %v12592_v18 }
 0xa3f   : > { %v12708_v33 = vpop.permute.xlu0 %8029  ;;  %10094 = vrot.lane.b32.xlu1 %v10093_v38, %s13246_s0  ;;  %10064 = vrot.lane.b32.xlu0 %v10063_v43, %s13246_s0  ;;  %v10108_v38 = vpack.i.bf16 %v7477_v51, %v7476_v20  ;;  %v12777_v43 = vpack.i.bf16 %v12739_v52, %v12637_v47  ;;  %v7480_v20 = vmul.f32 %v12658_v9, %v12739_v52 }
 0xa40   : > { %v12711_v15 = vpop.permute.xlu1 %8031 }
 0xa43   : > { %10099 = vrot.lane.b32.xlu1 %v12716_v34, %s13258_s1  ;;  %v12728_v5 = vpop.permute.xlu0 %8299  ;;  %10074 = vrot.lane.b32.xlu0 %v10073_v19, %s13261_s5  ;;  %v7888_v19 = vmul.f32 %v12764_v50, %v12586_v4 }
 0xa44   : > { %v8298_v58 = vpop.permute.xlu1 %8297  ;;  %v12773_v48 = vmul.f32 %v12728_v5, %v12603_v25  ;;  %v12783_v2 = vmul.f32 %v12728_v5, %v12622_v59 }
 0xa45   : > { %v12742_v55 = vmul.f32 %v8298_v58, %v12615_v40  ;;  %v12745_v8 = vmul.f32 %v8298_v58, %v12619_v27  ;;  %v12749_v0 = vsel %vm13329_vm3, %v8298_v58, %v12728_v5  ;;  %v12752_v54 = vmul.f32 %v8298_v58, %v12726_v21  ;;  %vm13351_vm3 = vmmov %vm13350_vm4 }
 0xa46   : > { %v12755_v57 = vmul.f32 %v8298_v58, %v12718_v3  ;;  %v12787_v26 = vmul.f32 %v12749_v0, %v12586_v4  ;;  %v12791_v1 = vmul.f32 %v12749_v0, %v12592_v18  ;;  %v12797_v58 = vmul.f32 %v12728_v5, %v12706_v37 }
 0xa47   : > { %10104 = vrot.lane.b32.xlu1 %v12735_v12, %s13258_s1  ;;  %10079 = vrot.lane.b32.xlu0 %v10078_v45, %s13246_s0  ;;  %v12802_v51 = vmul.f32 %v12749_v0, %v12608_v62  ;;  %v12808_v45 = vmul.f32 %v12570_v42, %v12718_v3  ;;  %v7889_v42 = vmul.f32 %v12699_v13, %v12603_v25 }
 0xa49   : > { %v10138_v41 = vpack.i.bf16 %v7889_v42, %v7888_v19  ;;  %v10143_v19 = vpack.i.bf16 %v7892_v60, %v7891_v53  ;;  %v7887_v42 = vmul.f32 %v12692_v16, %v12615_v40  ;;  %v7628_v60 = vmul.f32 %v12673_v44, %v12718_v3 }
 0xa4b   : > { %10109 = vrot.lane.b32.xlu1 %v10108_v38, %s13261_s5  ;;  %10119 = vrot.lane.b32.xlu0 %v12777_v43, %s13258_s1  ;;  %v7475_v38 = vmul.f32 %v12652_v39, %v12726_v21  ;;  %v10168_v6 = vpack.i.bf16 %v7890_v61, %v7887_v42  ;;  %v8039_v61 = vmul.f32 %v12711_v15, %v12603_v25 }
 0xa4c   : > { %v8037_v42 = vmul.f32 %v12708_v33, %v12615_v40  ;;  %v8040_v25 = vmul.f32 %v12708_v33, %v12619_v27  ;;  %v8045_v40 = vmul.f32 %v12711_v15, %v12706_v37 }
 0xa4f   : > { %10114 = vrot.lane.b32.xlu1 %v10113_v23, %s13246_s0  ;;  %10124 = vrot.lane.b32.xlu0 %v12626_v7, %s13247_s2  ;;  %v7479_v23 = vmul.f32 %v12665_v32, %v12637_v47  ;;  %v7625_v32 = vmul.f32 %v12673_v44, %v12726_v21 }
 0xa51   : > { %v10163_v9 = vpack.i.bf16 %v7480_v20, %v7479_v23  ;;  %v7629_v20 = vmul.f32 %v12686_v17, %v12637_v47  ;;  %v7895_v23 = vmul.f32 %v12699_v13, %v12706_v37  ;;  %v10153_v44 = vpack.i.bf16 %v7628_v60, %v7625_v32 }
 0xa52   : > { %v10198_v60 = vpack.i.bf16 %v8040_v25, %v8037_v42  ;;  %v8046_v37 = vmul.f32 %v12708_v33, %v12718_v3 }
 0xa53   : > { %10129 = vrot.lane.b32.xlu1 %v12716_v34, %s13247_s2  ;;  %10139 = vrot.lane.b32.xlu0 %v10138_v41, %s13248_s22  ;;  %v7478_v41 = vmul.f32 %v12652_v39, %v12718_v3  ;;  %v8033_v39 = vsel %vm899_vm8, %v12708_v33, %v12711_v15  ;;  %v10183_v46 = vpack.i.bf16 %v7630_v10, %v7629_v20 }
 0xa54   : > { %v8038_v17 = vmul.f32 %v8033_v39, %v12586_v4  ;;  %v8042_v4 = vmul.f32 %v12711_v15, %v12622_v59  ;;  %v8041_v32 = vmul.f32 %v8033_v39, %v12592_v18  ;;  %v7897_v59 = vmul.f32 %v12764_v50, %v12637_v47 }
 0xa55   : > { %v10148_v53 = vpack.i.bf16 %v7478_v41, %v7475_v38  ;;  %v7894_v38 = vmul.f32 %v12764_v50, %v12608_v62  ;;  %v7896_v41 = vmul.f32 %v12692_v16, %v12718_v3  ;;  %v8043_v18 = vmul.f32 %v12708_v33, %v12726_v21 }
 0xa56   : > { %v10188_v10 = vpack.i.bf16 %v8039_v61, %v8038_v17  ;;  %v10193_v27 = vpack.i.bf16 %v8042_v4, %v8041_v32  ;;  %v8047_v50 = vmul.f32 %v8033_v39, %v12637_v47  ;;  %v13330_v33 = vpack.i.bf16 %v12773_v48, %v12787_v26 }
 0xa57   : > { %10134 = vrot.lane.b32.xlu1 %v12735_v12, %s13247_s2  ;;  %10159 = vrot.lane.b32.xlu0 %v12777_v43, %s13247_s2 }
 0xa5b   : > { %10144 = vrot.lane.b32.xlu1 %v10143_v19, %s13248_s22  ;;  %10164 = vrot.lane.b32.xlu0 %v10163_v9, %s13261_s5  ;;  %v10173_v19 = vpack.i.bf16 %v7895_v23, %v7894_v38 }
 0xa5f   : > { %10149 = vrot.lane.b32.xlu1 %v10148_v53, %s13261_s5  ;;  %10169 = vrot.lane.b32.xlu0 %v10168_v6, %s13248_s22  ;;  %v7893_v6 = vmul.f32 %v12692_v16, %v12726_v21  ;;  %v8044_v16 = vmul.f32 %v8033_v39, %v12608_v62  ;;  %v7898_v53 = vmul.f32 %v12699_v13, %v12739_v52 }
 0xa60   : > { %v10208_v62 = vpack.i.bf16 %v8046_v37, %v8043_v18  ;;  %v8048_v13 = vmul.f32 %v12711_v15, %v12739_v52  ;;  %v8316_v15 = vmul.f32 %v12728_v5, %v12739_v52  ;;  %v13333_v21 = vpack.i.bf16 %v12797_v58, %v12802_v51 }
 0xa61   : > { %v10178_v9 = vpack.i.bf16 %v7896_v41, %v7893_v6  ;;  %v10203_v20 = vpack.i.bf16 %v8045_v40, %v8044_v16  ;;  %v10223_v23 = vpack.i.bf16 %v7898_v53, %v7897_v59 }
 0xa63   : > { %10154 = vrot.lane.b32.xlu1 %v10153_v44, %s13246_s0  ;;  %10184 = vrot.lane.b32.xlu0 %v10183_v46, %s13246_s0  ;;  %s619_s0 = scalar_lea.vmem %s13178_s18, %s8866_s11 }
 0xa67   : > { %10174 = vrot.lane.b32.xlu1 %v10173_v19, %s13248_s22  ;;  %10189 = vrot.lane.b32.xlu0 %v10188_v10, %s13249_s24 }
 0xa6b   : > { %10179 = vrot.lane.b32.xlu1 %v10178_v9, %s13248_s22  ;;  %10199 = vrot.lane.b32.xlu0 %v10198_v60, %s13249_s24 }
 0xa6f   : > { %10194 = vrot.lane.b32.xlu1 %v10193_v27, %s13249_s24  ;;  %10214 = vrot.lane.b32.xlu0 %v12613_v63, %s13250_s25  ;;  %v10238_v63 = vpack.i.bf16 %v8048_v13, %v8047_v50 }
 0xa73   : > { %10204 = vrot.lane.b32.xlu1 %v10203_v20, %s13249_s24  ;;  %10224 = vrot.lane.b32.xlu0 %v10223_v23, %s13248_s22 }
 0xa77   : > { %10209 = vrot.lane.b32.xlu1 %v10208_v62, %s13249_s24  ;;  %10229 = vrot.lane.b32.xlu0 %v12626_v7, %s13250_s25  ;;  %v8315_v7 = vmul.f32 %v12749_v0, %v12637_v47  ;;  %v13334_v47 = vpack.i.bf16 %v12755_v57, %v12752_v54 }
 0xa79   : > { %v10273_v3 = vpack.i.bf16 %v8316_v15, %v8315_v7 }
 0xa7b   : > { %10219 = vrot.lane.b32.xlu1 %v12642_v11, %s13250_s25  ;;  %10239 = vrot.lane.b32.xlu0 %v10238_v63, %s13249_s24  ;;  %v13331_v11 = vpack.i.bf16 %v12783_v2, %v12791_v1 }
 0xa7f   : > { %10234 = vrot.lane.b32.xlu1 %v12716_v34, %s13250_s25  ;;  %10244 = vrot.lane.b32.xlu0 %v12777_v43, %s13250_s25  ;;  %v13332_v34 = vpack.i.bf16 %v12745_v8, %v12742_v55 }
 0xa83   : > { %10249 = vrot.lane.b32.xlu1 %v12735_v12, %s13250_s25  ;;  %10254 = vrot.lane.b32.xlu0 %v13330_v33, %s13252_s29 }
 0xa87   : > { %10259 = vrot.lane.b32.xlu1 %v13331_v11, %s13252_s29  ;;  %10264 = vrot.lane.b32.xlu0 %v13332_v34, %s13252_s29  ;;  %v8846_v11 = vld [vmem:[%s13177_s17 + $0x4] sm:$0xf]  ;;  %v13335_v34 = vpack.c.bf16 %v12600_v56, %v12597_v22  ;;  %v13337_v22 = vpack.c.bf16 %v12650_v49, %v12647_v31  ;;  %v13338_v31 = vpack.c.bf16 %v12808_v45, %v12769_v24 }
 0xa8b   : > { %10269 = vrot.lane.b32.xlu1 %v13333_v21, %s13252_s29  ;;  %10274 = vrot.lane.b32.xlu0 %v10273_v3, %s13252_s29 }
 0xa8f   : > { %10279 = vrot.lane.b32.xlu1 %v13334_v47, %s13252_s29  ;;  %v13336_v47 = vpack.c.bf16 %v12634_v35, %v12630_v30 }
 0xaa1   : > { %v10045_v12 = vpop.permute.xlu0 %10044 }
 0xaa2   : > { %v10047_v5 = vunpack.i.h.bf16 %v10045_v12  ;;  %v10046_v52 = vunpack.i.l.bf16 %v10045_v12 }
 0xaa4   : > { %v7288_v43 = vsel %vm713_vm9, %v10046_v52, %v10047_v5 }
 0xaa5   : > { %v12945_v0 = vpop.permute.xlu0 %10049  ;;  %v10070_v55 = vpop.permute.xlu1 %10069 }
 0xaa6   : > { %v10072_v8 = vunpack.i.h.bf16 %v10070_v55  ;;  %v10071_v48 = vunpack.i.l.bf16 %v10070_v55 }
 0xaa8   : > { %v7290_v2 = vsel %vm713_vm9, %v10071_v48, %v10072_v8 }
 0xaa9   : > { %v10055_v26 = vpop.permute.xlu0 %10054  ;;  %v12949_v1 = vpop.permute.xlu1 %10084  ;;  %v9065_v58 = vpack.c.bf16 %v7290_v2, %v7288_v43 }
 0xaaa   : > { %v10057_v51 = vunpack.i.h.bf16 %v10055_v26  ;;  %v10056_v39 = vunpack.i.l.bf16 %v10055_v26 }
 0xaab   : > { %9066 = vmatprep.subr.bf16.mxu0 %v9065_v58 }
 0xaac   : > { %v7287_v54 = vsel %vm713_vm9, %v10056_v39, %v10046_v52  ;;  %v7289_v57 = vsel %vm713_vm9, %v10057_v51, %v10071_v48  ;;  %v7244_v51 = vld [vmem:[%s13177_s17] sm:$0xf] }
 0xaad   : > { %v9067_v44 = vpack.c.bf16 %v7289_v57, %v7287_v54  ;;  %v10090_v38 = vpop.permute.xlu1 %10089  ;;  %v10060_v61 = vpop.permute.xlu0 %10059 }
 0xaae   : > { %v10062_v13 = vunpack.i.h.bf16 %v10060_v61  ;;  %v10061_v50 = vunpack.i.l.bf16 %v10060_v61  ;;  %v10092_v63 = vunpack.i.h.bf16 %v10090_v38  ;;  %v10091_v33 = vunpack.i.l.bf16 %v10090_v38 }
 0xaaf   : > { %9068 = vmatpush1.bf16.msra.mxu0 %v9067_v44 }
 0xab0   : > { %v7520_v5 = vsel %vm764_vm10, %v10061_v50, %v10062_v13  ;;  %v7522_v52 = vsel %vm764_vm10, %v10091_v33, %v10092_v63  ;;  %v10086_v13 = vunpack.i.l.bf16 %v12949_v1 }
 0xab1   : > { %v12953_v46 = vpop.permute.xlu1 %10094  ;;  %v12955_v17 = vpop.permute.xlu0 %10064  ;;  %v9081_v48 = vpack.c.bf16 %v7522_v52, %v7520_v5 }
 0xab2   : > { %v10097_v56 = vunpack.i.h.bf16 %v12953_v46  ;;  %v10096_v8 = vunpack.i.l.bf16 %v12953_v46  ;;  %v10067_v43 = vunpack.i.h.bf16 %v12955_v17  ;;  %v10066_v2 = vunpack.i.l.bf16 %v12955_v17 }
 0xab4   : > { %v7672_v38 = vsel %vm13339_vm5, %v10096_v8, %v10097_v56  ;;  %v7670_v17 = vsel %vm13340_vm6, %v10066_v2, %v10067_v43  ;;  %vm13353_vm6 = vmmov %vm13351_vm3 }
 0xab5   : > { %v10100_v6 = vpop.permute.xlu1 %10099  ;;  %v10075_v41 = vpop.permute.xlu0 %10074 }
 0xab6   : > { %v10102_v25 = vunpack.i.h.bf16 %v10100_v6  ;;  %v10101_v10 = vunpack.i.l.bf16 %v10100_v6  ;;  %v10077_v3 = vunpack.i.h.bf16 %v10075_v41  ;;  %v10076_v21 = vunpack.i.l.bf16 %v10075_v41 }
 0xab8   : > { %v7292_v18 = vsel %vm713_vm9, %v10101_v10, %v10102_v25  ;;  %v7519_v30 = vsel %vm764_vm10, %v10076_v21, %v10061_v50  ;;  %v7521_v35 = vsel %vm764_vm10, %v10077_v3, %v10091_v33  ;;  %v10052_v33 = vunpack.i.h.bf16 %v12945_v0 }
 0xab9   : > { %v10105_v19 = vpop.permute.xlu1 %10104  ;;  %v12957_v42 = vpop.permute.xlu0 %10079  ;;  %v9083_v54 = vpack.c.bf16 %v7521_v35, %v7519_v30 }
 0xaba   : > { %v10106_v4 = vunpack.i.l.bf16 %v10105_v19  ;;  %v10107_v60 = vunpack.i.h.bf16 %v10105_v19  ;;  %v10082_v61 = vunpack.i.h.bf16 %v12957_v42  ;;  %v10081_v6 = vunpack.i.l.bf16 %v12957_v42 }
 0xabc   : > { %v7291_v16 = vsel %vm713_vm9, %v10106_v4, %v10101_v10 }
 0xabd   : > { %v12959_v9 = vpop.permute.xlu1 %10109  ;;  %v10120_v32 = vpop.permute.xlu0 %10119 }
 0xabe   : > { %v10122_v40 = vunpack.i.h.bf16 %v10120_v32  ;;  %v10121_v27 = vunpack.i.l.bf16 %v10120_v32  ;;  %v10112_v26 = vunpack.i.h.bf16 %v12959_v9  ;;  %v10111_v58 = vunpack.i.l.bf16 %v12959_v9 }
 0xac0   : > { %v7293_v53 = vsel %vm713_vm9, %v10107_v60, %v10121_v27  ;;  %v7294_v37 = vsel %vm713_vm9, %v10121_v27, %v10122_v40  ;;  %v7524_v45 = vsel %vm764_vm10, %v10111_v58, %v10112_v26  ;;  %vm13342_vm9 = vmmov %vm13339_vm5 }
 0xac1   : > { %v12963_v59 = vpop.permute.xlu1 %10114  ;;  %v9071_v20 = vpack.c.bf16 %v7293_v53, %v7291_v16  ;;  %v12967_v23 = vpop.permute.xlu0 %10124  ;;  %v9069_v62 = vpack.c.bf16 %v7294_v37, %v7292_v18  ;;  %v9089_v16 = vpack.c.bf16 %v7672_v38, %v7670_v17  ;;  %v7669_v53 = vsel %vm13341_vm7, %v10081_v6, %v10066_v2  ;;  %vm13354_vm7 = vmmov %vm13351_vm3 }
 0xac2   : > { %v10117_v32 = vunpack.i.h.bf16 %v12963_v59  ;;  %v10116_v60 = vunpack.i.l.bf16 %v12963_v59  ;;  %v7671_v42 = vsel %vm13342_vm9, %v10082_v61, %v10096_v8  ;;  %v8849_v59 = vld [vmem:[%s13177_s17 + $0x8] sm:$0xf]  ;;  %v10127_v21 = vunpack.i.h.bf16 %v12967_v23 }
 0xac3   : > { %9070 = vmatprep.subr.bf16.mxu0 %v9069_v62  ;;  %v10087_v62 = vunpack.i.h.bf16 %v12949_v1  ;;  %v9091_v3 = vpack.c.bf16 %v7671_v42, %v7669_v53  ;;  %vm13355_vm9 = vcmask 900096  }
 0xac4   : > { %9072 = vmatpush1.bf16.msra.mxu0 %v9071_v20  ;;  %v7789_v26 = vsel %vm13350_vm4, %v10127_v21, %v10086_v13 }
 0xac5   : > { %v12969_v7 = vpop.permute.xlu1 %10129  ;;  %v12974_v15 = vpop.permute.xlu0 %10139  ;;  %9074 = vmatprep.subr.bf16.mxu0 %v13335_v34  ;;  %v10126_v34 = vunpack.i.l.bf16 %v12967_v23  ;;  %v7790_v23 = vsel %vm13347_vm14, %v10086_v13, %v10087_v62  ;;  %v8853_v62 = vld [vmem:[%s13177_s17 + $0x10] sm:$0xf] }
 0xac6   : > { %v10131_v43 = vunpack.i.l.bf16 %v12969_v7 }
 0xac7   : > { %8847 = vmatmul.mubr.msk.f32.vlgmr.msra.gmra.mrb[18].mxu0 %vm899_vm8, %v8846_v11  ;;  %v10051_v11 = vunpack.i.l.bf16 %v12945_v0 }
 0xac8   : > { %9076 = vmatpush1.bf16.msra.mxu0 %v13336_v47  ;;  %7444 = vmatprep.mubr.f32.mxu0 %v10940_v36 }
 0xac9   : > { %v12983_v12 = vpop.permute.xlu1 %10134  ;;  %v12988_v55 = vpop.permute.xlu0 %10159  ;;  %9078 = vmatprep.subr.bf16.mxu0 %v13337_v22  ;;  %v7787_v35 = vsel %vm13348_vm11, %v10126_v34, %v10051_v11  ;;  %v7788_v2 = vsel %vm13349_vm13, %v10051_v11, %v10052_v33  ;;  %vm13362_vm13 = vcmask 785408  }
 0xaca   : > { %v10162_v8 = vunpack.i.h.bf16 %v12988_v55  ;;  %v10161_v30 = vunpack.i.l.bf16 %v12988_v55  ;;  %v10136_v55 = vunpack.i.l.bf16 %v12983_v12  ;;  %v9099_v61 = vpack.c.bf16 %v7789_v26, %v7787_v35 }
 0xacc   : > { %9080 = vmatpush1.bf16.msra.mxu0 %v13338_v31  ;;  %v7794_v38 = vsel %vm13351_vm3, %v10161_v30, %v10162_v8  ;;  %v7791_v17 = vsel %vm13354_vm7, %v10136_v55, %v10131_v43 }
 0xacd   : > { %v13004_v49 = vpop.permute.xlu1 %10144  ;;  %v10165_v39 = vpop.permute.xlu0 %10164  ;;  %9082 = vmatprep.subr.bf16.mxu0 %v9081_v48  ;;  %v10132_v48 = vunpack.i.h.bf16 %v12969_v7  ;;  %v8851_v7 = vld [vmem:[%s13177_s17 + $0xc] sm:$0xf] }
 0xace   : > { %v10167_v57 = vunpack.i.h.bf16 %v10165_v39  ;;  %v10166_v44 = vunpack.i.l.bf16 %v10165_v39 }
 0xacf   : > { %8848 = vmatmul.mubr.msk.f32.vlgmr.msra.gmra.mrb[18].mxu0 %vm899_vm8, %v7244_v51 }
 0xad0   : > { %9084 = vmatpush1.bf16.msra.mxu0 %v9083_v54  ;;  %v7526_v46 = vsel %vm764_vm10, %v10166_v44, %v10167_v57  ;;  %7602 = vmatprep.mubr.f32.mxu0 %v10940_v36  ;;  %v9097_v54 = vpack.c.bf16 %v7790_v23, %v7788_v2  ;;  %v10147_v57 = vunpack.i.h.bf16 %v13004_v49 }
 0xad1   : > { %v10150_v24 = vpop.permute.xlu1 %10149  ;;  %v13017_v41 = vpop.permute.xlu0 %10169  ;;  %v9085_v10 = vpack.c.bf16 %v7526_v46, %v7524_v45 }
 0xad2   : > { %v10152_v19 = vunpack.i.h.bf16 %v10150_v24  ;;  %v10151_v25 = vunpack.i.l.bf16 %v10150_v24  ;;  %v10142_v24 = vunpack.i.h.bf16 %v12974_v15  ;;  %v10171_v6 = vunpack.i.l.bf16 %v13017_v41 }
 0xad3   : > { %9086 = vmatprep.subr.bf16.mxu0 %v9085_v10 }
 0xad4   : > { %v7525_v4 = vsel %vm764_vm10, %v10152_v19, %v10166_v44  ;;  %v7523_v9 = vsel %vm764_vm10, %v10151_v25, %v10111_v58  ;;  %vm13343_vm10 = vmmov %vm13339_vm5  ;;  %v10137_v58 = vunpack.i.h.bf16 %v12983_v12  ;;  %v10146_v44 = vunpack.i.l.bf16 %v13004_v49 }
 0xad5   : > { %v9087_v40 = vpack.c.bf16 %v7525_v4, %v7523_v9  ;;  %v10155_v27 = vpop.permute.xlu1 %10154  ;;  %v10185_v18 = vpop.permute.xlu0 %10184  ;;  %v7674_v1 = vsel %vm13343_vm10, %v10116_v60, %v10117_v32  ;;  %v10141_v12 = vunpack.i.l.bf16 %v12974_v15  ;;  %vm13352_vm5 = vmmov %vm13351_vm3  ;;  %v10172_v49 = vunpack.i.h.bf16 %v13017_v41 }
 0xad6   : > { %v10157_v37 = vunpack.i.h.bf16 %v10155_v27  ;;  %v10156_v20 = vunpack.i.l.bf16 %v10155_v27  ;;  %v10187_v50 = vunpack.i.h.bf16 %v10185_v18  ;;  %v10186_v63 = vunpack.i.l.bf16 %v10185_v18  ;;  %vm13356_vm10 = vmmov %vm13355_vm9 }
 0xad7   : > { %9088 = vmatpush1.bf16.msra.mxu0 %v9087_v40  ;;  %v7792_v45 = vsel %vm13352_vm5, %v10131_v43, %v10132_v48  ;;  %v7793_v46 = vsel %vm13353_vm6, %v10137_v58, %v10161_v30  ;;  %v7940_v15 = vsel %vm13355_vm9, %v10146_v44, %v10147_v57  ;;  %v7938_v9 = vsel %vm13356_vm10, %v10141_v12, %v10142_v24  ;;  %vm13364_vm3 = vmmov %vm13362_vm13 }
 0xad8   : > { %9090 = vmatprep.subr.bf16.mxu0 %v9089_v16  ;;  %v7676_v5 = vsel %vm13344_vm0, %v10186_v63, %v10187_v50  ;;  %v7675_v52 = vsel %vm13345_vm12, %v10157_v37, %v10186_v63  ;;  %v7673_v22 = vsel %vm13346_vm2, %v10156_v20, %v10116_v60  ;;  %v9101_v10 = vpack.c.bf16 %v7794_v38, %v7792_v45  ;;  %vm13357_vm0 = vmmov %vm13355_vm9 }
 0xad9   : > { %v13034_v47 = vpop.permute.xlu1 %10174  ;;  %v13040_v56 = vpop.permute.xlu0 %10189  ;;  %v9093_v0 = vpack.c.bf16 %v7676_v5, %v7674_v1  ;;  %v9095_v31 = vpack.c.bf16 %v7675_v52, %v7673_v22  ;;  %v9103_v4 = vpack.c.bf16 %v7793_v46, %v7791_v17  ;;  %v7937_v32 = vsel %vm13357_vm0, %v10171_v6, %v10141_v12  ;;  %vm13358_vm12 = vmmov %vm13357_vm0 }
 0xada   : > { %8850 = vmatmul.mubr.msk.f32.vlgmr.msra.gmra.mrb[18].mxu0 %vm899_vm8, %v8849_v59  ;;  %v7939_v60 = vsel %vm13358_vm12, %v10172_v49, %v10146_v44  ;;  %v10177_v41 = vunpack.i.h.bf16 %v13034_v47  ;;  %v10176_v40 = vunpack.i.l.bf16 %v13034_v47  ;;  %v9105_v53 = vpack.c.bf16 %v7940_v15, %v7938_v9  ;;  %vm13359_vm2 = vmmov %vm13357_vm0 }
 0xadb   : > { %9092 = vmatpush1.bf16.msra.mxu0 %v9091_v3  ;;  %7752 = vmatprep.mubr.f32.mxu0 %v10940_v36  ;;  %v9107_v13 = vpack.c.bf16 %v7939_v60, %v7937_v32  ;;  %v10192_v59 = vunpack.i.h.bf16 %v13040_v56  ;;  %v10191_v33 = vunpack.i.l.bf16 %v13040_v56  ;;  %vm13360_vm14 = vmmov %vm13357_vm0 }
 0xadc   : > { %9094 = vmatprep.subr.bf16.mxu0 %v9093_v0  ;;  %v7942_v34 = vsel %vm13359_vm2, %v10176_v40, %v10177_v41  ;;  %vm13361_vm11 = vmmov %vm13357_vm0 }
 0xadd   : > { %v10180_v51 = vpop.permute.xlu1 %10179  ;;  %v13054_v39 = vpop.permute.xlu0 %10199  ;;  %vm13363_vm4 = vmmov %vm13357_vm0  ;;  %v8088_v35 = vsel %vm13364_vm3, %v10191_v33, %v10192_v59 }
 0xade   : > { %v10182_v50 = vunpack.i.h.bf16 %v10180_v51  ;;  %v10181_v63 = vunpack.i.l.bf16 %v10180_v51  ;;  %v10201_v5 = vunpack.i.l.bf16 %v13054_v39  ;;  %v10202_v22 = vunpack.i.h.bf16 %v13054_v39  ;;  %vm13365_vm5 = vmmov %vm13364_vm3  ;;  %v8855_v39 = vld [vmem:[%s13177_s17 + $0x14] sm:$0xf] }
 0xadf   : > { %9096 = vmatpush1.bf16.msra.mxu0 %v9095_v31  ;;  %vm13366_vm6 = vmmov %vm13364_vm3 }
 0xae0   : > { %9098 = vmatprep.subr.bf16.mxu0 %v9097_v54  ;;  %v7941_v56 = vsel %vm13363_vm4, %v10181_v63, %v10176_v40  ;;  %v8087_v55 = vsel %vm13366_vm6, %v10201_v5, %v10191_v33  ;;  %vm13367_vm7 = vmmov %vm13364_vm3 }
 0xae1   : > { %v10195_v19 = vpop.permute.xlu1 %10194  ;;  %v13069_v25 = vpop.permute.xlu0 %10214  ;;  %vm13368_vm9 = vmmov %vm13364_vm3 }
 0xae2   : > { %8852 = vmatmul.mubr.msk.f32.vlgmr.msra.gmra.mrb[18].mxu0 %vm899_vm8, %v8851_v7  ;;  %v10197_v42 = vunpack.i.h.bf16 %v10195_v19  ;;  %v10196_v18 = vunpack.i.l.bf16 %v10195_v19  ;;  %v10217_v54 = vunpack.i.h.bf16 %v13069_v25  ;;  %v10216_v57 = vunpack.i.l.bf16 %v13069_v25  ;;  %vm13369_vm10 = vmmov %vm13364_vm3 }
 0xae3   : > { %9100 = vmatpush1.bf16.msra.mxu0 %v9099_v61  ;;  %7870 = vmatprep.mubr.f32.mxu0 %v10940_v36  ;;  %vm13370_vm0 = vmmov %vm13364_vm3 }
 0xae4   : > { %9102 = vmatprep.subr.bf16.mxu0 %v9101_v10  ;;  %v8090_v52 = vsel %vm13362_vm13, %v10196_v18, %v10197_v42  ;;  %v8089_v48 = vsel %vm13365_vm5, %v10202_v22, %v10196_v18  ;;  %v8206_v32 = vsel %vm964_vm15, %v10216_v57, %v10217_v54 }
 0xae5   : > { %v13079_v27 = vpop.permute.xlu1 %10204  ;;  %v10225_v16 = vpop.permute.xlu0 %10224  ;;  %v9113_v58 = vpack.c.bf16 %v8090_v52, %v8088_v35  ;;  %v9115_v38 = vpack.c.bf16 %v8089_v48, %v8087_v55 }
 0xae6   : > { %v10227_v37 = vunpack.i.h.bf16 %v10225_v16  ;;  %v10226_v20 = vunpack.i.l.bf16 %v10225_v16  ;;  %v10207_v8 = vunpack.i.h.bf16 %v13079_v27  ;;  %v10206_v30 = vunpack.i.l.bf16 %v13079_v27 }
 0xae7   : > { %9104 = vmatpush1.bf16.msra.mxu0 %v9103_v4 }
 0xae8   : > { %9106 = vmatprep.subr.bf16.mxu0 %v9105_v53  ;;  %v7944_v3 = vsel %vm13360_vm14, %v10226_v20, %v10227_v37  ;;  %v7943_v21 = vsel %vm13361_vm11, %v10182_v50, %v10226_v20  ;;  %v8092_v24 = vsel %vm13367_vm7, %v10206_v30, %v10207_v8  ;;  %v8857_v20 = vld [vmem:[%s13177_s17 + $0x18] sm:$0xf] }
 0xae9   : > { %v10210_v11 = vpop.permute.xlu1 %10209  ;;  %v13089_v47 = vpop.permute.xlu0 %10229  ;;  %v9109_v1 = vpack.c.bf16 %v7944_v3, %v7942_v34  ;;  %v9111_v0 = vpack.c.bf16 %v7943_v21, %v7941_v56 }
 0xaea   : > { %8854 = vmatmul.mubr.msk.f32.vlgmr.msra.gmra.mrb[18].mxu0 %vm899_vm8, %v8853_v62  ;;  %v10212_v44 = vunpack.i.h.bf16 %v10210_v11  ;;  %v10211_v7 = vunpack.i.l.bf16 %v10210_v11  ;;  %v10232_v25 = vunpack.i.h.bf16 %v13089_v47  ;;  %v10231_v4 = vunpack.i.l.bf16 %v13089_v47 }
 0xaeb   : > { %9108 = vmatpush1.bf16.msra.mxu0 %v9107_v13  ;;  %8020 = vmatprep.mubr.f32.mxu0 %v10940_v36 }
 0xaec   : > { %9110 = vmatprep.subr.bf16.mxu0 %v9109_v1  ;;  %v8091_v9 = vsel %vm13370_vm0, %v10211_v7, %v10206_v30  ;;  %v8205_v62 = vsel %vm964_vm15, %v10231_v4, %v10216_v57 }
 0xaed   : > { %v10220_v23 = vpop.permute.xlu1 %10219  ;;  %v10240_v43 = vpop.permute.xlu0 %10239 }
 0xaee   : > { %v10222_v2 = vunpack.i.h.bf16 %v10220_v23  ;;  %v10221_v26 = vunpack.i.l.bf16 %v10220_v23  ;;  %v10242_v31 = vunpack.i.h.bf16 %v10240_v43  ;;  %v10241_v51 = vunpack.i.l.bf16 %v10240_v43 }
 0xaef   : > { %9112 = vmatpush1.bf16.msra.mxu0 %v9111_v0 }
 0xaf0   : > { %9114 = vmatprep.subr.bf16.mxu0 %v9113_v58  ;;  %v8094_v12 = vsel %vm13368_vm9, %v10241_v51, %v10242_v31  ;;  %v8208_v45 = vsel %vm964_vm15, %v10221_v26, %v10222_v2  ;;  %v8093_v46 = vsel %vm13369_vm10, %v10212_v44, %v10241_v51  ;;  %v8207_v41 = vsel %vm964_vm15, %v10232_v25, %v10221_v26  ;;  %v8859_v58 = vld [vmem:[%s13177_s17 + $0x1c] sm:$0xf] }
 0xaf1   : > { %v10235_v61 = vpop.permute.xlu1 %10234  ;;  %v10245_v17 = vpop.permute.xlu0 %10244  ;;  %v9117_v19 = vpack.c.bf16 %v8094_v12, %v8092_v24  ;;  %v9119_v60 = vpack.c.bf16 %v8093_v46, %v8091_v9  ;;  %v9121_v27 = vpack.c.bf16 %v8208_v45, %v8206_v32  ;;  %v9123_v63 = vpack.c.bf16 %v8207_v41, %v8205_v62  ;;  %v8861_v24 = vld [vmem:[%s13177_s17 + $0x20] sm:$0xf] }
 0xaf2   : > { %v10237_v49 = vunpack.i.h.bf16 %v10235_v61  ;;  %v10236_v6 = vunpack.i.l.bf16 %v10235_v61  ;;  %8856 = vmatmul.mubr.msk.f32.vlgmr.msra.gmra.mrb[18].mxu0 %vm899_vm8, %v8855_v39  ;;  %v10247_v10 = vunpack.i.h.bf16 %v10245_v17  ;;  %v10246_v15 = vunpack.i.l.bf16 %v10245_v17 }
 0xaf3   : > { %9116 = vmatpush1.bf16.msra.mxu0 %v9115_v38  ;;  %8170 = vmatprep.mubr.f32.mxu0 %v10940_v36  ;;  %v8450_v12 = vrot.slane %v10553_v14, %v10579_v28  ;;  %v8454_v45 = vrot.slane %v10553_v14, %v10581_v29 }
 0xaf4   : > { %9118 = vmatprep.subr.bf16.mxu0 %v9117_v19  ;;  %v8210_v18 = vsel %vm964_vm15, %v10236_v6, %v10237_v49  ;;  %v8212_v37 = vsel %vm964_vm15, %v10246_v15, %v10247_v10  ;;  %v13372_v10 = vld [vmem:[#allocation10_spill] sm:$0xff] }
 0xaf5   : > { %v10250_v40 = vpop.permute.xlu1 %10249  ;;  %v10255_v16 = vpop.permute.xlu0 %10254  ;;  %v9125_v33 = vpack.c.bf16 %v8212_v37, %v8210_v18 }
 0xaf6   : > { %v10252_v53 = vunpack.i.h.bf16 %v10250_v40  ;;  %v10251_v42 = vunpack.i.l.bf16 %v10250_v40  ;;  %v10257_v13 = vunpack.i.h.bf16 %v10255_v16  ;;  %v10256_v50 = vunpack.i.l.bf16 %v10255_v16 }
 0xaf7   : > { %9120 = vmatpush1.bf16.msra.mxu0 %v9119_v60 }
 0xaf8   : > { %9122 = vmatprep.subr.bf16.mxu0 %v9121_v27  ;;  %v8211_v11 = vsel %vm964_vm15, %v10252_v53, %v10246_v15  ;;  %v8209_v34 = vsel %vm964_vm15, %v10251_v42, %v10236_v6  ;;  %v8356_v52 = vsel %vm1012_vm1, %v10256_v50, %v10257_v13  ;;  %v13371_v6 = vld [vmem:[#allocation9_spill] sm:$0xff] }
 0xaf9   : > { %v10260_v59 = vpop.permute.xlu1 %10259  ;;  %v10265_v3 = vpop.permute.xlu0 %10264  ;;  %v9127_v56 = vpack.c.bf16 %v8211_v11, %v8209_v34 }
 0xafa   : > { %v10262_v21 = vunpack.i.h.bf16 %v10260_v59  ;;  %v10261_v47 = vunpack.i.l.bf16 %v10260_v59  ;;  %8858 = vmatmul.mubr.msk.f32.vlgmr.msra.gmra.mrb[18].mxu0 %vm899_vm8, %v8857_v20  ;;  %v10267_v1 = vunpack.i.h.bf16 %v10265_v3  ;;  %v10266_v5 = vunpack.i.l.bf16 %v10265_v3 }
 0xafb   : > { %9124 = vmatpush1.bf16.msra.mxu0 %v9123_v63  ;;  %8288 = vmatprep.mubr.f32.mxu0 %v10940_v36 }
 0xafc   : > { %9126 = vmatprep.subr.bf16.mxu0 %v9125_v33  ;;  %v8358_v22 = vsel %vm1012_vm1, %v10261_v47, %v10262_v21  ;;  %v8355_v30 = vsel %vm1012_vm1, %v10266_v5, %v10256_v50  ;;  %v8357_v23 = vsel %vm1012_vm1, %v10267_v1, %v10261_v47 }
 0xafd   : > { %v10270_v0 = vpop.permute.xlu1 %10269  ;;  %v9129_v8 = vpack.c.bf16 %v8358_v22, %v8356_v52  ;;  %v10275_v35 = vpop.permute.xlu0 %10274  ;;  %v9131_v31 = vpack.c.bf16 %v8357_v23, %v8355_v30 }
 0xafe   : > { %v10272_v48 = vunpack.i.h.bf16 %v10270_v0  ;;  %v10271_v43 = vunpack.i.l.bf16 %v10270_v0  ;;  %v10277_v2 = vunpack.i.h.bf16 %v10275_v35  ;;  %v10276_v26 = vunpack.i.l.bf16 %v10275_v35 }
 0xaff   : > { %9128 = vmatpush1.bf16.msra.mxu0 %v9127_v56 }
 0xb00   : > { %9130 = vmatprep.subr.bf16.mxu0 %v9129_v8  ;;  %v8360_v55 = vsel %vm1012_vm1, %v10271_v43, %v10272_v48  ;;  %v8362_v39 = vsel %vm1012_vm1, %v10276_v26, %v10277_v2 }
 0xb01   : > { %v10280_v51 = vpop.permute.xlu1 %10279  ;;  %v9133_v44 = vpack.c.bf16 %v8362_v39, %v8360_v55 }
 0xb02   : > { %v10282_v54 = vunpack.i.h.bf16 %v10280_v51  ;;  %v10281_v57 = vunpack.i.l.bf16 %v10280_v51  ;;  %8860 = vmatmul.mubr.msk.f32.vlgmr.msra.gmra.mrb[18].mxu0 %vm899_vm8, %v8859_v58 }
 0xb03   : > { %9132 = vmatpush1.bf16.msra.mxu0 %v9131_v31  ;;  %8438 = vmatprep.mubr.f32.mxu0 %v10940_v36 }
 0xb04   : > { %v8361_v7 = vsel %vm1012_vm1, %v10282_v54, %v10276_v26  ;;  %v8359_v38 = vsel %vm1012_vm1, %v10281_v57, %v10271_v43  ;;  %9134 = vmatprep.subr.bf16.mxu0 %v9133_v44 }
 0xb05   : > { %v9135_v61 = vpack.c.bf16 %v8361_v7, %v8359_v38 }
 0xb07   : > { %9136 = vmatpush1.bf16.msra.mxu0 %v9135_v61 }
 0xb0a   : > { %8862 = vmatmul.mubr.msk.f32.vlgmr.msra.gmra.mrb[18].mxu0 %vm899_vm8, %v8861_v24 }
 0xbdd   : > { %v8440_v36 = vpop.f32.mrb[18].mxu0 }
 0xbde   : > { %v8457_v46 = vadd.f32 %v8450_v12, %v8440_v36  ;;  %v8442_v17 = vpop.f32.mrb[19].mxu0 }
 0xbdf   : > { %v8458_v49 = vadd.f32 %v8454_v45, %v8442_v17 }
 0xbe0   : > { %v8459_v19 = vmul.f32 %v8457_v46, %v13371_v6 }
 0xbe1   : > { %v8460_v25 = vmul.f32 %v8458_v49, %v13371_v6 }
 0xbe2   : > { %v8461_v15 = vadd.f32 %v8459_v19, %v13372_v10 }
 0xbe3   : > { %v8462_v4 = vadd.f32 %v8460_v25, %v13372_v10 }
 0xbe5   : > { %v8465_v28 = vcombine.low %v8461_v15, %v8462_v4 }
 0xbe7   : > { %8467 = vst [vmem:[%s619_s0] sm:$0xff] %v8465_v28 }
 0xbe8 PF: > { %s30_s27 = sadd.s32 1, %s10330_s27  }
 0xbe9   : > { %p27_p5 = scmp.ge.s32.totalorder %s30_s27, 4  }
 0xbeb   :  { %29 = sbr.rel (!%p27_p5) target bundleno = 14 (0xe), region = 185 }
 0xbf2   :  { %8489 = vsyncpa [#allocation4], 1 }
 0xbf3   :  { %8491 = vsyncpa [#allocation4 + $0x1], 1 }
 0xbf4   :  { %8492 = vsyncpa [#allocation6], 1 }

</bundles_post_ra>
